<compile_context>
chip_gen: v6e
topology: v6e:2x2x1
jax: 0.10.0
libtpu: 0.0.40
codegen_flags: <defaults>
</compile_context>

<pallas_src>
import functools

import jax
import jax.numpy as jnp
from jax.experimental import pallas as pl
from jax.experimental.pallas import tpu as pltpu


# ---------------------------------------------------------------------------
# Fused kernel: conv stack + concatenated heads, whole batch in one step
# ---------------------------------------------------------------------------
def _fused_head_kernel(x_ref, mask_ref, wconv_ref, bconv_ref, whead_ref,
                       bhead_ref, o_ref, feat_ref, slab_ref,
                       *, H, W, B, Cp, F, n_layers, LO):
    """Refs (single grid step, whole batch):
      x_ref:     (B, Cp, H*W)   bf16   input, channel-padded, channel-major flat
      mask_ref:  (2, H*W)       bf16   [x>0, x<W-1] column-edge masks
      wconv_ref: (L, F, 9*Cp)   bf16   BN-folded conv weights (tap-major K)
      bconv_ref: (L, F, 1)      f32    BN-folded conv biases
      whead_ref: (Ctp, 9*Cp)    bf16   concatenated cls/bb/kp weights (padded)
      bhead_ref: (Ctp, 1)       f32    concatenated head biases (padded)
      o_ref:     (B, Ctp, H*W)  f32    lane-dense output (NCHW-flat)
      feat_ref:  (B*Cp, SEG)    bf16   per-batch zero-halo feature rows
      slab_ref:  (9*Cp, B*HW)   bf16   im2col slab = matmul RHS
    """
    HW = H * W

    # Zero once per forward: halo columns and channel-pad rows stay zero and
    # implement the conv's zero padding in y (and the Cin->Cp padding).
    feat_ref[...] = jnp.zeros_like(feat_ref)
    for b in range(B):
        feat_ref[b * Cp:(b + 1) * Cp, LO:LO + HW] = x_ref[b]

    def build_slab():
        # slab[t*Cp + c, b*HW + p] = feat_b[c, p + dy*W + dx]  (0 off-image)
        for t in range(9):
            dy, dx = t // 3 - 1, t % 3 - 1
            off = LO + dy * W + dx                       # static lane offset
            for b in range(B):
                win = feat_ref[b * Cp:(b + 1) * Cp, off:off + HW]   # bf16
                if dx == -1:
                    win = win * mask_ref[0:1, :]         # zero where x == 0
                elif dx == 1:
                    win = win * mask_ref[1:2, :]         # zero where x == W-1
                slab_ref[t * Cp:(t + 1) * Cp, b * HW:(b + 1) * HW] = win

    # ConvBnAct stack (BN folded) -- one K = 9*Cp, N = B*HW matmul per layer.
    for l in range(n_layers):
        build_slab()
        acc = jnp.dot(wconv_ref[l], slab_ref[...],
                      preferred_element_type=jnp.float32)        # (F, B*HW) f32
        y = jnp.maximum(acc + bconv_ref[l], 0.0).astype(feat_ref.dtype)
        for b in range(B):
            feat_ref[b * Cp:b * Cp + F, LO:LO + HW] = y[:, b * HW:(b + 1) * HW]

    # Fused cls / bbox / keypoint prediction convs (one matmul, padded Ctp).
    build_slab()
    out = jnp.dot(whead_ref[...], slab_ref[...],
                  preferred_element_type=jnp.float32)             # (Ctp, B*HW)
    out = out + bhead_ref[...]
    for b in range(B):
        o_ref[b] = out[:, b * HW:(b + 1) * HW].astype(o_ref.dtype)


def _fused_head_call(x_pad, masks, wconv, bconv, whead, bhead,
                     *, H, W, Cp, F, n_layers):
    B, _, HW = x_pad.shape
    Ctp = whead.shape[0]
    L = n_layers

    LO = 128                                           # lane-aligned interior start
    SEG = ((LO + HW + W + 1 + 127) // 128) * 128       # per-batch segment width

    kernel = functools.partial(_fused_head_kernel, H=H, W=W, B=B, Cp=Cp, F=F,
                               n_layers=n_layers, LO=LO)

    flops = int(2 * B * HW * 9 * Cp * (n_layers * F + Ctp))
    bytes_accessed = int(x_pad.size * 2 + masks.size * 2 + wconv.size * 2 +
                         bconv.size * 4 + whead.size * 2 + bhead.size * 4 +
                         B * Ctp * HW * 4)

    return pl.pallas_call(
        kernel,
        out_shape=jax.ShapeDtypeStruct((B, Ctp, HW), jnp.float32),
        grid_spec=pltpu.PrefetchScalarGridSpec(
            num_scalar_prefetch=0,
            grid=(1,),
            in_specs=[
                pl.BlockSpec((B, Cp, HW), lambda i: (0, 0, 0)),
                pl.BlockSpec((2, HW), lambda i: (0, 0)),
                pl.BlockSpec((L, F, 9 * Cp), lambda i: (0, 0, 0)),
                pl.BlockSpec((L, F, 1), lambda i: (0, 0, 0)),
                pl.BlockSpec((Ctp, 9 * Cp), lambda i: (0, 0)),
                pl.BlockSpec((Ctp, 1), lambda i: (0, 0)),
            ],
            out_specs=pl.BlockSpec((B, Ctp, HW), lambda i: (0, 0, 0)),
            scratch_shapes=[
                pltpu.VMEM((B * Cp, SEG), jnp.bfloat16),   # zero-halo feature buf
                pltpu.VMEM((9 * Cp, B * HW), jnp.bfloat16) # im2col slab
            ]),
        compiler_params=pltpu.CompilerParams(
            dimension_semantics=("arbitrary",)),
        cost_estimate=pl.CostEstimate(flops=flops, transcendentals=0,
                                      bytes_accessed=bytes_accessed),
    )(x_pad, masks, wconv, bconv, whead, bhead)


# ---------------------------------------------------------------------------
# Parameter construction (synthetic, deterministic) + BN / Scale folding
# ---------------------------------------------------------------------------
def _pack_conv_weight(w, cin_pad):
    """(Cout, Cin, 3, 3) conv weight -> (Cout, 9*cin_pad); K ordered
    tap-major / channel-minor to match the kernel's im2col slab rows."""
    cout, cin = w.shape[0], w.shape[1]
    w = jnp.transpose(w, (0, 2, 3, 1))                    # (Cout, ky, kx, Cin)
    if cin_pad > cin:
        w = jnp.pad(w, ((0, 0), (0, 0), (0, 0), (0, cin_pad - cin)))
    return w.reshape(cout, 9 * cin_pad)


def make_params(key, nc, in_ch, feat_ch, num_anchors, n_conv_layers, nk=5,
                use_scale=False):
    eps = 1e-5
    # shared channel padding so every layer uses the same K = 9*Cp contraction
    Cp = ((max(in_ch, feat_ch) + 15) // 16) * 16
    keys = jax.random.split(key, n_conv_layers * 5 + 6)
    ki = 0

    wconv_list, bconv_list = [], []
    chn = in_ch
    for _ in range(n_conv_layers):
        w = 0.05 * jax.random.normal(keys[ki], (feat_ch, chn, 3, 3), jnp.float32); ki += 1
        gamma = 1.0 + 0.1 * jax.random.normal(keys[ki], (feat_ch,)); ki += 1
        beta = 0.1 * jax.random.normal(keys[ki], (feat_ch,)); ki += 1
        mean = 0.1 * jax.random.normal(keys[ki], (feat_ch,)); ki += 1
        var = jnp.abs(jax.random.normal(keys[ki], (feat_ch,))) + 0.5; ki += 1
        # eval-mode BatchNorm folded straight into the conv weight / bias
        bn_scale = gamma / jnp.sqrt(var + eps)
        wconv_list.append(
            _pack_conv_weight(w * bn_scale[:, None, None, None], Cp))
        bconv_list.append(beta - mean * bn_scale)
        chn = feat_ch
    wconv = jnp.stack(wconv_list, 0).astype(jnp.bfloat16)              # (L,F,9Cp)
    bconv = jnp.stack(bconv_list, 0)[:, :, None].astype(jnp.float32)   # (L,F,1)

    def head(kw, kb, cout):
        w = 0.05 * jax.random.normal(kw, (cout, feat_ch, 3, 3), jnp.float32)
        b = 0.01 * jax.random.normal(kb, (cout,), jnp.float32)
        return w, b

    c_cls, c_bb, c_kp = nc * num_anchors, 4 * num_anchors, 2 * nk * num_anchors
    w_cls, b_cls = head(keys[ki], keys[ki + 1], c_cls); ki += 2
    w_bb, b_bb = head(keys[ki], keys[ki + 1], c_bb); ki += 2
    w_kp, b_kp = head(keys[ki], keys[ki + 1], c_kp); ki += 2

    if use_scale:
        # Scale() multiplies the WHOLE conv output (conv + bias) by a learnable
        # scalar: fold it into both the bbox weight and its bias.
        s = jnp.float32(1.0)                    # Scale(1.0) initial value
        w_bb, b_bb = w_bb * s, b_bb * s

    whead = jnp.concatenate([_pack_conv_weight(w_cls, Cp),
                             _pack_conv_weight(w_bb, Cp),
                             _pack_conv_weight(w_kp, Cp)], 0)
    bhead = jnp.concatenate([b_cls, b_bb, b_kp])

    # Pad Ct -> Ctp (multiple of 8) with zero rows for a full-vreg output store.
    Ct = whead.shape[0]
    Ctp = ((Ct + 7) // 8) * 8
    if Ctp > Ct:
        whead = jnp.pad(whead, ((0, Ctp - Ct), (0, 0)))
        bhead = jnp.pad(bhead, ((0, Ctp - Ct),))
    whead = whead.astype(jnp.bfloat16)                       # (Ctp, 9*Cp)
    bhead = bhead[:, None].astype(jnp.float32)               # (Ctp, 1)

    return {"Cp": Cp, "feat_ch": feat_ch, "n_layers": n_conv_layers,
            "nc": nc, "nk": nk, "splits": (c_cls, c_bb, c_kp), "Ctp": Ctp,
            "wconv": wconv, "bconv": bconv, "whead": whead, "bhead": bhead}


def _make_edge_masks(H, W):
    x_idx = jnp.tile(jnp.arange(W), H)                   # column index per flat pixel
    left = (x_idx > 0)                                   # valid for dx = -1 taps
    right = (x_idx < W - 1)                              # valid for dx = +1 taps
    return jnp.stack([left, right], 0).astype(jnp.bfloat16)   # (2, H*W)


# ---------------------------------------------------------------------------
# Forward pass (mirrors SCRFDStrideFaceHead.forward)
# ---------------------------------------------------------------------------
def scrfd_stride_face_head_forward(params, x_nchw, *, export=False):
    B, Cin, H, W = x_nchw.shape
    HW = H * W
    Cp = params["Cp"]

    # pure reshape + cast + channel zero-pad; no transposes
    x_flat = x_nchw.reshape(B, Cin, HW).astype(jnp.bfloat16)
    x_pad = jnp.pad(x_flat, ((0, 0), (0, Cp - Cin), (0, 0)))
    masks = _make_edge_masks(H, W)

    out = _fused_head_call(x_pad, masks, params["wconv"], params["bconv"],
                           params["whead"], params["bhead"],
                           H=H, W=W, Cp=Cp, F=params["feat_ch"],
                           n_layers=params["n_layers"])       # (B, Ctp, HW)

    c_cls, c_bb, c_kp = params["splits"]
    cls_flat = out[:, :c_cls, :]
    bb_flat = out[:, c_cls:c_cls + c_bb, :]
    kp_flat = out[:, c_cls + c_bb:c_cls + c_bb + c_kp, :]

    if export:
        nc, nk = params["nc"], params["nk"]
        to_anchor = lambda t, d: jnp.transpose(t, (0, 2, 1)).reshape(B, -1, d)
        return (jax.nn.sigmoid(to_anchor(cls_flat, nc)),
                to_anchor(bb_flat, 4),
                to_anchor(kp_flat, nk))

    # outputs are already NCHW-flat -> only reshapes, no transposes
    return (cls_flat.reshape(B, c_cls, H, W),
            bb_flat.reshape(B, c_bb, H, W),
            kp_flat.reshape(B, c_kp, H, W))


# ---------------------------------------------------------------------------
if __name__ == "__main__":
    nc, in_ch, feat_ch, num_anchors, n_conv_layers = 1, 4, 32, 2, 2
    B, H, W = 2, 16, 16

    key = jax.random.PRNGKey(0)
    kx, kp = jax.random.split(key)
    x = jax.random.normal(kx, (B, in_ch, H, W), jnp.float32)   # NCHW like PyTorch

    params = make_params(kp, nc, in_ch, feat_ch, num_anchors, n_conv_layers,
                         use_scale=False)

    cls_score, bb_pred, kp_pred = scrfd_stride_face_head_forward(
        params, x, export=False)

    jax.block_until_ready((cls_score, bb_pred, kp_pred))

    assert cls_score.shape == (B, nc * num_anchors, H, W)
    assert bb_pred.shape == (B, 4 * num_anchors, H, W)
    assert kp_pred.shape == (B, 2 * 5 * num_anchors, H, W)
    print("KERNEL_OK")
</pallas_src>

<mosaic_0001>
module attributes {stable_mosaic.version = 11 : i64} {
  func.func @_fused_head_kernel(%arg0: i32, %arg1: memref<2x32x256xbf16, #tpu.memory_space<vmem>>, %arg2: memref<2x256xbf16, #tpu.memory_space<vmem>>, %arg3: memref<2x32x288xbf16, #tpu.memory_space<vmem>>, %arg4: memref<2x32x1xf32, #tpu.memory_space<vmem>>, %arg5: memref<32x288xbf16, #tpu.memory_space<vmem>>, %arg6: memref<32x1xf32, #tpu.memory_space<vmem>>, %arg7: memref<2x32x256xf32, #tpu.memory_space<vmem>>, %arg8: memref<64x512xbf16, #tpu.memory_space<vmem>>, %arg9: memref<288x512xbf16, #tpu.memory_space<vmem>>) attributes {dimension_semantics = [#tpu.dimension_semantics<arbitrary>], iteration_bounds = array<i64: 1>, scalar_prefetch = 0 : i64, scratch_operands = 2 : i64, tpu.core_type = #tpu.core_type<tc>, window_params = [{pipeline_mode = #tpu.pipeline_mode<synchronous>, transform_indices = @transform_0, window_bounds = array<i64: 2, 32, 256>}, {pipeline_mode = #tpu.pipeline_mode<synchronous>, transform_indices = @transform_1, window_bounds = array<i64: 2, 256>}, {pipeline_mode = #tpu.pipeline_mode<synchronous>, transform_indices = @transform_2, window_bounds = array<i64: 2, 32, 288>}, {pipeline_mode = #tpu.pipeline_mode<synchronous>, transform_indices = @transform_3, window_bounds = array<i64: 2, 32, 1>}, {pipeline_mode = #tpu.pipeline_mode<synchronous>, transform_indices = @transform_4, window_bounds = array<i64: 32, 288>}, {pipeline_mode = #tpu.pipeline_mode<synchronous>, transform_indices = @transform_5, window_bounds = array<i64: 32, 1>}, {pipeline_mode = #tpu.pipeline_mode<synchronous>, transform_indices = @transform_6, window_bounds = array<i64: 2, 32, 256>}]} {
    %cst = arith.constant 0.000000e+00 : bf16
    %0 = vector.broadcast %cst : bf16 to vector<64x512xbf16>
    %c0 = arith.constant 0 : index
    %c0_0 = arith.constant 0 : index
    %1 = vector.load %arg8[%c0, %c0_0] : memref<64x512xbf16, #tpu.memory_space<vmem>>, vector<64x512xbf16>
    tpu.vector_store %arg8[%c0, %c0_0], %0 {strides = array<i32>} : memref<64x512xbf16, #tpu.memory_space<vmem>>, vector<64x512xbf16>,
    %c0_1 = arith.constant 0 : index
    %c0_2 = arith.constant 0 : index
    %c0_3 = arith.constant 0 : index
    %2 = vector.load %arg1[%c0_1, %c0_2, %c0_3] : memref<2x32x256xbf16, #tpu.memory_space<vmem>>, vector<1x32x256xbf16>
    %3 = vector.shape_cast %2 : vector<1x32x256xbf16> to vector<32x256xbf16>
    %c0_4 = arith.constant 0 : index
    %c128 = arith.constant 128 : index
    %4 = vector.load %arg8[%c0_4, %c128] : memref<64x512xbf16, #tpu.memory_space<vmem>>, vector<32x256xbf16>
    tpu.vector_store %arg8[%c0_4, %c128], %3 {strides = array<i32>} : memref<64x512xbf16, #tpu.memory_space<vmem>>, vector<32x256xbf16>,
    %c1 = arith.constant 1 : index
    %c0_5 = arith.constant 0 : index
    %c0_6 = arith.constant 0 : index
    %5 = vector.load %arg1[%c1, %c0_5, %c0_6] : memref<2x32x256xbf16, #tpu.memory_space<vmem>>, vector<1x32x256xbf16>
    %6 = vector.shape_cast %5 : vector<1x32x256xbf16> to vector<32x256xbf16>
    %c32 = arith.constant 32 : index
    %c128_7 = arith.constant 128 : index
    %7 = vector.load %arg8[%c32, %c128_7] : memref<64x512xbf16, #tpu.memory_space<vmem>>, vector<32x256xbf16>
    tpu.vector_store %arg8[%c32, %c128_7], %6 {strides = array<i32>} : memref<64x512xbf16, #tpu.memory_space<vmem>>, vector<32x256xbf16>,
    %c0_8 = arith.constant 0 : index
    %c111 = arith.constant 111 : index
    %8 = vector.load %arg8[%c0_8, %c111] : memref<64x512xbf16, #tpu.memory_space<vmem>>, vector<32x256xbf16>
    %c0_9 = arith.constant 0 : index
    %c0_10 = arith.constant 0 : index
    %9 = vector.load %arg2[%c0_9, %c0_10] : memref<2x256xbf16, #tpu.memory_space<vmem>>, vector<1x256xbf16>
    %10 = vector.broadcast %9 : vector<1x256xbf16> to vector<32x256xbf16>
    %11 = arith.mulf %8, %10 : vector<32x256xbf16>
    %c0_11 = arith.constant 0 : index
    %c0_12 = arith.constant 0 : index
    %12 = vector.load %arg9[%c0_11, %c0_12] : memref<288x512xbf16, #tpu.memory_space<vmem>>, vector<32x256xbf16>
    tpu.vector_store %arg9[%c0_11, %c0_12], %11 {strides = array<i32>} : memref<288x512xbf16, #tpu.memory_space<vmem>>, vector<32x256xbf16>,
    %c32_13 = arith.constant 32 : index
    %c111_14 = arith.constant 111 : index
    %13 = vector.load %arg8[%c32_13, %c111_14] : memref<64x512xbf16, #tpu.memory_space<vmem>>, vector<32x256xbf16>
    %c0_15 = arith.constant 0 : index
    %c0_16 = arith.constant 0 : index
    %14 = vector.load %arg2[%c0_15, %c0_16] : memref<2x256xbf16, #tpu.memory_space<vmem>>, vector<1x256xbf16>
    %15 = vector.broadcast %14 : vector<1x256xbf16> to vector<32x256xbf16>
    %16 = arith.mulf %13, %15 : vector<32x256xbf16>
    %c0_17 = arith.constant 0 : index
    %c256 = arith.constant 256 : index
    %17 = vector.load %arg9[%c0_17, %c256] : memref<288x512xbf16, #tpu.memory_space<vmem>>, vector<32x256xbf16>
    tpu.vector_store %arg9[%c0_17, %c256], %16 {strides = array<i32>} : memref<288x512xbf16, #tpu.memory_space<vmem>>, vector<32x256xbf16>,
    %c0_18 = arith.constant 0 : index
    %c112 = arith.constant 112 : index
    %18 = vector.load %arg8[%c0_18, %c112] : memref<64x512xbf16, #tpu.memory_space<vmem>>, vector<32x256xbf16>
    %c32_19 = arith.constant 32 : index
    %c0_20 = arith.constant 0 : index
    %19 = vector.load %arg9[%c32_19, %c0_20] : memref<288x512xbf16, #tpu.memory_space<vmem>>, vector<32x256xbf16>
    tpu.vector_store %arg9[%c32_19, %c0_20], %18 {strides = array<i32>} : memref<288x512xbf16, #tpu.memory_space<vmem>>, vector<32x256xbf16>,
    %c32_21 = arith.constant 32 : index
    %c112_22 = arith.constant 112 : index
    %20 = vector.load %arg8[%c32_21, %c112_22] : memref<64x512xbf16, #tpu.memory_space<vmem>>, vector<32x256xbf16>
    %c32_23 = arith.constant 32 : index
    %c256_24 = arith.constant 256 : index
    %21 = vector.load %arg9[%c32_23, %c256_24] : memref<288x512xbf16, #tpu.memory_space<vmem>>, vector<32x256xbf16>
    tpu.vector_store %arg9[%c32_23, %c256_24], %20 {strides = array<i32>} : memref<288x512xbf16, #tpu.memory_space<vmem>>, vector<32x256xbf16>,
    %c0_25 = arith.constant 0 : index
    %c113 = arith.constant 113 : index
    %22 = vector.load %arg8[%c0_25, %c113] : memref<64x512xbf16, #tpu.memory_space<vmem>>, vector<32x256xbf16>
    %c1_26 = arith.constant 1 : index
    %c0_27 = arith.constant 0 : index
    %23 = vector.load %arg2[%c1_26, %c0_27] : memref<2x256xbf16, #tpu.memory_space<vmem>>, vector<1x256xbf16>
    %24 = vector.broadcast %23 : vector<1x256xbf16> to vector<32x256xbf16>
    %25 = arith.mulf %22, %24 : vector<32x256xbf16>
    %c64 = arith.constant 64 : index
    %c0_28 = arith.constant 0 : index
    %26 = vector.load %arg9[%c64, %c0_28] : memref<288x512xbf16, #tpu.memory_space<vmem>>, vector<32x256xbf16>
    tpu.vector_store %arg9[%c64, %c0_28], %25 {strides = array<i32>} : memref<288x512xbf16, #tpu.memory_space<vmem>>, vector<32x256xbf16>,
    %c32_29 = arith.constant 32 : index
    %c113_30 = arith.constant 113 : index
    %27 = vector.load %arg8[%c32_29, %c113_30] : memref<64x512xbf16, #tpu.memory_space<vmem>>, vector<32x256xbf16>
    %c1_31 = arith.constant 1 : index
    %c0_32 = arith.constant 0 : index
    %28 = vector.load %arg2[%c1_31, %c0_32] : memref<2x256xbf16, #tpu.memory_space<vmem>>, vector<1x256xbf16>
    %29 = vector.broadcast %28 : vector<1x256xbf16> to vector<32x256xbf16>
    %30 = arith.mulf %27, %29 : vector<32x256xbf16>
    %c64_33 = arith.constant 64 : index
    %c256_34 = arith.constant 256 : index
    %31 = vector.load %arg9[%c64_33, %c256_34] : memref<288x512xbf16, #tpu.memory_space<vmem>>, vector<32x256xbf16>
    tpu.vector_store %arg9[%c64_33, %c256_34], %30 {strides = array<i32>} : memref<288x512xbf16, #tpu.memory_space<vmem>>, vector<32x256xbf16>,
    %c0_35 = arith.constant 0 : index
    %c127 = arith.constant 127 : index
    %32 = vector.load %arg8[%c0_35, %c127] : memref<64x512xbf16, #tpu.memory_space<vmem>>, vector<32x256xbf16>
    %c0_36 = arith.constant 0 : index
    %c0_37 = arith.constant 0 : index
    %33 = vector.load %arg2[%c0_36, %c0_37] : memref<2x256xbf16, #tpu.memory_space<vmem>>, vector<1x256xbf16>
    %34 = vector.broadcast %33 : vector<1x256xbf16> to vector<32x256xbf16>
    %35 = arith.mulf %32, %34 : vector<32x256xbf16>
    %c96 = arith.constant 96 : index
    %c0_38 = arith.constant 0 : index
    %36 = vector.load %arg9[%c96, %c0_38] : memref<288x512xbf16, #tpu.memory_space<vmem>>, vector<32x256xbf16>
    tpu.vector_store %arg9[%c96, %c0_38], %35 {strides = array<i32>} : memref<288x512xbf16, #tpu.memory_space<vmem>>, vector<32x256xbf16>,
    %c32_39 = arith.constant 32 : index
    %c127_40 = arith.constant 127 : index
    %37 = vector.load %arg8[%c32_39, %c127_40] : memref<64x512xbf16, #tpu.memory_space<vmem>>, vector<32x256xbf16>
    %c0_41 = arith.constant 0 : index
    %c0_42 = arith.constant 0 : index
    %38 = vector.load %arg2[%c0_41, %c0_42] : memref<2x256xbf16, #tpu.memory_space<vmem>>, vector<1x256xbf16>
    %39 = vector.broadcast %38 : vector<1x256xbf16> to vector<32x256xbf16>
    %40 = arith.mulf %37, %39 : vector<32x256xbf16>
    %c96_43 = arith.constant 96 : index
    %c256_44 = arith.constant 256 : index
    %41 = vector.load %arg9[%c96_43, %c256_44] : memref<288x512xbf16, #tpu.memory_space<vmem>>, vector<32x256xbf16>
    tpu.vector_store %arg9[%c96_43, %c256_44], %40 {strides = array<i32>} : memref<288x512xbf16, #tpu.memory_space<vmem>>, vector<32x256xbf16>,
    %c0_45 = arith.constant 0 : index
    %c128_46 = arith.constant 128 : index
    %42 = vector.load %arg8[%c0_45, %c128_46] : memref<64x512xbf16, #tpu.memory_space<vmem>>, vector<32x256xbf16>
    %c128_47 = arith.constant 128 : index
    %c0_48 = arith.constant 0 : index
    %43 = vector.load %arg9[%c128_47, %c0_48] : memref<288x512xbf16, #tpu.memory_space<vmem>>, vector<32x256xbf16>
    tpu.vector_store %arg9[%c128_47, %c0_48], %42 {strides = array<i32>} : memref<288x512xbf16, #tpu.memory_space<vmem>>, vector<32x256xbf16>,
    %c32_49 = arith.constant 32 : index
    %c128_50 = arith.constant 128 : index
    %44 = vector.load %arg8[%c32_49, %c128_50] : memref<64x512xbf16, #tpu.memory_space<vmem>>, vector<32x256xbf16>
    %c128_51 = arith.constant 128 : index
    %c256_52 = arith.constant 256 : index
    %45 = vector.load %arg9[%c128_51, %c256_52] : memref<288x512xbf16, #tpu.memory_space<vmem>>, vector<32x256xbf16>
    tpu.vector_store %arg9[%c128_51, %c256_52], %44 {strides = array<i32>} : memref<288x512xbf16, #tpu.memory_space<vmem>>, vector<32x256xbf16>,
    %c0_53 = arith.constant 0 : index
    %c129 = arith.constant 129 : index
    %46 = vector.load %arg8[%c0_53, %c129] : memref<64x512xbf16, #tpu.memory_space<vmem>>, vector<32x256xbf16>
    %c1_54 = arith.constant 1 : index
    %c0_55 = arith.constant 0 : index
    %47 = vector.load %arg2[%c1_54, %c0_55] : memref<2x256xbf16, #tpu.memory_space<vmem>>, vector<1x256xbf16>
    %48 = vector.broadcast %47 : vector<1x256xbf16> to vector<32x256xbf16>
    %49 = arith.mulf %46, %48 : vector<32x256xbf16>
    %c160 = arith.constant 160 : index
    %c0_56 = arith.constant 0 : index
    %50 = vector.load %arg9[%c160, %c0_56] : memref<288x512xbf16, #tpu.memory_space<vmem>>, vector<32x256xbf16>
    tpu.vector_store %arg9[%c160, %c0_56], %49 {strides = array<i32>} : memref<288x512xbf16, #tpu.memory_space<vmem>>, vector<32x256xbf16>,
    %c32_57 = arith.constant 32 : index
    %c129_58 = arith.constant 129 : index
    %51 = vector.load %arg8[%c32_57, %c129_58] : memref<64x512xbf16, #tpu.memory_space<vmem>>, vector<32x256xbf16>
    %c1_59 = arith.constant 1 : index
    %c0_60 = arith.constant 0 : index
    %52 = vector.load %arg2[%c1_59, %c0_60] : memref<2x256xbf16, #tpu.memory_space<vmem>>, vector<1x256xbf16>
    %53 = vector.broadcast %52 : vector<1x256xbf16> to vector<32x256xbf16>
    %54 = arith.mulf %51, %53 : vector<32x256xbf16>
    %c160_61 = arith.constant 160 : index
    %c256_62 = arith.constant 256 : index
    %55 = vector.load %arg9[%c160_61, %c256_62] : memref<288x512xbf16, #tpu.memory_space<vmem>>, vector<32x256xbf16>
    tpu.vector_store %arg9[%c160_61, %c256_62], %54 {strides = array<i32>} : memref<288x512xbf16, #tpu.memory_space<vmem>>, vector<32x256xbf16>,
    %c0_63 = arith.constant 0 : index
    %c143 = arith.constant 143 : index
    %56 = vector.load %arg8[%c0_63, %c143] : memref<64x512xbf16, #tpu.memory_space<vmem>>, vector<32x256xbf16>
    %c0_64 = arith.constant 0 : index
    %c0_65 = arith.constant 0 : index
    %57 = vector.load %arg2[%c0_64, %c0_65] : memref<2x256xbf16, #tpu.memory_space<vmem>>, vector<1x256xbf16>
    %58 = vector.broadcast %57 : vector<1x256xbf16> to vector<32x256xbf16>
    %59 = arith.mulf %56, %58 : vector<32x256xbf16>
    %c192 = arith.constant 192 : index
    %c0_66 = arith.constant 0 : index
    %60 = vector.load %arg9[%c192, %c0_66] : memref<288x512xbf16, #tpu.memory_space<vmem>>, vector<32x256xbf16>
    tpu.vector_store %arg9[%c192, %c0_66], %59 {strides = array<i32>} : memref<288x512xbf16, #tpu.memory_space<vmem>>, vector<32x256xbf16>,
    %c32_67 = arith.constant 32 : index
    %c143_68 = arith.constant 143 : index
    %61 = vector.load %arg8[%c32_67, %c143_68] : memref<64x512xbf16, #tpu.memory_space<vmem>>, vector<32x256xbf16>
    %c0_69 = arith.constant 0 : index
    %c0_70 = arith.constant 0 : index
    %62 = vector.load %arg2[%c0_69, %c0_70] : memref<2x256xbf16, #tpu.memory_space<vmem>>, vector<1x256xbf16>
    %63 = vector.broadcast %62 : vector<1x256xbf16> to vector<32x256xbf16>
    %64 = arith.mulf %61, %63 : vector<32x256xbf16>
    %c192_71 = arith.constant 192 : index
    %c256_72 = arith.constant 256 : index
    %65 = vector.load %arg9[%c192_71, %c256_72] : memref<288x512xbf16, #tpu.memory_space<vmem>>, vector<32x256xbf16>
    tpu.vector_store %arg9[%c192_71, %c256_72], %64 {strides = array<i32>} : memref<288x512xbf16, #tpu.memory_space<vmem>>, vector<32x256xbf16>,
    %c0_73 = arith.constant 0 : index
    %c144 = arith.constant 144 : index
    %66 = vector.load %arg8[%c0_73, %c144] : memref<64x512xbf16, #tpu.memory_space<vmem>>, vector<32x256xbf16>
    %c224 = arith.constant 224 : index
    %c0_74 = arith.constant 0 : index
    %67 = vector.load %arg9[%c224, %c0_74] : memref<288x512xbf16, #tpu.memory_space<vmem>>, vector<32x256xbf16>
    tpu.vector_store %arg9[%c224, %c0_74], %66 {strides = array<i32>} : memref<288x512xbf16, #tpu.memory_space<vmem>>, vector<32x256xbf16>,
    %c32_75 = arith.constant 32 : index
    %c144_76 = arith.constant 144 : index
    %68 = vector.load %arg8[%c32_75, %c144_76] : memref<64x512xbf16, #tpu.memory_space<vmem>>, vector<32x256xbf16>
    %c224_77 = arith.constant 224 : index
    %c256_78 = arith.constant 256 : index
    %69 = vector.load %arg9[%c224_77, %c256_78] : memref<288x512xbf16, #tpu.memory_space<vmem>>, vector<32x256xbf16>
    tpu.vector_store %arg9[%c224_77, %c256_78], %68 {strides = array<i32>} : memref<288x512xbf16, #tpu.memory_space<vmem>>, vector<32x256xbf16>,
    %c0_79 = arith.constant 0 : index
    %c145 = arith.constant 145 : index
    %70 = vector.load %arg8[%c0_79, %c145] : memref<64x512xbf16, #tpu.memory_space<vmem>>, vector<32x256xbf16>
    %c1_80 = arith.constant 1 : index
    %c0_81 = arith.constant 0 : index
    %71 = vector.load %arg2[%c1_80, %c0_81] : memref<2x256xbf16, #tpu.memory_space<vmem>>, vector<1x256xbf16>
    %72 = vector.broadcast %71 : vector<1x256xbf16> to vector<32x256xbf16>
    %73 = arith.mulf %70, %72 : vector<32x256xbf16>
    %c256_82 = arith.constant 256 : index
    %c0_83 = arith.constant 0 : index
    %74 = vector.load %arg9[%c256_82, %c0_83] : memref<288x512xbf16, #tpu.memory_space<vmem>>, vector<32x256xbf16>
    tpu.vector_store %arg9[%c256_82, %c0_83], %73 {strides = array<i32>} : memref<288x512xbf16, #tpu.memory_space<vmem>>, vector<32x256xbf16>,
    %c32_84 = arith.constant 32 : index
    %c145_85 = arith.constant 145 : index
    %75 = vector.load %arg8[%c32_84, %c145_85] : memref<64x512xbf16, #tpu.memory_space<vmem>>, vector<32x256xbf16>
    %c1_86 = arith.constant 1 : index
    %c0_87 = arith.constant 0 : index
    %76 = vector.load %arg2[%c1_86, %c0_87] : memref<2x256xbf16, #tpu.memory_space<vmem>>, vector<1x256xbf16>
    %77 = vector.broadcast %76 : vector<1x256xbf16> to vector<32x256xbf16>
    %78 = arith.mulf %75, %77 : vector<32x256xbf16>
    %c256_88 = arith.constant 256 : index
    %c256_89 = arith.constant 256 : index
    %79 = vector.load %arg9[%c256_88, %c256_89] : memref<288x512xbf16, #tpu.memory_space<vmem>>, vector<32x256xbf16>
    tpu.vector_store %arg9[%c256_88, %c256_89], %78 {strides = array<i32>} : memref<288x512xbf16, #tpu.memory_space<vmem>>, vector<32x256xbf16>,
    %c0_90 = arith.constant 0 : index
    %c0_91 = arith.constant 0 : index
    %c0_92 = arith.constant 0 : index
    %80 = vector.load %arg3[%c0_90, %c0_91, %c0_92] : memref<2x32x288xbf16, #tpu.memory_space<vmem>>, vector<1x32x288xbf16>
    %81 = vector.shape_cast %80 : vector<1x32x288xbf16> to vector<32x288xbf16>
    %c0_93 = arith.constant 0 : index
    %c0_94 = arith.constant 0 : index
    %82 = vector.load %arg9[%c0_93, %c0_94] : memref<288x512xbf16, #tpu.memory_space<vmem>>, vector<288x512xbf16>
    %cst_95 = arith.constant dense<0.000000e+00> : vector<32x512xf32>
    %83 = tpu.matmul %81, %82, %cst_95 {dimension_numbers = #tpu.dot_dimension_numbers<[1], [0], [0], [1], [0, 0, 1, 1], [], []>} : vector<32x288xbf16>, vector<288x512xbf16>, vector<32x512xf32> -> vector<32x512xf32>
    %c0_96 = arith.constant 0 : index
    %c0_97 = arith.constant 0 : index
    %c0_98 = arith.constant 0 : index
    %84 = vector.load %arg4[%c0_96, %c0_97, %c0_98] : memref<2x32x1xf32, #tpu.memory_space<vmem>>, vector<1x32x1xf32>
    %85 = vector.shape_cast %84 : vector<1x32x1xf32> to vector<32x1xf32>
    %86 = vector.broadcast %85 : vector<32x1xf32> to vector<32x512xf32>
    %87 = arith.addf %83, %86 : vector<32x512xf32>
    %cst_99 = arith.constant 0.000000e+00 : f32
    %88 = vector.broadcast %cst_99 : f32 to vector<32x512xf32>
    %89 = arith.maximumf %87, %88 : vector<32x512xf32>
    %90 = arith.truncf %89 : vector<32x512xf32> to vector<32x512xbf16>
    %91 = vector.extract_strided_slice %90 {offsets = [0, 0], sizes = [32, 256], strides = [1, 1]} : vector<32x512xbf16> to vector<32x256xbf16>
    %c0_100 = arith.constant 0 : index
    %c128_101 = arith.constant 128 : index
    %92 = vector.load %arg8[%c0_100, %c128_101] : memref<64x512xbf16, #tpu.memory_space<vmem>>, vector<32x256xbf16>
    tpu.vector_store %arg8[%c0_100, %c128_101], %91 {strides = array<i32>} : memref<64x512xbf16, #tpu.memory_space<vmem>>, vector<32x256xbf16>,
    %93 = vector.extract_strided_slice %90 {offsets = [0, 256], sizes = [32, 256], strides = [1, 1]} : vector<32x512xbf16> to vector<32x256xbf16>
    %c32_102 = arith.constant 32 : index
    %c128_103 = arith.constant 128 : index
    %94 = vector.load %arg8[%c32_102, %c128_103] : memref<64x512xbf16, #tpu.memory_space<vmem>>, vector<32x256xbf16>
    tpu.vector_store %arg8[%c32_102, %c128_103], %93 {strides = array<i32>} : memref<64x512xbf16, #tpu.memory_space<vmem>>, vector<32x256xbf16>,
    %c0_104 = arith.constant 0 : index
    %c111_105 = arith.constant 111 : index
    %95 = vector.load %arg8[%c0_104, %c111_105] : memref<64x512xbf16, #tpu.memory_space<vmem>>, vector<32x256xbf16>
    %c0_106 = arith.constant 0 : index
    %c0_107 = arith.constant 0 : index
    %96 = vector.load %arg2[%c0_106, %c0_107] : memref<2x256xbf16, #tpu.memory_space<vmem>>, vector<1x256xbf16>
    %97 = vector.broadcast %96 : vector<1x256xbf16> to vector<32x256xbf16>
    %98 = arith.mulf %95, %97 : vector<32x256xbf16>
    %c0_108 = arith.constant 0 : index
    %c0_109 = arith.constant 0 : index
    %99 = vector.load %arg9[%c0_108, %c0_109] : memref<288x512xbf16, #tpu.memory_space<vmem>>, vector<32x256xbf16>
    tpu.vector_store %arg9[%c0_108, %c0_109], %98 {strides = array<i32>} : memref<288x512xbf16, #tpu.memory_space<vmem>>, vector<32x256xbf16>,
    %c32_110 = arith.constant 32 : index
    %c111_111 = arith.constant 111 : index
    %100 = vector.load %arg8[%c32_110, %c111_111] : memref<64x512xbf16, #tpu.memory_space<vmem>>, vector<32x256xbf16>
    %c0_112 = arith.constant 0 : index
    %c0_113 = arith.constant 0 : index
    %101 = vector.load %arg2[%c0_112, %c0_113] : memref<2x256xbf16, #tpu.memory_space<vmem>>, vector<1x256xbf16>
    %102 = vector.broadcast %101 : vector<1x256xbf16> to vector<32x256xbf16>
    %103 = arith.mulf %100, %102 : vector<32x256xbf16>
    %c0_114 = arith.constant 0 : index
    %c256_115 = arith.constant 256 : index
    %104 = vector.load %arg9[%c0_114, %c256_115] : memref<288x512xbf16, #tpu.memory_space<vmem>>, vector<32x256xbf16>
    tpu.vector_store %arg9[%c0_114, %c256_115], %103 {strides = array<i32>} : memref<288x512xbf16, #tpu.memory_space<vmem>>, vector<32x256xbf16>,
    %c0_116 = arith.constant 0 : index
    %c112_117 = arith.constant 112 : index
    %105 = vector.load %arg8[%c0_116, %c112_117] : memref<64x512xbf16, #tpu.memory_space<vmem>>, vector<32x256xbf16>
    %c32_118 = arith.constant 32 : index
    %c0_119 = arith.constant 0 : index
    %106 = vector.load %arg9[%c32_118, %c0_119] : memref<288x512xbf16, #tpu.memory_space<vmem>>, vector<32x256xbf16>
    tpu.vector_store %arg9[%c32_118, %c0_119], %105 {strides = array<i32>} : memref<288x512xbf16, #tpu.memory_space<vmem>>, vector<32x256xbf16>,
    %c32_120 = arith.constant 32 : index
    %c112_121 = arith.constant 112 : index
    %107 = vector.load %arg8[%c32_120, %c112_121] : memref<64x512xbf16, #tpu.memory_space<vmem>>, vector<32x256xbf16>
    %c32_122 = arith.constant 32 : index
    %c256_123 = arith.constant 256 : index
    %108 = vector.load %arg9[%c32_122, %c256_123] : memref<288x512xbf16, #tpu.memory_space<vmem>>, vector<32x256xbf16>
    tpu.vector_store %arg9[%c32_122, %c256_123], %107 {strides = array<i32>} : memref<288x512xbf16, #tpu.memory_space<vmem>>, vector<32x256xbf16>,
    %c0_124 = arith.constant 0 : index
    %c113_125 = arith.constant 113 : index
    %109 = vector.load %arg8[%c0_124, %c113_125] : memref<64x512xbf16, #tpu.memory_space<vmem>>, vector<32x256xbf16>
    %c1_126 = arith.constant 1 : index
    %c0_127 = arith.constant 0 : index
    %110 = vector.load %arg2[%c1_126, %c0_127] : memref<2x256xbf16, #tpu.memory_space<vmem>>, vector<1x256xbf16>
    %111 = vector.broadcast %110 : vector<1x256xbf16> to vector<32x256xbf16>
    %112 = arith.mulf %109, %111 : vector<32x256xbf16>
    %c64_128 = arith.constant 64 : index
    %c0_129 = arith.constant 0 : index
    %113 = vector.load %arg9[%c64_128, %c0_129] : memref<288x512xbf16, #tpu.memory_space<vmem>>, vector<32x256xbf16>
    tpu.vector_store %arg9[%c64_128, %c0_129], %112 {strides = array<i32>} : memref<288x512xbf16, #tpu.memory_space<vmem>>, vector<32x256xbf16>,
    %c32_130 = arith.constant 32 : index
    %c113_131 = arith.constant 113 : index
    %114 = vector.load %arg8[%c32_130, %c113_131] : memref<64x512xbf16, #tpu.memory_space<vmem>>, vector<32x256xbf16>
    %c1_132 = arith.constant 1 : index
    %c0_133 = arith.constant 0 : index
    %115 = vector.load %arg2[%c1_132, %c0_133] : memref<2x256xbf16, #tpu.memory_space<vmem>>, vector<1x256xbf16>
    %116 = vector.broadcast %115 : vector<1x256xbf16> to vector<32x256xbf16>
    %117 = arith.mulf %114, %116 : vector<32x256xbf16>
    %c64_134 = arith.constant 64 : index
    %c256_135 = arith.constant 256 : index
    %118 = vector.load %arg9[%c64_134, %c256_135] : memref<288x512xbf16, #tpu.memory_space<vmem>>, vector<32x256xbf16>
    tpu.vector_store %arg9[%c64_134, %c256_135], %117 {strides = array<i32>} : memref<288x512xbf16, #tpu.memory_space<vmem>>, vector<32x256xbf16>,
    %c0_136 = arith.constant 0 : index
    %c127_137 = arith.constant 127 : index
    %119 = vector.load %arg8[%c0_136, %c127_137] : memref<64x512xbf16, #tpu.memory_space<vmem>>, vector<32x256xbf16>
    %c0_138 = arith.constant 0 : index
    %c0_139 = arith.constant 0 : index
    %120 = vector.load %arg2[%c0_138, %c0_139] : memref<2x256xbf16, #tpu.memory_space<vmem>>, vector<1x256xbf16>
    %121 = vector.broadcast %120 : vector<1x256xbf16> to vector<32x256xbf16>
    %122 = arith.mulf %119, %121 : vector<32x256xbf16>
    %c96_140 = arith.constant 96 : index
    %c0_141 = arith.constant 0 : index
    %123 = vector.load %arg9[%c96_140, %c0_141] : memref<288x512xbf16, #tpu.memory_space<vmem>>, vector<32x256xbf16>
    tpu.vector_store %arg9[%c96_140, %c0_141], %122 {strides = array<i32>} : memref<288x512xbf16, #tpu.memory_space<vmem>>, vector<32x256xbf16>,
    %c32_142 = arith.constant 32 : index
    %c127_143 = arith.constant 127 : index
    %124 = vector.load %arg8[%c32_142, %c127_143] : memref<64x512xbf16, #tpu.memory_space<vmem>>, vector<32x256xbf16>
    %c0_144 = arith.constant 0 : index
    %c0_145 = arith.constant 0 : index
    %125 = vector.load %arg2[%c0_144, %c0_145] : memref<2x256xbf16, #tpu.memory_space<vmem>>, vector<1x256xbf16>
    %126 = vector.broadcast %125 : vector<1x256xbf16> to vector<32x256xbf16>
    %127 = arith.mulf %124, %126 : vector<32x256xbf16>
    %c96_146 = arith.constant 96 : index
    %c256_147 = arith.constant 256 : index
    %128 = vector.load %arg9[%c96_146, %c256_147] : memref<288x512xbf16, #tpu.memory_space<vmem>>, vector<32x256xbf16>
    tpu.vector_store %arg9[%c96_146, %c256_147], %127 {strides = array<i32>} : memref<288x512xbf16, #tpu.memory_space<vmem>>, vector<32x256xbf16>,
    %c0_148 = arith.constant 0 : index
    %c128_149 = arith.constant 128 : index
    %129 = vector.load %arg8[%c0_148, %c128_149] : memref<64x512xbf16, #tpu.memory_space<vmem>>, vector<32x256xbf16>
    %c128_150 = arith.constant 128 : index
    %c0_151 = arith.constant 0 : index
    %130 = vector.load %arg9[%c128_150, %c0_151] : memref<288x512xbf16, #tpu.memory_space<vmem>>, vector<32x256xbf16>
    tpu.vector_store %arg9[%c128_150, %c0_151], %129 {strides = array<i32>} : memref<288x512xbf16, #tpu.memory_space<vmem>>, vector<32x256xbf16>,
    %c32_152 = arith.constant 32 : index
    %c128_153 = arith.constant 128 : index
    %131 = vector.load %arg8[%c32_152, %c128_153] : memref<64x512xbf16, #tpu.memory_space<vmem>>, vector<32x256xbf16>
    %c128_154 = arith.constant 128 : index
    %c256_155 = arith.constant 256 : index
    %132 = vector.load %arg9[%c128_154, %c256_155] : memref<288x512xbf16, #tpu.memory_space<vmem>>, vector<32x256xbf16>
    tpu.vector_store %arg9[%c128_154, %c256_155], %131 {strides = array<i32>} : memref<288x512xbf16, #tpu.memory_space<vmem>>, vector<32x256xbf16>,
    %c0_156 = arith.constant 0 : index
    %c129_157 = arith.constant 129 : index
    %133 = vector.load %arg8[%c0_156, %c129_157] : memref<64x512xbf16, #tpu.memory_space<vmem>>, vector<32x256xbf16>
    %c1_158 = arith.constant 1 : index
    %c0_159 = arith.constant 0 : index
    %134 = vector.load %arg2[%c1_158, %c0_159] : memref<2x256xbf16, #tpu.memory_space<vmem>>, vector<1x256xbf16>
    %135 = vector.broadcast %134 : vector<1x256xbf16> to vector<32x256xbf16>
    %136 = arith.mulf %133, %135 : vector<32x256xbf16>
    %c160_160 = arith.constant 160 : index
    %c0_161 = arith.constant 0 : index
    %137 = vector.load %arg9[%c160_160, %c0_161] : memref<288x512xbf16, #tpu.memory_space<vmem>>, vector<32x256xbf16>
    tpu.vector_store %arg9[%c160_160, %c0_161], %136 {strides = array<i32>} : memref<288x512xbf16, #tpu.memory_space<vmem>>, vector<32x256xbf16>,
    %c32_162 = arith.constant 32 : index
    %c129_163 = arith.constant 129 : index
    %138 = vector.load %arg8[%c32_162, %c129_163] : memref<64x512xbf16, #tpu.memory_space<vmem>>, vector<32x256xbf16>
    %c1_164 = arith.constant 1 : index
    %c0_165 = arith.constant 0 : index
    %139 = vector.load %arg2[%c1_164, %c0_165] : memref<2x256xbf16, #tpu.memory_space<vmem>>, vector<1x256xbf16>
    %140 = vector.broadcast %139 : vector<1x256xbf16> to vector<32x256xbf16>
    %141 = arith.mulf %138, %140 : vector<32x256xbf16>
    %c160_166 = arith.constant 160 : index
    %c256_167 = arith.constant 256 : index
    %142 = vector.load %arg9[%c160_166, %c256_167] : memref<288x512xbf16, #tpu.memory_space<vmem>>, vector<32x256xbf16>
    tpu.vector_store %arg9[%c160_166, %c256_167], %141 {strides = array<i32>} : memref<288x512xbf16, #tpu.memory_space<vmem>>, vector<32x256xbf16>,
    %c0_168 = arith.constant 0 : index
    %c143_169 = arith.constant 143 : index
    %143 = vector.load %arg8[%c0_168, %c143_169] : memref<64x512xbf16, #tpu.memory_space<vmem>>, vector<32x256xbf16>
    %c0_170 = arith.constant 0 : index
    %c0_171 = arith.constant 0 : index
    %144 = vector.load %arg2[%c0_170, %c0_171] : memref<2x256xbf16, #tpu.memory_space<vmem>>, vector<1x256xbf16>
    %145 = vector.broadcast %144 : vector<1x256xbf16> to vector<32x256xbf16>
    %146 = arith.mulf %143, %145 : vector<32x256xbf16>
    %c192_172 = arith.constant 192 : index
    %c0_173 = arith.constant 0 : index
    %147 = vector.load %arg9[%c192_172, %c0_173] : memref<288x512xbf16, #tpu.memory_space<vmem>>, vector<32x256xbf16>
    tpu.vector_store %arg9[%c192_172, %c0_173], %146 {strides = array<i32>} : memref<288x512xbf16, #tpu.memory_space<vmem>>, vector<32x256xbf16>,
    %c32_174 = arith.constant 32 : index
    %c143_175 = arith.constant 143 : index
    %148 = vector.load %arg8[%c32_174, %c143_175] : memref<64x512xbf16, #tpu.memory_space<vmem>>, vector<32x256xbf16>
    %c0_176 = arith.constant 0 : index
    %c0_177 = arith.constant 0 : index
    %149 = vector.load %arg2[%c0_176, %c0_177] : memref<2x256xbf16, #tpu.memory_space<vmem>>, vector<1x256xbf16>
    %150 = vector.broadcast %149 : vector<1x256xbf16> to vector<32x256xbf16>
    %151 = arith.mulf %148, %150 : vector<32x256xbf16>
    %c192_178 = arith.constant 192 : index
    %c256_179 = arith.constant 256 : index
    %152 = vector.load %arg9[%c192_178, %c256_179] : memref<288x512xbf16, #tpu.memory_space<vmem>>, vector<32x256xbf16>
    tpu.vector_store %arg9[%c192_178, %c256_179], %151 {strides = array<i32>} : memref<288x512xbf16, #tpu.memory_space<vmem>>, vector<32x256xbf16>,
    %c0_180 = arith.constant 0 : index
    %c144_181 = arith.constant 144 : index
    %153 = vector.load %arg8[%c0_180, %c144_181] : memref<64x512xbf16, #tpu.memory_space<vmem>>, vector<32x256xbf16>
    %c224_182 = arith.constant 224 : index
    %c0_183 = arith.constant 0 : index
    %154 = vector.load %arg9[%c224_182, %c0_183] : memref<288x512xbf16, #tpu.memory_space<vmem>>, vector<32x256xbf16>
    tpu.vector_store %arg9[%c224_182, %c0_183], %153 {strides = array<i32>} : memref<288x512xbf16, #tpu.memory_space<vmem>>, vector<32x256xbf16>,
    %c32_184 = arith.constant 32 : index
    %c144_185 = arith.constant 144 : index
    %155 = vector.load %arg8[%c32_184, %c144_185] : memref<64x512xbf16, #tpu.memory_space<vmem>>, vector<32x256xbf16>
    %c224_186 = arith.constant 224 : index
    %c256_187 = arith.constant 256 : index
    %156 = vector.load %arg9[%c224_186, %c256_187] : memref<288x512xbf16, #tpu.memory_space<vmem>>, vector<32x256xbf16>
    tpu.vector_store %arg9[%c224_186, %c256_187], %155 {strides = array<i32>} : memref<288x512xbf16, #tpu.memory_space<vmem>>, vector<32x256xbf16>,
    %c0_188 = arith.constant 0 : index
    %c145_189 = arith.constant 145 : index
    %157 = vector.load %arg8[%c0_188, %c145_189] : memref<64x512xbf16, #tpu.memory_space<vmem>>, vector<32x256xbf16>
    %c1_190 = arith.constant 1 : index
    %c0_191 = arith.constant 0 : index
    %158 = vector.load %arg2[%c1_190, %c0_191] : memref<2x256xbf16, #tpu.memory_space<vmem>>, vector<1x256xbf16>
    %159 = vector.broadcast %158 : vector<1x256xbf16> to vector<32x256xbf16>
    %160 = arith.mulf %157, %159 : vector<32x256xbf16>
    %c256_192 = arith.constant 256 : index
    %c0_193 = arith.constant 0 : index
    %161 = vector.load %arg9[%c256_192, %c0_193] : memref<288x512xbf16, #tpu.memory_space<vmem>>, vector<32x256xbf16>
    tpu.vector_store %arg9[%c256_192, %c0_193], %160 {strides = array<i32>} : memref<288x512xbf16, #tpu.memory_space<vmem>>, vector<32x256xbf16>,
    %c32_194 = arith.constant 32 : index
    %c145_195 = arith.constant 145 : index
    %162 = vector.load %arg8[%c32_194, %c145_195] : memref<64x512xbf16, #tpu.memory_space<vmem>>, vector<32x256xbf16>
    %c1_196 = arith.constant 1 : index
    %c0_197 = arith.constant 0 : index
    %163 = vector.load %arg2[%c1_196, %c0_197] : memref<2x256xbf16, #tpu.memory_space<vmem>>, vector<1x256xbf16>
    %164 = vector.broadcast %163 : vector<1x256xbf16> to vector<32x256xbf16>
    %165 = arith.mulf %162, %164 : vector<32x256xbf16>
    %c256_198 = arith.constant 256 : index
    %c256_199 = arith.constant 256 : index
    %166 = vector.load %arg9[%c256_198, %c256_199] : memref<288x512xbf16, #tpu.memory_space<vmem>>, vector<32x256xbf16>
    tpu.vector_store %arg9[%c256_198, %c256_199], %165 {strides = array<i32>} : memref<288x512xbf16, #tpu.memory_space<vmem>>, vector<32x256xbf16>,
    %c1_200 = arith.constant 1 : index
    %c0_201 = arith.constant 0 : index
    %c0_202 = arith.constant 0 : index
    %167 = vector.load %arg3[%c1_200, %c0_201, %c0_202] : memref<2x32x288xbf16, #tpu.memory_space<vmem>>, vector<1x32x288xbf16>
    %168 = vector.shape_cast %167 : vector<1x32x288xbf16> to vector<32x288xbf16>
    %c0_203 = arith.constant 0 : index
    %c0_204 = arith.constant 0 : index
    %169 = vector.load %arg9[%c0_203, %c0_204] : memref<288x512xbf16, #tpu.memory_space<vmem>>, vector<288x512xbf16>
    %cst_205 = arith.constant dense<0.000000e+00> : vector<32x512xf32>
    %170 = tpu.matmul %168, %169, %cst_205 {dimension_numbers = #tpu.dot_dimension_numbers<[1], [0], [0], [1], [0, 0, 1, 1], [], []>} : vector<32x288xbf16>, vector<288x512xbf16>, vector<32x512xf32> -> vector<32x512xf32>
    %c1_206 = arith.constant 1 : index
    %c0_207 = arith.constant 0 : index
    %c0_208 = arith.constant 0 : index
    %171 = vector.load %arg4[%c1_206, %c0_207, %c0_208] : memref<2x32x1xf32, #tpu.memory_space<vmem>>, vector<1x32x1xf32>
    %172 = vector.shape_cast %171 : vector<1x32x1xf32> to vector<32x1xf32>
    %173 = vector.broadcast %172 : vector<32x1xf32> to vector<32x512xf32>
    %174 = arith.addf %170, %173 : vector<32x512xf32>
    %cst_209 = arith.constant 0.000000e+00 : f32
    %175 = vector.broadcast %cst_209 : f32 to vector<32x512xf32>
    %176 = arith.maximumf %174, %175 : vector<32x512xf32>
    %177 = arith.truncf %176 : vector<32x512xf32> to vector<32x512xbf16>
    %178 = vector.extract_strided_slice %177 {offsets = [0, 0], sizes = [32, 256], strides = [1, 1]} : vector<32x512xbf16> to vector<32x256xbf16>
    %c0_210 = arith.constant 0 : index
    %c128_211 = arith.constant 128 : index
    %179 = vector.load %arg8[%c0_210, %c128_211] : memref<64x512xbf16, #tpu.memory_space<vmem>>, vector<32x256xbf16>
    tpu.vector_store %arg8[%c0_210, %c128_211], %178 {strides = array<i32>} : memref<64x512xbf16, #tpu.memory_space<vmem>>, vector<32x256xbf16>,
    %180 = vector.extract_strided_slice %177 {offsets = [0, 256], sizes = [32, 256], strides = [1, 1]} : vector<32x512xbf16> to vector<32x256xbf16>
    %c32_212 = arith.constant 32 : index
    %c128_213 = arith.constant 128 : index
    %181 = vector.load %arg8[%c32_212, %c128_213] : memref<64x512xbf16, #tpu.memory_space<vmem>>, vector<32x256xbf16>
    tpu.vector_store %arg8[%c32_212, %c128_213], %180 {strides = array<i32>} : memref<64x512xbf16, #tpu.memory_space<vmem>>, vector<32x256xbf16>,
    %c0_214 = arith.constant 0 : index
    %c111_215 = arith.constant 111 : index
    %182 = vector.load %arg8[%c0_214, %c111_215] : memref<64x512xbf16, #tpu.memory_space<vmem>>, vector<32x256xbf16>
    %c0_216 = arith.constant 0 : index
    %c0_217 = arith.constant 0 : index
    %183 = vector.load %arg2[%c0_216, %c0_217] : memref<2x256xbf16, #tpu.memory_space<vmem>>, vector<1x256xbf16>
    %184 = vector.broadcast %183 : vector<1x256xbf16> to vector<32x256xbf16>
    %185 = arith.mulf %182, %184 : vector<32x256xbf16>
    %c0_218 = arith.constant 0 : index
    %c0_219 = arith.constant 0 : index
    %186 = vector.load %arg9[%c0_218, %c0_219] : memref<288x512xbf16, #tpu.memory_space<vmem>>, vector<32x256xbf16>
    tpu.vector_store %arg9[%c0_218, %c0_219], %185 {strides = array<i32>} : memref<288x512xbf16, #tpu.memory_space<vmem>>, vector<32x256xbf16>,
    %c32_220 = arith.constant 32 : index
    %c111_221 = arith.constant 111 : index
    %187 = vector.load %arg8[%c32_220, %c111_221] : memref<64x512xbf16, #tpu.memory_space<vmem>>, vector<32x256xbf16>
    %c0_222 = arith.constant 0 : index
    %c0_223 = arith.constant 0 : index
    %188 = vector.load %arg2[%c0_222, %c0_223] : memref<2x256xbf16, #tpu.memory_space<vmem>>, vector<1x256xbf16>
    %189 = vector.broadcast %188 : vector<1x256xbf16> to vector<32x256xbf16>
    %190 = arith.mulf %187, %189 : vector<32x256xbf16>
    %c0_224 = arith.constant 0 : index
    %c256_225 = arith.constant 256 : index
    %191 = vector.load %arg9[%c0_224, %c256_225] : memref<288x512xbf16, #tpu.memory_space<vmem>>, vector<32x256xbf16>
    tpu.vector_store %arg9[%c0_224, %c256_225], %190 {strides = array<i32>} : memref<288x512xbf16, #tpu.memory_space<vmem>>, vector<32x256xbf16>,
    %c0_226 = arith.constant 0 : index
    %c112_227 = arith.constant 112 : index
    %192 = vector.load %arg8[%c0_226, %c112_227] : memref<64x512xbf16, #tpu.memory_space<vmem>>, vector<32x256xbf16>
    %c32_228 = arith.constant 32 : index
    %c0_229 = arith.constant 0 : index
    %193 = vector.load %arg9[%c32_228, %c0_229] : memref<288x512xbf16, #tpu.memory_space<vmem>>, vector<32x256xbf16>
    tpu.vector_store %arg9[%c32_228, %c0_229], %192 {strides = array<i32>} : memref<288x512xbf16, #tpu.memory_space<vmem>>, vector<32x256xbf16>,
    %c32_230 = arith.constant 32 : index
    %c112_231 = arith.constant 112 : index
    %194 = vector.load %arg8[%c32_230, %c112_231] : memref<64x512xbf16, #tpu.memory_space<vmem>>, vector<32x256xbf16>
    %c32_232 = arith.constant 32 : index
    %c256_233 = arith.constant 256 : index
    %195 = vector.load %arg9[%c32_232, %c256_233] : memref<288x512xbf16, #tpu.memory_space<vmem>>, vector<32x256xbf16>
    tpu.vector_store %arg9[%c32_232, %c256_233], %194 {strides = array<i32>} : memref<288x512xbf16, #tpu.memory_space<vmem>>, vector<32x256xbf16>,
    %c0_234 = arith.constant 0 : index
    %c113_235 = arith.constant 113 : index
    %196 = vector.load %arg8[%c0_234, %c113_235] : memref<64x512xbf16, #tpu.memory_space<vmem>>, vector<32x256xbf16>
    %c1_236 = arith.constant 1 : index
    %c0_237 = arith.constant 0 : index
    %197 = vector.load %arg2[%c1_236, %c0_237] : memref<2x256xbf16, #tpu.memory_space<vmem>>, vector<1x256xbf16>
    %198 = vector.broadcast %197 : vector<1x256xbf16> to vector<32x256xbf16>
    %199 = arith.mulf %196, %198 : vector<32x256xbf16>
    %c64_238 = arith.constant 64 : index
    %c0_239 = arith.constant 0 : index
    %200 = vector.load %arg9[%c64_238, %c0_239] : memref<288x512xbf16, #tpu.memory_space<vmem>>, vector<32x256xbf16>
    tpu.vector_store %arg9[%c64_238, %c0_239], %199 {strides = array<i32>} : memref<288x512xbf16, #tpu.memory_space<vmem>>, vector<32x256xbf16>,
    %c32_240 = arith.constant 32 : index
    %c113_241 = arith.constant 113 : index
    %201 = vector.load %arg8[%c32_240, %c113_241] : memref<64x512xbf16, #tpu.memory_space<vmem>>, vector<32x256xbf16>
    %c1_242 = arith.constant 1 : index
    %c0_243 = arith.constant 0 : index
    %202 = vector.load %arg2[%c1_242, %c0_243] : memref<2x256xbf16, #tpu.memory_space<vmem>>, vector<1x256xbf16>
    %203 = vector.broadcast %202 : vector<1x256xbf16> to vector<32x256xbf16>
    %204 = arith.mulf %201, %203 : vector<32x256xbf16>
    %c64_244 = arith.constant 64 : index
    %c256_245 = arith.constant 256 : index
    %205 = vector.load %arg9[%c64_244, %c256_245] : memref<288x512xbf16, #tpu.memory_space<vmem>>, vector<32x256xbf16>
    tpu.vector_store %arg9[%c64_244, %c256_245], %204 {strides = array<i32>} : memref<288x512xbf16, #tpu.memory_space<vmem>>, vector<32x256xbf16>,
    %c0_246 = arith.constant 0 : index
    %c127_247 = arith.constant 127 : index
    %206 = vector.load %arg8[%c0_246, %c127_247] : memref<64x512xbf16, #tpu.memory_space<vmem>>, vector<32x256xbf16>
    %c0_248 = arith.constant 0 : index
    %c0_249 = arith.constant 0 : index
    %207 = vector.load %arg2[%c0_248, %c0_249] : memref<2x256xbf16, #tpu.memory_space<vmem>>, vector<1x256xbf16>
    %208 = vector.broadcast %207 : vector<1x256xbf16> to vector<32x256xbf16>
    %209 = arith.mulf %206, %208 : vector<32x256xbf16>
    %c96_250 = arith.constant 96 : index
    %c0_251 = arith.constant 0 : index
    %210 = vector.load %arg9[%c96_250, %c0_251] : memref<288x512xbf16, #tpu.memory_space<vmem>>, vector<32x256xbf16>
    tpu.vector_store %arg9[%c96_250, %c0_251], %209 {strides = array<i32>} : memref<288x512xbf16, #tpu.memory_space<vmem>>, vector<32x256xbf16>,
    %c32_252 = arith.constant 32 : index
    %c127_253 = arith.constant 127 : index
    %211 = vector.load %arg8[%c32_252, %c127_253] : memref<64x512xbf16, #tpu.memory_space<vmem>>, vector<32x256xbf16>
    %c0_254 = arith.constant 0 : index
    %c0_255 = arith.constant 0 : index
    %212 = vector.load %arg2[%c0_254, %c0_255] : memref<2x256xbf16, #tpu.memory_space<vmem>>, vector<1x256xbf16>
    %213 = vector.broadcast %212 : vector<1x256xbf16> to vector<32x256xbf16>
    %214 = arith.mulf %211, %213 : vector<32x256xbf16>
    %c96_256 = arith.constant 96 : index
    %c256_257 = arith.constant 256 : index
    %215 = vector.load %arg9[%c96_256, %c256_257] : memref<288x512xbf16, #tpu.memory_space<vmem>>, vector<32x256xbf16>
    tpu.vector_store %arg9[%c96_256, %c256_257], %214 {strides = array<i32>} : memref<288x512xbf16, #tpu.memory_space<vmem>>, vector<32x256xbf16>,
    %c0_258 = arith.constant 0 : index
    %c128_259 = arith.constant 128 : index
    %216 = vector.load %arg8[%c0_258, %c128_259] : memref<64x512xbf16, #tpu.memory_space<vmem>>, vector<32x256xbf16>
    %c128_260 = arith.constant 128 : index
    %c0_261 = arith.constant 0 : index
    %217 = vector.load %arg9[%c128_260, %c0_261] : memref<288x512xbf16, #tpu.memory_space<vmem>>, vector<32x256xbf16>
    tpu.vector_store %arg9[%c128_260, %c0_261], %216 {strides = array<i32>} : memref<288x512xbf16, #tpu.memory_space<vmem>>, vector<32x256xbf16>,
    %c32_262 = arith.constant 32 : index
    %c128_263 = arith.constant 128 : index
    %218 = vector.load %arg8[%c32_262, %c128_263] : memref<64x512xbf16, #tpu.memory_space<vmem>>, vector<32x256xbf16>
    %c128_264 = arith.constant 128 : index
    %c256_265 = arith.constant 256 : index
    %219 = vector.load %arg9[%c128_264, %c256_265] : memref<288x512xbf16, #tpu.memory_space<vmem>>, vector<32x256xbf16>
    tpu.vector_store %arg9[%c128_264, %c256_265], %218 {strides = array<i32>} : memref<288x512xbf16, #tpu.memory_space<vmem>>, vector<32x256xbf16>,
    %c0_266 = arith.constant 0 : index
    %c129_267 = arith.constant 129 : index
    %220 = vector.load %arg8[%c0_266, %c129_267] : memref<64x512xbf16, #tpu.memory_space<vmem>>, vector<32x256xbf16>
    %c1_268 = arith.constant 1 : index
    %c0_269 = arith.constant 0 : index
    %221 = vector.load %arg2[%c1_268, %c0_269] : memref<2x256xbf16, #tpu.memory_space<vmem>>, vector<1x256xbf16>
    %222 = vector.broadcast %221 : vector<1x256xbf16> to vector<32x256xbf16>
    %223 = arith.mulf %220, %222 : vector<32x256xbf16>
    %c160_270 = arith.constant 160 : index
    %c0_271 = arith.constant 0 : index
    %224 = vector.load %arg9[%c160_270, %c0_271] : memref<288x512xbf16, #tpu.memory_space<vmem>>, vector<32x256xbf16>
    tpu.vector_store %arg9[%c160_270, %c0_271], %223 {strides = array<i32>} : memref<288x512xbf16, #tpu.memory_space<vmem>>, vector<32x256xbf16>,
    %c32_272 = arith.constant 32 : index
    %c129_273 = arith.constant 129 : index
    %225 = vector.load %arg8[%c32_272, %c129_273] : memref<64x512xbf16, #tpu.memory_space<vmem>>, vector<32x256xbf16>
    %c1_274 = arith.constant 1 : index
    %c0_275 = arith.constant 0 : index
    %226 = vector.load %arg2[%c1_274, %c0_275] : memref<2x256xbf16, #tpu.memory_space<vmem>>, vector<1x256xbf16>
    %227 = vector.broadcast %226 : vector<1x256xbf16> to vector<32x256xbf16>
    %228 = arith.mulf %225, %227 : vector<32x256xbf16>
    %c160_276 = arith.constant 160 : index
    %c256_277 = arith.constant 256 : index
    %229 = vector.load %arg9[%c160_276, %c256_277] : memref<288x512xbf16, #tpu.memory_space<vmem>>, vector<32x256xbf16>
    tpu.vector_store %arg9[%c160_276, %c256_277], %228 {strides = array<i32>} : memref<288x512xbf16, #tpu.memory_space<vmem>>, vector<32x256xbf16>,
    %c0_278 = arith.constant 0 : index
    %c143_279 = arith.constant 143 : index
    %230 = vector.load %arg8[%c0_278, %c143_279] : memref<64x512xbf16, #tpu.memory_space<vmem>>, vector<32x256xbf16>
    %c0_280 = arith.constant 0 : index
    %c0_281 = arith.constant 0 : index
    %231 = vector.load %arg2[%c0_280, %c0_281] : memref<2x256xbf16, #tpu.memory_space<vmem>>, vector<1x256xbf16>
    %232 = vector.broadcast %231 : vector<1x256xbf16> to vector<32x256xbf16>
    %233 = arith.mulf %230, %232 : vector<32x256xbf16>
    %c192_282 = arith.constant 192 : index
    %c0_283 = arith.constant 0 : index
    %234 = vector.load %arg9[%c192_282, %c0_283] : memref<288x512xbf16, #tpu.memory_space<vmem>>, vector<32x256xbf16>
    tpu.vector_store %arg9[%c192_282, %c0_283], %233 {strides = array<i32>} : memref<288x512xbf16, #tpu.memory_space<vmem>>, vector<32x256xbf16>,
    %c32_284 = arith.constant 32 : index
    %c143_285 = arith.constant 143 : index
    %235 = vector.load %arg8[%c32_284, %c143_285] : memref<64x512xbf16, #tpu.memory_space<vmem>>, vector<32x256xbf16>
    %c0_286 = arith.constant 0 : index
    %c0_287 = arith.constant 0 : index
    %236 = vector.load %arg2[%c0_286, %c0_287] : memref<2x256xbf16, #tpu.memory_space<vmem>>, vector<1x256xbf16>
    %237 = vector.broadcast %236 : vector<1x256xbf16> to vector<32x256xbf16>
    %238 = arith.mulf %235, %237 : vector<32x256xbf16>
    %c192_288 = arith.constant 192 : index
    %c256_289 = arith.constant 256 : index
    %239 = vector.load %arg9[%c192_288, %c256_289] : memref<288x512xbf16, #tpu.memory_space<vmem>>, vector<32x256xbf16>
    tpu.vector_store %arg9[%c192_288, %c256_289], %238 {strides = array<i32>} : memref<288x512xbf16, #tpu.memory_space<vmem>>, vector<32x256xbf16>,
    %c0_290 = arith.constant 0 : index
    %c144_291 = arith.constant 144 : index
    %240 = vector.load %arg8[%c0_290, %c144_291] : memref<64x512xbf16, #tpu.memory_space<vmem>>, vector<32x256xbf16>
    %c224_292 = arith.constant 224 : index
    %c0_293 = arith.constant 0 : index
    %241 = vector.load %arg9[%c224_292, %c0_293] : memref<288x512xbf16, #tpu.memory_space<vmem>>, vector<32x256xbf16>
    tpu.vector_store %arg9[%c224_292, %c0_293], %240 {strides = array<i32>} : memref<288x512xbf16, #tpu.memory_space<vmem>>, vector<32x256xbf16>,
    %c32_294 = arith.constant 32 : index
    %c144_295 = arith.constant 144 : index
    %242 = vector.load %arg8[%c32_294, %c144_295] : memref<64x512xbf16, #tpu.memory_space<vmem>>, vector<32x256xbf16>
    %c224_296 = arith.constant 224 : index
    %c256_297 = arith.constant 256 : index
    %243 = vector.load %arg9[%c224_296, %c256_297] : memref<288x512xbf16, #tpu.memory_space<vmem>>, vector<32x256xbf16>
    tpu.vector_store %arg9[%c224_296, %c256_297], %242 {strides = array<i32>} : memref<288x512xbf16, #tpu.memory_space<vmem>>, vector<32x256xbf16>,
    %c0_298 = arith.constant 0 : index
    %c145_299 = arith.constant 145 : index
    %244 = vector.load %arg8[%c0_298, %c145_299] : memref<64x512xbf16, #tpu.memory_space<vmem>>, vector<32x256xbf16>
    %c1_300 = arith.constant 1 : index
    %c0_301 = arith.constant 0 : index
    %245 = vector.load %arg2[%c1_300, %c0_301] : memref<2x256xbf16, #tpu.memory_space<vmem>>, vector<1x256xbf16>
    %246 = vector.broadcast %245 : vector<1x256xbf16> to vector<32x256xbf16>
    %247 = arith.mulf %244, %246 : vector<32x256xbf16>
    %c256_302 = arith.constant 256 : index
    %c0_303 = arith.constant 0 : index
    %248 = vector.load %arg9[%c256_302, %c0_303] : memref<288x512xbf16, #tpu.memory_space<vmem>>, vector<32x256xbf16>
    tpu.vector_store %arg9[%c256_302, %c0_303], %247 {strides = array<i32>} : memref<288x512xbf16, #tpu.memory_space<vmem>>, vector<32x256xbf16>,
    %c32_304 = arith.constant 32 : index
    %c145_305 = arith.constant 145 : index
    %249 = vector.load %arg8[%c32_304, %c145_305] : memref<64x512xbf16, #tpu.memory_space<vmem>>, vector<32x256xbf16>
    %c1_306 = arith.constant 1 : index
    %c0_307 = arith.constant 0 : index
    %250 = vector.load %arg2[%c1_306, %c0_307] : memref<2x256xbf16, #tpu.memory_space<vmem>>, vector<1x256xbf16>
    %251 = vector.broadcast %250 : vector<1x256xbf16> to vector<32x256xbf16>
    %252 = arith.mulf %249, %251 : vector<32x256xbf16>
    %c256_308 = arith.constant 256 : index
    %c256_309 = arith.constant 256 : index
    %253 = vector.load %arg9[%c256_308, %c256_309] : memref<288x512xbf16, #tpu.memory_space<vmem>>, vector<32x256xbf16>
    tpu.vector_store %arg9[%c256_308, %c256_309], %252 {strides = array<i32>} : memref<288x512xbf16, #tpu.memory_space<vmem>>, vector<32x256xbf16>,
    %c0_310 = arith.constant 0 : index
    %c0_311 = arith.constant 0 : index
    %254 = vector.load %arg5[%c0_310, %c0_311] : memref<32x288xbf16, #tpu.memory_space<vmem>>, vector<32x288xbf16>
    %c0_312 = arith.constant 0 : index
    %c0_313 = arith.constant 0 : index
    %255 = vector.load %arg9[%c0_312, %c0_313] : memref<288x512xbf16, #tpu.memory_space<vmem>>, vector<288x512xbf16>
    %cst_314 = arith.constant dense<0.000000e+00> : vector<32x512xf32>
    %256 = tpu.matmul %254, %255, %cst_314 {dimension_numbers = #tpu.dot_dimension_numbers<[1], [0], [0], [1], [0, 0, 1, 1], [], []>} : vector<32x288xbf16>, vector<288x512xbf16>, vector<32x512xf32> -> vector<32x512xf32>
    %c0_315 = arith.constant 0 : index
    %c0_316 = arith.constant 0 : index
    %257 = vector.load %arg6[%c0_315, %c0_316] : memref<32x1xf32, #tpu.memory_space<vmem>>, vector<32x1xf32>
    %258 = vector.broadcast %257 : vector<32x1xf32> to vector<32x512xf32>
    %259 = arith.addf %256, %258 : vector<32x512xf32>
    %260 = vector.extract_strided_slice %259 {offsets = [0, 0], sizes = [32, 256], strides = [1, 1]} : vector<32x512xf32> to vector<32x256xf32>
    %c0_317 = arith.constant 0 : index
    %c0_318 = arith.constant 0 : index
    %c0_319 = arith.constant 0 : index
    %261 = vector.load %arg7[%c0_317, %c0_318, %c0_319] : memref<2x32x256xf32, #tpu.memory_space<vmem>>, vector<1x32x256xf32>
    %262 = vector.shape_cast %261 : vector<1x32x256xf32> to vector<32x256xf32>
    %263 = vector.shape_cast %260 : vector<32x256xf32> to vector<1x32x256xf32>
    tpu.vector_store %arg7[%c0_317, %c0_318, %c0_319], %263 {strides = array<i32>} : memref<2x32x256xf32, #tpu.memory_space<vmem>>, vector<1x32x256xf32>,
    %264 = vector.extract_strided_slice %259 {offsets = [0, 256], sizes = [32, 256], strides = [1, 1]} : vector<32x512xf32> to vector<32x256xf32>
    %c1_320 = arith.constant 1 : index
    %c0_321 = arith.constant 0 : index
    %c0_322 = arith.constant 0 : index
    %265 = vector.load %arg7[%c1_320, %c0_321, %c0_322] : memref<2x32x256xf32, #tpu.memory_space<vmem>>, vector<1x32x256xf32>
    %266 = vector.shape_cast %265 : vector<1x32x256xf32> to vector<32x256xf32>
    %267 = vector.shape_cast %264 : vector<32x256xf32> to vector<1x32x256xf32>
    tpu.vector_store %arg7[%c1_320, %c0_321, %c0_322], %267 {strides = array<i32>} : memref<2x32x256xf32, #tpu.memory_space<vmem>>, vector<1x32x256xf32>,
    return
  }
  func.func @transform_0(%arg0: i32) -> (i32, i32, i32) {
    %c0_i32 = arith.constant 0 : i32
    %c0_i32_0 = arith.constant 0 : i32
    %c0_i32_1 = arith.constant 0 : i32
    %c0_i32_2 = arith.constant 0 : i32
    return %c0_i32, %c0_i32_0, %c0_i32_1 : i32, i32, i32
  }
  func.func @transform_1(%arg0: i32) -> (i32, i32) {
    %c0_i32 = arith.constant 0 : i32
    %c0_i32_0 = arith.constant 0 : i32
    %c0_i32_1 = arith.constant 0 : i32
    return %c0_i32, %c0_i32_0 : i32, i32
  }
  func.func @transform_2(%arg0: i32) -> (i32, i32, i32) {
    %c0_i32 = arith.constant 0 : i32
    %c0_i32_0 = arith.constant 0 : i32
    %c0_i32_1 = arith.constant 0 : i32
    %c0_i32_2 = arith.constant 0 : i32
    return %c0_i32, %c0_i32_0, %c0_i32_1 : i32, i32, i32
  }
  func.func @transform_3(%arg0: i32) -> (i32, i32, i32) {
    %c0_i32 = arith.constant 0 : i32
    %c0_i32_0 = arith.constant 0 : i32
    %c0_i32_1 = arith.constant 0 : i32
    %c0_i32_2 = arith.constant 0 : i32
    return %c0_i32, %c0_i32_0, %c0_i32_1 : i32, i32, i32
  }
  func.func @transform_4(%arg0: i32) -> (i32, i32) {
    %c0_i32 = arith.constant 0 : i32
    %c0_i32_0 = arith.constant 0 : i32
    %c0_i32_1 = arith.constant 0 : i32
    return %c0_i32, %c0_i32_0 : i32, i32
  }
  func.func @transform_5(%arg0: i32) -> (i32, i32) {
    %c0_i32 = arith.constant 0 : i32
    %c0_i32_0 = arith.constant 0 : i32
    %c0_i32_1 = arith.constant 0 : i32
    return %c0_i32, %c0_i32_0 : i32, i32
  }
  func.func @transform_6(%arg0: i32) -> (i32, i32, i32) {
    %c0_i32 = arith.constant 0 : i32
    %c0_i32_0 = arith.constant 0 : i32
    %c0_i32_1 = arith.constant 0 : i32
    %c0_i32_2 = arith.constant 0 : i32
    return %c0_i32, %c0_i32_0, %c0_i32_1 : i32, i32, i32
  }
}

</mosaic_0001>

<bundles_post_ra>
// kernel: tpu_custom_call.1
= control target key start
LH: loop header
LB: loop body
LE: loop exit
PB: predicated region body
PF: predicated region fallthrough
CT: control target
= control target key end

     0   :  { %11 = vsyncpa [#allocation5], 0  ;;  %s10808_s0 = inlined_call_operand.hbm [shape: bf16[2,32,256], index: 0, kind: input, shape index: {}]   ;;  %s10809_s1 = inlined_call_operand.vmem [shape: bf16[2,256], index: 1, kind: input, shape index: {}]   ;;  %s10810_s2 = inlined_call_operand.vmem [shape: bf16[2,32,288], index: 2, kind: input, shape index: {}]   ;;  %s10811_s3 = inlined_call_operand.vmem [shape: f32[2,32,1], index: 3, kind: input, shape index: {}]   ;;  %s10812_s4 = inlined_call_operand.hbm [shape: bf16[32,288], index: 4, kind: input, shape index: {}]   ;;  %s10813_s5 = inlined_call_operand.vmem [shape: f32[32,1], index: 5, kind: input, shape index: {}]   ;;  %s10814_s6 = inlined_call_operand.hbm [shape: f32[2,32,256], index: 6, kind: output, shape index: {}]  }
   0x1   :  { %12 = vsyncpa [#allocation8], 0 }
   0x2   :  { %13 = vsyncpa [#allocation6], 0  ;;  %s7743_s21 = smov [#allocation4]  }
   0x3   :  { %s19_s22 = sshll.u32 %s7743_s21, 4  ;;  %s20_s22 = int_to_ptr.vmem [resolvable:$true] %s19_s22 }
   0x4   :  { %s7685_s23 = scalar_lea.vmem %s20_s22, 1024  ;;  %p7690_p1 = scmp.lt.s32.totalorder %s20_s22, %s20_s22 }
   0x5   :  { %p7686_p0 = scmp.ne.s32.totalorder %s20_s22, %s7685_s23  ;;  %p7691_p2 = scmp.lt.s32.totalorder %s7685_s23, %s7685_s23 }
   0x7   :  { %p7692_p3 = por %p7691_p2, %p7690_p1 }
   0x9   :  { %p7693_p4 = pnand %p7692_p3, %p7686_p0 }
   0xb   :  { %7696 = shalt.err (!%p7693_p4)
}
   0xc   :  { %s7744_s24 = smov 128   ;;  %s7745_s25 = smov 8  }
   0xd   :  { %25 = dma.hbm_to_vmem [thread:$0]  %s10808_s0, 1024, %s20_s22, [#allocation5], %s7744_s24, %s7744_s24, %s7745_s25  }
   0xe   :  { %s7746_s28 = smov [#allocation7]  }
   0xf   :  { %s37_s29 = sshll.u32 %s7746_s28, 4  ;;  %s38_s29 = int_to_ptr.vmem [resolvable:$true] %s37_s29 }
  0x10   :  { %s7705_s30 = scalar_lea.vmem %s38_s29, 768  ;;  %p7710_p6 = scmp.lt.s32.totalorder %s38_s29, %s38_s29 }
  0x11   :  { %p7706_p5 = scmp.ne.s32.totalorder %s38_s29, %s7705_s30  ;;  %p7711_p7 = scmp.lt.s32.totalorder %s7705_s30, %s7705_s30 }
  0x13   :  { %p7712_p8 = por %p7711_p7, %p7710_p6 }
  0x15   :  { %p7713_p9 = pnand %p7712_p8, %p7706_p5 }
  0x17   :  { %7716 = shalt.err (!%p7713_p9)
}
  0x18   :  { %s7747_s7 = smov 192   ;;  %s7748_s8 = smov 12  }
  0x19   :  { %43 = dma.hbm_to_vmem [thread:$0]  %s10812_s4, 768, %s38_s29, [#allocation8], %s7747_s7, %s7747_s7, %s7748_s8  }
  0x1a   :  { %7737 = dma.done.wait [#allocation5], 1024  }
  0x1b   :  { %7738 = vsyncadd [#allocation5], 4294966272 }
  0x1c   :  { %7739 = dma.done.wait [#allocation8], 768  }
  0x1d   :  { %7740 = vsyncadd [#allocation8], 4294966528  ;;  %v107_v0 = vlaneseq  ;;  %v7749_v1 = vmov 1966171168   ;;  %v10815_v4 = vmov 0   ;;  %v7826_v8 = vld [vmem:[#allocation4 + $0x10] sm:$0xff] }
  0x1e   :  { %v105_v2 = vunpack.c.l.s4 %v7749_v1  ;;  %57 = vst [vmem:[#allocation2 + $0x20] sm:$0xff] %v10815_v4  ;;  %58 = vst [vmem:[#allocation2 + $0x28] sm:$0xff] %v10815_v4  ;;  %2289 = vmatprep.mubr.bf16.mxu1 %v10815_v4  ;;  %7617 = vset.pattern.permute.xlu0 %v10815_v4  ;;  %v7247_v7 = vld.sshfl [vmem:[%s10809_s1] sm:$0x11 pattern:$0x75316420] }
  0x1f   :  { %v108_v3 = vshrl.u32 %v107_v0, 7  ;;  %53 = vst [vmem:[#allocation2] sm:$0xff] %v10815_v4  ;;  %54 = vst [vmem:[#allocation2 + $0x8] sm:$0xff] %v10815_v4  ;;  %7618 = vset.pattern.permute.xlu1 %v10815_v4  ;;  %v7828_v9 = vld [vmem:[#allocation4 + $0x18] sm:$0xff]  ;;  %v792_v11 = vcombine.high %v7247_v7, %v7247_v7  ;;  %v7835_v13 = vld [vmem:[#allocation4] sm:$0xff]  ;;  %s7751_s11 = smov 127  }
  0x20   :  { %55 = vst [vmem:[#allocation2 + $0x10] sm:$0xff] %v10815_v4  ;;  %56 = vst [vmem:[#allocation2 + $0x18] sm:$0xff] %v10815_v4  ;;  %v106_v5 = vunpack.c.0.s8 %v105_v2  ;;  %v7837_v14 = vld [vmem:[#allocation4 + $0x8] sm:$0xff]  ;;  %v7839_v15 = vld [vmem:[#allocation4 + $0x30] sm:$0xff]  ;;  %s7752_s12 = smov 111   ;;  %s7753_s13 = smov 17  }
  0x21   :  { %59 = vst [vmem:[#allocation2 + $0x30] sm:$0xff] %v10815_v4  ;;  %60 = vst [vmem:[#allocation2 + $0x38] sm:$0xff] %v10815_v4  ;;  %v7830_v10 = vsub.s32 0, %v108_v3  ;;  %v7844_v16 = vld [vmem:[#allocation4 + $0x38] sm:$0xff]  ;;  %v7846_v17 = vld [vmem:[#allocation4 + $0x20] sm:$0xff]  ;;  %s7754_s14 = smov 15  }
  0x22   :  { %61 = vst [vmem:[#allocation2 + $0x40] sm:$0xff] %v10815_v4  ;;  %62 = vst [vmem:[#allocation2 + $0x48] sm:$0xff] %v10815_v4  ;;  %v7821_v6 = vsub.s32 %v106_v5, %v108_v3  ;;  %v7848_v18 = vld [vmem:[#allocation4 + $0x28] sm:$0xff]  ;;  %s7755_s15 = smov 113   ;;  %s7756_s16 = smov 1   ;;  %vm714_vm0 = vcmask 1039360  }
  0x23   :  { %63 = vst [vmem:[#allocation2 + $0x50] sm:$0xff] %v10815_v4  ;;  %64 = vst [vmem:[#allocation2 + $0x58] sm:$0xff] %v10815_v4  ;;  %s7757_s17 = smov 16   ;;  %vm140_vm1 = vcmask 908288   ;;  %vm186_vm2 = vcmask 138240   ;;  %vm484_vm3 = vcmask 924672  }
  0x24   :  { %65 = vst [vmem:[#allocation2 + $0x60] sm:$0xff] %v10815_v4  ;;  %66 = vst [vmem:[#allocation2 + $0x68] sm:$0xff] %v10815_v4  ;;  %v799_v12 = vrot.slane %v7247_v7, %v7821_v6  ;;  %v806_v19 = vrot.slane %v792_v11, %v7821_v6  ;;  %s7758_s18 = smov 112   ;;  %vm529_vm4 = vcmask 121856   ;;  %vm184_vm5 = vcmask 1043456  }
  0x25   :  { %67 = vst [vmem:[#allocation2 + $0x70] sm:$0xff] %v10815_v4  ;;  %68 = vst [vmem:[#allocation2 + $0x78] sm:$0xff] %v10815_v4  ;;  %vm759_vm6 = vcmask 7168   ;;  %vm356_vm7 = vcmask 130048   ;;  %vm2197_vm8 = vcmask 261120   ;;  %vm1401_vm9 = vcmask 916480  }
  0x26   :  { %10844 = vst [vmem:[#allocation13_spill] sm:$0xff] %v7821_v6  ;;  %10845 = vst [vmem:[#allocation14_spill] sm:$0xff] %v7830_v10  ;;  %v808_v20 = vpack.i.b16 %v799_v12, %v799_v12  ;;  %v1506_v21 = vshrl.u32 %v799_v12, 16  ;;  %v815_v23 = vpack.i.b16 %v806_v19, %v806_v19  ;;  %v1514_v24 = vshrl.u32 %v806_v19, 16 }
  0x27   :  { %75 = vst [vmem:[#allocation2 + $0x24] sm:$0xff] %v7826_v8  ;;  %76 = vst [vmem:[#allocation2 + $0x34] sm:$0xff] %v7828_v9 }
  0x28   :  { %73 = vst [vmem:[#allocation2 + $0x4] sm:$0xff] %v7835_v13  ;;  %74 = vst [vmem:[#allocation2 + $0x14] sm:$0xff] %v7837_v14  ;;  %v813_v22 = vrot.slane %v808_v20, %v7830_v10  ;;  %v820_v25 = vrot.slane %v815_v23, %v7830_v10  ;;  %v1507_v26 = vpack.i.b16 %v1506_v21, %v1506_v21 }
  0x29   :  { %84 = vst [vmem:[#allocation2 + $0x64] sm:$0xff] %v7839_v15  ;;  %85 = vst [vmem:[#allocation2 + $0x74] sm:$0xff] %v7844_v16  ;;  %v1515_v27 = vpack.i.b16 %v1514_v24, %v1514_v24 }
  0x2a   :  { %82 = vst [vmem:[#allocation2 + $0x44] sm:$0xff] %v7846_v17  ;;  %83 = vst [vmem:[#allocation2 + $0x54] sm:$0xff] %v7848_v18  ;;  %v7248_v28 = vcombine.low %v813_v22, %v820_v25  ;;  %v1512_v29 = vrot.slane %v1507_v26, %v7830_v10  ;;  %v8245_v6 = vld [vmem:[#allocation2 + $0x5c] sm:$0xf] }
  0x2b   :  { %v1520_v30 = vrot.slane %v1515_v27, %v7830_v10 }
  0x2c   :  { %826 = vrot.lane.b32.xlu1 %v7248_v28, %s7751_s11  ;;  %711 = vrot.lane.b32.xlu0 %v7248_v28, %s7751_s11 }
  0x2d   :  { %v7258_v31 = vcombine.low %v1512_v29, %v1520_v30 }
  0x2e   :  { %v320_v32 = vld [vmem:[#allocation2 + $0x28] sm:$0xf]  ;;  %v7870_v33 = vld [vmem:[#allocation2 + $0x20] sm:$0xff]  ;;  %v322_v34 = vld [vmem:[#allocation2 + $0x38] sm:$0xf] }
  0x2f   :  { %v7875_v35 = vld [vmem:[#allocation2 + $0x30] sm:$0xff]  ;;  %v316_v36 = vld [vmem:[#allocation2 + $0x8] sm:$0xf]  ;;  %v7880_v37 = vld [vmem:[#allocation2] sm:$0xff] }
  0x30   :  { %137 = vrot.lane.b32.xlu1 %v7248_v28, %s7752_s12  ;;  %253 = vrot.lane.b32.xlu0 %v7248_v28, %s7752_s12  ;;  %v318_v38 = vld [vmem:[#allocation2 + $0x18] sm:$0xf]  ;;  %v7885_v39 = vld [vmem:[#allocation2 + $0x10] sm:$0xff]  ;;  %v377_v40 = vld [vmem:[#allocation2 + $0x68] sm:$0xf] }
  0x31   :  { %v7890_v41 = vld [vmem:[#allocation2 + $0x60] sm:$0xff]  ;;  %v379_v42 = vld [vmem:[#allocation2 + $0x78] sm:$0xf]  ;;  %v7895_v43 = vld [vmem:[#allocation2 + $0x70] sm:$0xff] }
  0x32   :  { %v780_v46 = vld [vmem:[#allocation2 + $0x68] sm:$0xf]  ;;  %v782_v52 = vld [vmem:[#allocation2 + $0x78] sm:$0xf]  ;;  %v7913_v20 = vld [vmem:[#allocation2 + $0x40] sm:$0xff] }
  0x33   :  { %v665_v47 = vld [vmem:[#allocation2 + $0x28] sm:$0xf]  ;;  %v667_v53 = vld [vmem:[#allocation2 + $0x38] sm:$0xf]  ;;  %v7918_v24 = vld [vmem:[#allocation2 + $0x50] sm:$0xff] }
  0x34   :  { %1526 = vrot.lane.b32.xlu0 %v7258_v31, %s7753_s13  ;;  %1185 = vrot.lane.b32.xlu1 %v7248_v28, %s7754_s14  ;;  %v776_v56 = vld [vmem:[#allocation2 + $0x48] sm:$0xf]  ;;  %v778_v61 = vld [vmem:[#allocation2 + $0x58] sm:$0xf] }
  0x35   :  { %v661_v57 = vld [vmem:[#allocation2 + $0x8] sm:$0xf]  ;;  %v663_v62 = vld [vmem:[#allocation2 + $0x18] sm:$0xf] }
  0x36   :  { %v91_v63 = vld [vmem:[#allocation2 + $0x28] sm:$0xf]  ;;  %v93_v11 = vld [vmem:[#allocation2 + $0x38] sm:$0xf] }
  0x37   :  { %v87_v21 = vld [vmem:[#allocation2 + $0x8] sm:$0xf]  ;;  %v89_v25 = vld [vmem:[#allocation2 + $0x18] sm:$0xf] }
  0x38   :  { %1298 = vrot.lane.b32.xlu1 %v7248_v28, %s7754_s14  ;;  %598 = vrot.lane.b32.xlu0 %v7258_v31, %s7755_s15 }
  0x3c   :  { %481 = vrot.lane.b32.xlu1 %v7258_v31, %s7755_s15  ;;  %957 = vrot.lane.b32.xlu0 %v7258_v31, %s7756_s16 }
  0x40   :  { %1072 = vrot.lane.b32.xlu0 %v7258_v31, %s7756_s16  ;;  %1641 = vrot.lane.b32.xlu1 %v7258_v31, %s7753_s13 }
  0x44   :  { %341 = vrot.lane.b32.xlu1 %v320_v32, %s7757_s17  ;;  %339 = vrot.lane.b32.xlu0 %v7870_v33, %s7757_s17 }
  0x48   :  { %345 = vrot.lane.b32.xlu1 %v322_v34, %s7757_s17  ;;  %343 = vrot.lane.b32.xlu0 %v7875_v35, %s7757_s17 }
  0x4c   :  { %333 = vrot.lane.b32.xlu1 %v316_v36, %s7757_s17  ;;  %331 = vrot.lane.b32.xlu0 %v7880_v37, %s7757_s17 }
  0x50   :  { %337 = vrot.lane.b32.xlu1 %v318_v38, %s7757_s17  ;;  %335 = vrot.lane.b32.xlu0 %v7885_v39, %s7757_s17 }
  0x54   :  { %398 = vrot.lane.b32.xlu1 %v377_v40, %s7757_s17  ;;  %396 = vrot.lane.b32.xlu0 %v7890_v41, %s7757_s17 }
  0x58   :  { %402 = vrot.lane.b32.xlu1 %v379_v42, %s7757_s17  ;;  %400 = vrot.lane.b32.xlu0 %v7895_v43, %s7757_s17 }
  0x9e   :  { %v827_v44 = vpop.permute.xlu1 %826  ;;  %v712_v45 = vpop.permute.xlu0 %711 }
  0x9f   :  { %v828_v48 = vrot.slane %v827_v44, 4  ;;  %v713_v49 = vrot.slane %v712_v45, 4 }
  0xa1   :  { %v837_v50 = vmul.bf16 %v828_v48, %v780_v46  ;;  %v723_v51 = vmul.bf16 %v713_v49, %v665_v47  ;;  %v839_v54 = vmul.bf16 %v828_v48, %v782_v52  ;;  %v725_v55 = vmul.bf16 %v713_v49, %v667_v53  ;;  %v1474_v46 = vld [vmem:[#allocation2 + $0xc] sm:$0xf] }
  0xa2   :  { %v833_v58 = vmul.bf16 %v828_v48, %v776_v56  ;;  %v719_v59 = vmul.bf16 %v713_v49, %v661_v57  ;;  %v138_v60 = vpop.permute.xlu1 %137  ;;  %v835_v1 = vmul.bf16 %v828_v48, %v778_v61  ;;  %v721_v2 = vmul.bf16 %v713_v49, %v663_v62  ;;  %v7931_v32 = vpop.permute.xlu0 %253  ;;  %v1478_v47 = vld [vmem:[#allocation2 + $0x2c] sm:$0xf]  ;;  %v429_v56 = vld [vmem:[#allocation2 + $0x8] sm:$0xf] }
  0xa3   :  { %858 = vrot.lane.b32.xlu1 %v837_v50, %s7756_s16  ;;  %744 = vrot.lane.b32.xlu0 %v723_v51, %s7756_s16  ;;  %v139_v0 = vrot.slane %v138_v60, 4  ;;  %v829_v3 = vsel %vm714_vm0, %v828_v48, %v827_v44  ;;  %v715_v28 = vsel %vm714_vm0, %v713_v49, %v712_v45  ;;  %v433_v57 = vld [vmem:[#allocation2 + $0x28] sm:$0xf] }
  0xa4   :  { %v836_v7 = vmul.bf16 %v829_v3, %v7890_v41  ;;  %v838_v19 = vmul.bf16 %v829_v3, %v7895_v43  ;;  %v832_v22 = vmul.bf16 %v829_v3, %v7913_v20  ;;  %v834_v26 = vmul.bf16 %v829_v3, %v7918_v24 }
  0xa5   :  { %v149_v5 = vmul.bf16 %v139_v0, %v91_v63  ;;  %v151_v12 = vmul.bf16 %v139_v0, %v93_v11  ;;  %v145_v23 = vmul.bf16 %v139_v0, %v87_v21  ;;  %v147_v27 = vmul.bf16 %v139_v0, %v89_v25  ;;  %v552_v21 = vld [vmem:[#allocation2 + $0x78] sm:$0xf] }
  0xa6   :  { %v141_v29 = vsel %vm140_vm1, %v139_v0, %v138_v60  ;;  %v722_v31 = vmul.bf16 %v715_v28, %v7870_v33  ;;  %v724_v36 = vmul.bf16 %v715_v28, %v7875_v35  ;;  %v7935_v38 = vpop.permute.xlu1 %1185  ;;  %v718_v40 = vmul.bf16 %v715_v28, %v7880_v37  ;;  %v1527_v44 = vpop.permute.xlu0 %1526  ;;  %v431_v0 = vld [vmem:[#allocation2 + $0x18] sm:$0xf] }
  0xa7   :  { %862 = vrot.lane.b32.xlu1 %v839_v54, %s7756_s16  ;;  %748 = vrot.lane.b32.xlu0 %v725_v55, %s7756_s16  ;;  %v148_v30 = vmul.bf16 %v7870_v33, %v141_v29  ;;  %v150_v34 = vmul.bf16 %v7875_v35, %v141_v29  ;;  %v144_v42 = vmul.bf16 %v7880_v37, %v141_v29  ;;  %v1528_v48 = vrot.slane %v1527_v44, 4  ;;  %v1476_v54 = vld [vmem:[#allocation2 + $0x1c] sm:$0xf] }
  0xa8   :  { %v720_v49 = vmul.bf16 %v715_v28, %v7885_v39  ;;  %v146_v50 = vmul.bf16 %v7885_v39, %v141_v29  ;;  %v1480_v55 = vld [vmem:[#allocation2 + $0x3c] sm:$0xf] }
  0xa9   :  { %v1533_v51 = vmul.bf16 %v1528_v48, %v1474_v46  ;;  %v1537_v52 = vmul.bf16 %v1528_v48, %v1478_v47  ;;  %v1539_v60 = vmul.bf16 %v1528_v48, %v1480_v55  ;;  %v1529_v11 = vsel %vm186_vm2, %v1528_v48, %v1527_v44 }
  0xaa   :  { %v7943_v45 = vpop.permute.xlu1 %1298  ;;  %v599_v63 = vpop.permute.xlu0 %598  ;;  %v1538_v47 = vmul.bf16 %v1529_v11, %v7828_v9 }
  0xab   :  { %850 = vrot.lane.b32.xlu1 %v833_v58, %s7756_s16  ;;  %736 = vrot.lane.b32.xlu0 %v719_v59, %s7756_s16  ;;  %v1535_v59 = vmul.bf16 %v1528_v48, %v1476_v54  ;;  %v600_v3 = vrot.slane %v599_v63, 4 }
  0xae   :  { %v482_v53 = vpop.permute.xlu1 %481 }
  0xaf   :  { %854 = vrot.lane.b32.xlu1 %v835_v1, %s7756_s16  ;;  %740 = vrot.lane.b32.xlu0 %v721_v2, %s7756_s16  ;;  %v483_v58 = vrot.slane %v482_v53, 4  ;;  %v435_v1 = vld [vmem:[#allocation2 + $0x38] sm:$0xf]  ;;  %v550_v2 = vld [vmem:[#allocation2 + $0x68] sm:$0xf] }
  0xb1   :  { %v489_v61 = vmul.bf16 %v483_v58, %v429_v56  ;;  %v493_v62 = vmul.bf16 %v483_v58, %v433_v57  ;;  %v485_v25 = vsel %vm484_vm3, %v483_v58, %v482_v53  ;;  %v1365_v57 = vld [vmem:[#allocation2 + $0x2c] sm:$0xf] }
  0xb2   :  { %v488_v29 = vmul.bf16 %v485_v25, %v7880_v37  ;;  %v1536_v37 = vmul.bf16 %v1529_v11, %v7826_v8  ;;  %v494_v53 = vmul.bf16 %v485_v25, %v7875_v35 }
  0xb3   :  { %170 = vrot.lane.b32.xlu1 %v149_v5, %s7753_s13  ;;  %856 = vrot.lane.b32.xlu0 %v836_v7, %s7756_s16  ;;  %v491_v5 = vmul.bf16 %v483_v58, %v431_v0  ;;  %v495_v7 = vmul.bf16 %v483_v58, %v435_v1 }
  0xb7   :  { %174 = vrot.lane.b32.xlu1 %v151_v12, %s7753_s13  ;;  %860 = vrot.lane.b32.xlu0 %v838_v19, %s7756_s16  ;;  %v609_v12 = vmul.bf16 %v600_v3, %v550_v2  ;;  %v1532_v19 = vmul.bf16 %v1529_v11, %v7835_v13  ;;  %v255_v2 = vrot.slane %v7931_v32, 4 }
  0xbb   :  { %848 = vrot.lane.b32.xlu0 %v832_v22, %s7756_s16  ;;  %162 = vrot.lane.b32.xlu1 %v145_v23, %s7753_s13  ;;  %v611_v22 = vmul.bf16 %v600_v3, %v552_v21  ;;  %v1534_v23 = vmul.bf16 %v1529_v11, %v7837_v14  ;;  %v256_v11 = vsel %vm140_vm1, %v255_v2, %v7931_v32 }
  0xbf   :  { %852 = vrot.lane.b32.xlu0 %v834_v26, %s7756_s16  ;;  %166 = vrot.lane.b32.xlu1 %v147_v27, %s7753_s13  ;;  %v546_v26 = vld [vmem:[#allocation2 + $0x48] sm:$0xf]  ;;  %v7965_v27 = vpop.permute.xlu0 %957 }
  0xc0   :  { %v605_v28 = vmul.bf16 %v600_v3, %v546_v26  ;;  %v209_v26 = vld [vmem:[#allocation2 + $0x78] sm:$0xf] }
  0xc3   :  { %168 = vrot.lane.b32.xlu0 %v148_v30, %s7753_s13  ;;  %742 = vrot.lane.b32.xlu1 %v722_v31, %s7756_s16  ;;  %v548_v30 = vld [vmem:[#allocation2 + $0x58] sm:$0xf] }
  0xc4   :  { %v607_v31 = vmul.bf16 %v600_v3, %v548_v30  ;;  %v265_v30 = vmul.bf16 %v7895_v43, %v256_v11 }
  0xc7   :  { %172 = vrot.lane.b32.xlu0 %v150_v34, %s7753_s13  ;;  %746 = vrot.lane.b32.xlu1 %v724_v36, %s7756_s16  ;;  %v490_v34 = vmul.bf16 %v485_v25, %v7885_v39  ;;  %v7971_v36 = vpop.permute.xlu0 %1072 }
  0xcb   :  { %734 = vrot.lane.b32.xlu1 %v718_v40, %s7756_s16  ;;  %160 = vrot.lane.b32.xlu0 %v144_v42, %s7753_s13  ;;  %v7973_v40 = vpop.permute.xlu1 %1641  ;;  %v601_v42 = vsel %vm484_vm3, %v600_v3, %v599_v63  ;;  %v7984_v39 = vpop.permute.xlu0 %339  ;;  %v1361_v63 = vld [vmem:[#allocation2 + $0xc] sm:$0xf]  ;;  %v1363_v3 = vld [vmem:[#allocation2 + $0x1c] sm:$0xf] }
  0xcc   :  { %v608_v44 = vmul.bf16 %v601_v42, %v7890_v41  ;;  %v610_v48 = vmul.bf16 %v601_v42, %v7895_v43  ;;  %v606_v54 = vmul.bf16 %v7918_v24, %v601_v42 }
  0xcf   :  { %738 = vrot.lane.b32.xlu1 %v720_v49, %s7756_s16  ;;  %164 = vrot.lane.b32.xlu0 %v146_v50, %s7753_s13  ;;  %v7982_v46 = vpop.permute.xlu1 %341  ;;  %v7992_v50 = vpop.permute.xlu0 %343 }
  0xd3   :  { %1550 = vrot.lane.b32.xlu1 %v1533_v51, %s7752_s12  ;;  %1558 = vrot.lane.b32.xlu0 %v1537_v52, %s7752_s12  ;;  %v7990_v49 = vpop.permute.xlu1 %345  ;;  %v492_v51 = vmul.bf16 %v485_v25, %v7870_v33  ;;  %v604_v52 = vmul.bf16 %v7913_v20, %v601_v42  ;;  %v8002_v56 = vpop.permute.xlu0 %331  ;;  %v1367_v33 = vld [vmem:[#allocation2 + $0x3c] sm:$0xf]  ;;  %v1187_v25 = vrot.slane %v7935_v38, 4 }
  0xd4   :  { %v347_v10 = vrot.slane %v8002_v56, 4 }
  0xd7   :  { %1554 = vrot.lane.b32.xlu1 %v1535_v59, %s7752_s12  ;;  %1562 = vrot.lane.b32.xlu0 %v1539_v60, %s7752_s12  ;;  %v8000_v55 = vpop.permute.xlu1 %333  ;;  %v8011_v35 = vpop.permute.xlu0 %335  ;;  %v373_v59 = vld [vmem:[#allocation2 + $0x48] sm:$0xf] }
  0xd8   :  { %v348_v4 = vrot.slane %v8000_v55, 4 }
  0xdb   :  { %506 = vrot.lane.b32.xlu1 %v489_v61, %s7754_s14  ;;  %514 = vrot.lane.b32.xlu0 %v493_v62, %s7754_s14  ;;  %v8009_v58 = vpop.permute.xlu1 %337  ;;  %v8018_v61 = vpop.permute.xlu0 %396  ;;  %v375_v62 = vld [vmem:[#allocation2 + $0x58] sm:$0xf] }
  0xdf   :  { %510 = vrot.lane.b32.xlu1 %v491_v5, %s7754_s14  ;;  %518 = vrot.lane.b32.xlu0 %v495_v7, %s7754_s14  ;;  %v8016_v60 = vpop.permute.xlu1 %398  ;;  %v8028_v1 = vpop.permute.xlu0 %400 }
  0xe3   :  { %630 = vrot.lane.b32.xlu1 %v609_v12, %s7754_s14  ;;  %1548 = vrot.lane.b32.xlu0 %v1532_v19, %s7752_s12  ;;  %v8026_v0 = vpop.permute.xlu1 %402  ;;  %v207_v12 = vld [vmem:[#allocation2 + $0x68] sm:$0xf] }
  0xe7   :  { %634 = vrot.lane.b32.xlu1 %v611_v22, %s7754_s14  ;;  %1552 = vrot.lane.b32.xlu0 %v1534_v23, %s7752_s12  ;;  %v264_v22 = vmul.bf16 %v255_v2, %v207_v12  ;;  %v263_v23 = vmul.bf16 %v7890_v41, %v256_v11  ;;  %v261_v12 = vmul.bf16 %v7918_v24, %v256_v11 }
  0xeb   :  { %622 = vrot.lane.b32.xlu1 %v605_v28, %s7754_s14  ;;  %504 = vrot.lane.b32.xlu0 %v488_v29, %s7754_s14  ;;  %v266_v29 = vmul.bf16 %v255_v2, %v209_v26 }
  0xef   :  { %626 = vrot.lane.b32.xlu1 %v607_v31, %s7754_s14  ;;  %508 = vrot.lane.b32.xlu0 %v490_v34, %s7754_s14  ;;  %v1188_v31 = vsel %vm529_vm4, %v1187_v25, %v7935_v38  ;;  %v1139_v34 = vld [vmem:[#allocation2 + $0x2c] sm:$0xf] }
  0xf3   :  { %1556 = vrot.lane.b32.xlu1 %v1536_v37, %s7752_s12  ;;  %628 = vrot.lane.b32.xlu0 %v608_v44, %s7754_s14  ;;  %v1196_v37 = vmul.bf16 %v1187_v25, %v1139_v34  ;;  %v1195_v44 = vmul.bf16 %v1188_v31, %v7826_v8  ;;  %v1193_v34 = vmul.bf16 %v1188_v31, %v7837_v14 }
  0xf7   :  { %1560 = vrot.lane.b32.xlu1 %v1538_v47, %s7752_s12  ;;  %632 = vrot.lane.b32.xlu0 %v610_v48, %s7754_s14  ;;  %v1141_v47 = vld [vmem:[#allocation2 + $0x3c] sm:$0xf] }
  0xf8   :  { %v1198_v48 = vmul.bf16 %v1187_v25, %v1141_v47  ;;  %v1422_v47 = vld [vmem:[#allocation2 + $0x6c] sm:$0xf] }
  0xfb   :  { %512 = vrot.lane.b32.xlu1 %v492_v51, %s7754_s14  ;;  %620 = vrot.lane.b32.xlu0 %v604_v52, %s7754_s14  ;;  %v1197_v51 = vmul.bf16 %v1188_v31, %v7828_v9  ;;  %v203_v52 = vld [vmem:[#allocation2 + $0x48] sm:$0xf] }
  0xff   :  { %516 = vrot.lane.b32.xlu1 %v494_v53, %s7754_s14  ;;  %624 = vrot.lane.b32.xlu0 %v606_v54, %s7754_s14 }
 0x103   :  { %1386 = vrot.lane.b32.xlu1 %v1365_v57, %s7758_s18  ;;  %1384 = vrot.lane.b32.xlu0 %v7826_v8, %s7758_s18  ;;  %v260_v57 = vmul.bf16 %v255_v2, %v203_v52  ;;  %v8104_v52 = vrot.slane %v7965_v27, 4 }
 0x107   :  { %1390 = vrot.lane.b32.xlu1 %v1367_v33, %s7758_s18  ;;  %1388 = vrot.lane.b32.xlu0 %v7828_v9, %s7758_s18  ;;  %v259_v33 = vmul.bf16 %v7913_v20, %v256_v11 }
 0x10b   :  { %390 = vrot.lane.b32.xlu1 %v373_v59, %s7757_s17  ;;  %388 = vrot.lane.b32.xlu0 %v7913_v20, %s7757_s17  ;;  %v205_v59 = vld [vmem:[#allocation2 + $0x58] sm:$0xf] }
 0x10f   :  { %394 = vrot.lane.b32.xlu1 %v375_v62, %s7757_s17  ;;  %392 = vrot.lane.b32.xlu0 %v7918_v24, %s7757_s17 }
 0x113   :  { %1378 = vrot.lane.b32.xlu1 %v1361_v63, %s7758_s18  ;;  %1376 = vrot.lane.b32.xlu0 %v7835_v13, %s7758_s18 }
 0x115   :  { %v8034_v5 = vpop.permute.xlu1 %858  ;;  %v8036_v7 = vpop.permute.xlu0 %744 }
 0x117   :  { %1382 = vrot.lane.b32.xlu1 %v1363_v3, %s7758_s18  ;;  %1380 = vrot.lane.b32.xlu0 %v7837_v14, %s7758_s18  ;;  %v262_v3 = vmul.bf16 %v255_v2, %v205_v59 }
 0x119   :  { %v8043_v19 = vpop.permute.xlu1 %862  ;;  %v8045_v21 = vpop.permute.xlu0 %748 }
 0x11b   :  { %285 = vrot.lane.b32.xlu1 %v264_v22, %s7753_s13  ;;  %283 = vrot.lane.b32.xlu0 %v263_v23, %s7753_s13  ;;  %v1135_v22 = vld [vmem:[#allocation2 + $0xc] sm:$0xf] }
 0x11c   :  { %v1192_v26 = vmul.bf16 %v1187_v25, %v1135_v22 }
 0x11d   :  { %v8051_v32 = vpop.permute.xlu1 %850  ;;  %v8053_v28 = vpop.permute.xlu0 %736 }
 0x11f   :  { %289 = vrot.lane.b32.xlu1 %v266_v29, %s7753_s13  ;;  %287 = vrot.lane.b32.xlu0 %v265_v30, %s7753_s13  ;;  %v1191_v29 = vmul.bf16 %v1188_v31, %v7835_v13  ;;  %v1137_v30 = vld [vmem:[#allocation2 + $0x1c] sm:$0xf] }
 0x120   :  { %v1194_v11 = vmul.bf16 %v1187_v25, %v1137_v30 }
 0x121   :  { %v8060_v41 = vpop.permute.xlu1 %854  ;;  %v8062_v42 = vpop.permute.xlu0 %740 }
 0x123   :  { %1217 = vrot.lane.b32.xlu1 %v1196_v37, %s7755_s15  ;;  %1215 = vrot.lane.b32.xlu0 %v1195_v44, %s7755_s15  ;;  %v755_v44 = vrot.slane %v8036_v7, 4  ;;  %v1424_v7 = vld [vmem:[#allocation2 + $0x7c] sm:$0xf] }
 0x125   :  { %v8067_v43 = vpop.permute.xlu1 %170  ;;  %v8069_v38 = vpop.permute.xlu0 %856 }
 0x126   :  { %10846 = vst [vmem:[#allocation15_spill] sm:$0xff] %v8067_v43 }
 0x127   :  { %1221 = vrot.lane.b32.xlu1 %v1198_v48, %s7755_s15  ;;  %1219 = vrot.lane.b32.xlu0 %v1197_v51, %s7755_s15 }
 0x129   :  { %v8074_v53 = vpop.permute.xlu1 %174  ;;  %v8076_v54 = vpop.permute.xlu0 %860 }
 0x12b   :  { %277 = vrot.lane.b32.xlu1 %v260_v57, %s7753_s13  ;;  %275 = vrot.lane.b32.xlu0 %v259_v33, %s7753_s13  ;;  %v757_v57 = vrot.slane %v8045_v21, 4  ;;  %v960_v21 = vsel %vm759_vm6, %v8104_v52, %v7965_v27 }
 0x12c   :  { %v967_v27 = vmul.bf16 %v960_v21, %v7826_v8 }
 0x12d   :  { %v8081_v62 = vpop.permute.xlu0 %848  ;;  %v8083_v63 = vpop.permute.xlu1 %162 }
 0x12e   :  { %10847 = vst [vmem:[#allocation16_spill] sm:$0xff] %v8083_v63  ;;  %v8243_v63 = vld [vmem:[#allocation2 + $0x44] sm:$0xff] }
 0x12f   :  { %281 = vrot.lane.b32.xlu1 %v262_v3, %s7753_s13  ;;  %279 = vrot.lane.b32.xlu0 %v261_v12, %s7753_s13 }
 0x131   :  { %v8088_v23 = vpop.permute.xlu0 %852  ;;  %v8090_v20 = vpop.permute.xlu1 %166 }
 0x132   :  { %10848 = vst [vmem:[#allocation17_spill] sm:$0xff] %v8090_v20 }
 0x133   :  { %1209 = vrot.lane.b32.xlu1 %v1192_v26, %s7755_s15  ;;  %1207 = vrot.lane.b32.xlu0 %v1191_v29, %s7755_s15 }
 0x135   :  { %v8095_v2 = vpop.permute.xlu0 %168  ;;  %v743_v24 = vpop.permute.xlu1 %742 }
 0x136   :  { %10849 = vst [vmem:[#allocation18_spill] sm:$0xff] %v8095_v2  ;;  %v754_v37 = vrot.slane %v743_v24, 4  ;;  %v869_v2 = vrot.slane %v8034_v5, 4 }
 0x137   :  { %1213 = vrot.lane.b32.xlu1 %v1194_v11, %s7755_s15  ;;  %1211 = vrot.lane.b32.xlu0 %v1193_v34, %s7755_s15  ;;  %v909_v11 = vld [vmem:[#allocation2 + $0x2c] sm:$0xf]  ;;  %v751_v34 = vrot.slane %v8053_v28, 4 }
 0x138   :  { %v763_v31 = vsel %vm184_vm5, %v754_v37, %v755_v44  ;;  %v968_v44 = vmul.bf16 %v8104_v52, %v909_v11  ;;  %v1420_v11 = vld [vmem:[#allocation2 + $0x5c] sm:$0xf] }
 0x139   :  { %v8101_v48 = vpop.permute.xlu0 %172  ;;  %v747_v51 = vpop.permute.xlu1 %746  ;;  %v764_v12 = vsel %vm759_vm6, %v743_v24, %v763_v31 }
 0x13a   :  { %v756_v25 = vrot.slane %v747_v51, 4 }
 0x13b   :  { %1443 = vrot.lane.b32.xlu1 %v1422_v47, %s7758_s18  ;;  %1441 = vrot.lane.b32.xlu0 %v7839_v15, %s7758_s18  ;;  %v753_v47 = vrot.slane %v8062_v42, 4  ;;  %v969_v42 = vmul.bf16 %v960_v21, %v7828_v9 }
 0x13c   :  { %v765_v33 = vsel %vm184_vm5, %v756_v25, %v757_v57  ;;  %v911_v25 = vld [vmem:[#allocation2 + $0x3c] sm:$0xf] }
 0x13d   :  { %v735_v59 = vpop.permute.xlu1 %734  ;;  %v8112_v3 = vpop.permute.xlu0 %160  ;;  %v766_v22 = vsel %vm759_vm6, %v747_v51, %v765_v33  ;;  %v970_v8 = vmul.bf16 %v8104_v52, %v911_v25  ;;  %v907_v25 = vld [vmem:[#allocation2 + $0x1c] sm:$0xf] }
 0x13e   :  { %10850 = vst [vmem:[#allocation19_spill] sm:$0xff] %v8112_v3  ;;  %v750_v26 = vrot.slane %v735_v59, 4  ;;  %v7296_v29 = vcombine.high %v764_v12, %v766_v22  ;;  %v7295_v30 = vcombine.low %v764_v12, %v766_v22  ;;  %v349_v3 = vrot.slane %v8011_v35, 4 }
 0x13f   :  { %1447 = vrot.lane.b32.xlu1 %v1424_v7, %s7758_s18  ;;  %1445 = vrot.lane.b32.xlu0 %v7844_v16, %s7758_s18 }
 0x140   :  { %2204 = vmatprep.subr.bf16.mxu0 %v7296_v29  ;;  %v758_v51 = vsel %vm184_vm5, %v750_v26, %v751_v34  ;;  %v1418_v29 = vld [vmem:[#allocation2 + $0x4c] sm:$0xf] }
 0x141   :  { %2205 = vmatpush1.bf16.msra.mxu0 %v7295_v30  ;;  %v739_v24 = vpop.permute.xlu1 %738  ;;  %v8123_v37 = vpop.permute.xlu0 %164  ;;  %v760_v31 = vsel %vm759_vm6, %v735_v59, %v758_v51  ;;  %v963_v51 = vmul.bf16 %v960_v21, %v7835_v13 }
 0x142   :  { %10851 = vst [vmem:[#allocation20_spill] sm:$0xff] %v8123_v37  ;;  %v752_v57 = vrot.slane %v739_v24, 4  ;;  %v8250_v37 = vld [vmem:[%s10810_s2 + $0x4] ss:$12 sps:$4 sm:$0xff]  }
 0x143   :  { %989 = vrot.lane.b32.xlu1 %v968_v44, %s7751_s11  ;;  %987 = vrot.lane.b32.xlu0 %v967_v27, %s7751_s11  ;;  %10853 = vst [vmem:[#allocation22_spill] sm:$0xff] %v8250_v37 }
 0x144   :  { %v761_v28 = vsel %vm184_vm5, %v752_v57, %v753_v47  ;;  %v8163_v57 = vrot.slane %v7943_v45, 4  ;;  %2236 = vmatprep.mubr.bf16.mxu0 %v8250_v37  ;;  %v870_v37 = vrot.slane %v8076_v54, 4 }
 0x145   :  { %v762_v7 = vsel %vm759_vm6, %v739_v24, %v761_v28  ;;  %v8134_v33 = vpop.permute.xlu1 %1550  ;;  %v8136_v12 = vpop.permute.xlu0 %1558  ;;  %v905_v24 = vld [vmem:[#allocation2 + $0xc] sm:$0xf] }
 0x146   :  { %v7292_v22 = vcombine.high %v760_v31, %v762_v7  ;;  %v7291_v26 = vcombine.low %v760_v31, %v762_v7  ;;  %v964_v47 = vmul.bf16 %v8104_v52, %v905_v24  ;;  %v966_v7 = vmul.bf16 %v8104_v52, %v907_v25  ;;  %v1248_v25 = vld [vmem:[#allocation2 + $0x4c] sm:$0xf] }
 0x147   :  { %993 = vrot.lane.b32.xlu1 %v970_v8, %s7751_s11  ;;  %991 = vrot.lane.b32.xlu0 %v969_v42, %s7751_s11  ;;  %v965_v8 = vmul.bf16 %v960_v21, %v7837_v14  ;;  %v8176_v13 = vsel %vm529_vm4, %v8163_v57, %v7943_v45  ;;  %v1252_v42 = vld [vmem:[#allocation2 + $0x6c] sm:$0xf]  ;;  %v8186_v52 = vrot.slane %v7973_v40, 4  ;;  %v354_v14 = vrot.slane %v7990_v49, 4 }
 0x148   :  { %2206 = vmatprep.subr.bf16.mxu0 %v7292_v22  ;;  %v8179_v22 = vrot.slane %v7971_v36, 4  ;;  %v353_v45 = vrot.slane %v7992_v50, 4  ;;  %v1309_v24 = vmul.bf16 %v8163_v57, %v1252_v42  ;;  %v1305_v20 = vmul.bf16 %v8163_v57, %v1248_v25  ;;  %v8264_v25 = vld [vmem:[#allocation2 + $0x6c] sm:$0xf] }
 0x149   :  { %2207 = vmatpush1.bf16.msra.mxu0 %v7291_v26  ;;  %v8142_v59 = vpop.permute.xlu1 %1554  ;;  %v8144_v30 = vpop.permute.xlu0 %1562  ;;  %v352_v26 = vrot.slane %v7982_v46, 4  ;;  %v1308_v46 = vmul.bf16 %v8176_v13, %v7839_v15  ;;  %v8212_v15 = vsel %vm186_vm2, %v8186_v52, %v7973_v40  ;;  %v350_v40 = vrot.slane %v8009_v58, 4  ;;  %10854 = vst [vmem:[#allocation23_spill] sm:$0xff] %v8264_v25 }
 0x14a   :  { %v1304_v55 = vmul.bf16 %v8176_v13, %v7846_v17 }
 0x14b   :  { %1435 = vrot.lane.b32.xlu1 %v1418_v29, %s7758_s18  ;;  %1433 = vrot.lane.b32.xlu0 %v7846_v17, %s7758_s18  ;;  %v351_v29 = vrot.slane %v7984_v39, 4  ;;  %v1306_v17 = vmul.bf16 %v8176_v13, %v7848_v18 }
 0x14d   :  { %v8149_v9 = vpop.permute.xlu1 %506  ;;  %v8151_v34 = vpop.permute.xlu0 %514  ;;  %v360_v49 = vsel %vm184_vm5, %v351_v29, %v352_v26  ;;  %v1310_v26 = vmul.bf16 %v8176_v13, %v7844_v16  ;;  %v8218_v29 = vld [vmem:[#allocation2 + $0x6c] sm:$0xf]  ;;  %v355_v13 = vsel %vm184_vm5, %v347_v10, %v348_v4  ;;  %v8305_v4 = vld [vmem:[#allocation2 + $0x5c] sm:$0xf] }
 0x14e   :  { %v8236_v16 = vsel %vm356_vm7, %v7984_v39, %v360_v49  ;;  %v8262_v49 = vld [vmem:[#allocation2 + $0x54] sm:$0xff]  ;;  %10857 = vst [vmem:[#allocation26_spill] sm:$0xff] %v8305_v4  ;;  %v8309_v10 = vsel %vm356_vm7, %v8002_v56, %v355_v13  ;;  %v1567_v4 = vrot.slane %v8142_v59, 4 }
 0x14f   :  { %1439 = vrot.lane.b32.xlu1 %v1420_v11, %s7758_s18  ;;  %1437 = vrot.lane.b32.xlu0 %v7848_v18, %s7758_s18  ;;  %v8274_v18 = vld [vmem:[#allocation2 + $0x7c] sm:$0xf] }
 0x150   :  { %10855 = vst [vmem:[#allocation24_spill] sm:$0xff] %v8274_v18 }
 0x151   :  { %v8156_v44 = vpop.permute.xlu1 %510  ;;  %v8158_v27 = vpop.permute.xlu0 %518 }
 0x153   :  { %981 = vrot.lane.b32.xlu1 %v964_v47, %s7751_s11  ;;  %979 = vrot.lane.b32.xlu0 %v963_v51, %s7751_s11  ;;  %v1254_v47 = vld [vmem:[#allocation2 + $0x7c] sm:$0xf]  ;;  %v8200_v51 = vsel %vm759_vm6, %v8179_v22, %v7971_v36  ;;  %v362_v36 = vsel %vm184_vm5, %v353_v45, %v354_v14 }
 0x154   :  { %v1311_v42 = vmul.bf16 %v8163_v57, %v1254_v47  ;;  %v8232_v47 = vld [vmem:[#allocation2 + $0x4c] sm:$0xf]  ;;  %v8254_v39 = vsel %vm356_vm7, %v7992_v50, %v362_v36  ;;  %v408_v50 = vrot.slane %v8018_v61, 4  ;;  %v868_v36 = vrot.slane %v8069_v38, 4 }
 0x155   :  { %v8167_v28 = vpop.permute.xlu1 %630  ;;  %v8169_v31 = vpop.permute.xlu0 %1548 }
 0x156   :  { %v876_v5 = vsel %vm184_vm5, %v868_v36, %v869_v2  ;;  %v866_v36 = vrot.slane %v8088_v23, 4 }
 0x157   :  { %985 = vrot.lane.b32.xlu1 %v966_v7, %s7751_s11  ;;  %983 = vrot.lane.b32.xlu0 %v965_v8, %s7751_s11  ;;  %v8205_v7 = vld [vmem:[#allocation2 + $0x5c] sm:$0xf]  ;;  %v8207_v8 = vld [vmem:[#allocation2 + $0x64] sm:$0xff] }
 0x158   :  { %10852 = vst [vmem:[#allocation21_spill] sm:$0xff] %v8207_v8  ;;  %v1307_v58 = vmul.bf16 %v8163_v57, %v8205_v7  ;;  %v1082_v7 = vmul.bf16 %v8200_v51, %v8207_v8  ;;  %v1564_v8 = vrot.slane %v8169_v31, 4 }
 0x159   :  { %v8190_v21 = vpop.permute.xlu1 %634  ;;  %v8192_v11 = vpop.permute.xlu0 %1552 }
 0x15b   :  { %1330 = vrot.lane.b32.xlu1 %v1309_v24, %s7755_s15  ;;  %1328 = vrot.lane.b32.xlu0 %v1308_v46, %s7755_s15  ;;  %v8220_v24 = vld [vmem:[#allocation2 + $0x7c] sm:$0xf]  ;;  %v8222_v46 = vld [vmem:[#allocation2 + $0x74] sm:$0xff] }
 0x15d   :  { %v8228_v14 = vpop.permute.xlu1 %622  ;;  %v8230_v45 = vpop.permute.xlu0 %504 }
 0x15f   :  { %1334 = vrot.lane.b32.xlu1 %v1311_v42, %s7755_s15  ;;  %1332 = vrot.lane.b32.xlu0 %v1310_v26, %s7755_s15  ;;  %v358_v26 = vsel %vm184_vm5, %v349_v3, %v350_v40  ;;  %v8295_v3 = vld [vmem:[#allocation2 + $0x4c] sm:$0xf]  ;;  %v409_v40 = vrot.slane %v8016_v60, 4 }
 0x160   :  { %10856 = vst [vmem:[#allocation25_spill] sm:$0xff] %v8295_v3  ;;  %v8313_v60 = vsel %vm356_vm7, %v8011_v35, %v358_v26  ;;  %v1566_v35 = vrot.slane %v8192_v11, 4 }
 0x161   :  { %v8279_v57 = vpop.permute.xlu1 %626  ;;  %v8281_v43 = vpop.permute.xlu0 %508  ;;  %v416_v25 = vsel %vm184_vm5, %v408_v50, %v409_v40  ;;  %v7276_v13 = vcombine.high %v8309_v10, %v8313_v60  ;;  %v871_v50 = vrot.slane %v8043_v19, 4  ;;  %v1565_v40 = vrot.slane %v8134_v33, 4 }
 0x162   :  { %v8354_v19 = vsel %vm356_vm7, %v8018_v61, %v416_v25  ;;  %v867_v61 = vrot.slane %v8060_v41, 4 }
 0x163   :  { %1322 = vrot.lane.b32.xlu1 %v1305_v20, %s7755_s15  ;;  %1320 = vrot.lane.b32.xlu0 %v1304_v55, %s7755_s15  ;;  %v411_v20 = vrot.slane %v8026_v0, 4  ;;  %v410_v55 = vrot.slane %v8028_v1, 4  ;;  %v1569_v0 = vrot.slane %v8136_v12, 4  ;;  %v1574_v12 = vsel %vm184_vm5, %v1566_v35, %v1567_v4 }
 0x164   :  { %v878_v33 = vsel %vm184_vm5, %v870_v37, %v871_v50  ;;  %v865_v4 = vrot.slane %v8051_v32, 4  ;;  %v1572_v25 = vsel %vm184_vm5, %v1564_v8, %v1565_v40  ;;  %v8373_v37 = vsel %vm759_vm6, %v8069_v38, %v876_v5 }
 0x165   :  { %v1557_v42 = vpop.permute.xlu1 %1556  ;;  %v8318_v18 = vpop.permute.xlu0 %628  ;;  %v418_v56 = vsel %vm184_vm5, %v410_v55, %v411_v20  ;;  %v1571_v20 = vrot.slane %v8144_v30, 4  ;;  %v10858_v30 = vmul.bf16 %v8179_v22, %v8218_v29  ;;  %v8383_v41 = vsel %vm759_vm6, %v8076_v54, %v878_v33 }
 0x166   :  { %v1568_v26 = vrot.slane %v1557_v42, 4  ;;  %v8358_v2 = vsel %vm356_vm7, %v8028_v1, %v418_v56  ;;  %v1575_v56 = vsel %vm140_vm1, %v8192_v11, %v1574_v12  ;;  %v522_v8 = vrot.slane %v8281_v43, 4 }
 0x167   :  { %1326 = vrot.lane.b32.xlu1 %v1307_v58, %s7755_s15  ;;  %1324 = vrot.lane.b32.xlu0 %v1306_v17, %s7755_s15  ;;  %v7275_v17 = vcombine.low %v8309_v10, %v8313_v60  ;;  %v864_v38 = vrot.slane %v8081_v62, 4  ;;  %v874_v50 = vsel %vm184_vm5, %v866_v36, %v867_v61  ;;  %v1573_v11 = vsel %vm140_vm1, %v8169_v31, %v1572_v25  ;;  %v10886_v10 = vld [vmem:[#allocation26_spill] sm:$0xff] }
 0x168   :  { %v1576_v59 = vsel %vm184_vm5, %v1568_v26, %v1569_v0  ;;  %v10860_v54 = vmul.bf16 %v8200_v51, %v8222_v46  ;;  %v525_v40 = vrot.slane %v8151_v34, 4  ;;  %v7332_v12 = vcombine.high %v1573_v11, %v1575_v56 }
 0x169   :  { %v1561_v58 = vpop.permute.xlu1 %1560  ;;  %v8345_v3 = vpop.permute.xlu0 %632  ;;  %v7297_v31 = vcombine.low %v8373_v37, %v8383_v41  ;;  %v7298_v34 = vcombine.high %v8373_v37, %v8383_v41  ;;  %v872_v25 = vsel %vm184_vm5, %v864_v38, %v865_v4  ;;  %v7331_v37 = vcombine.low %v1573_v11, %v1575_v56 }
 0x16a   :  { %v1570_v55 = vrot.slane %v1561_v58, 4  ;;  %v642_v36 = vrot.slane %v8345_v3, 4  ;;  %v873_v38 = vsel %vm759_vm6, %v8081_v62, %v872_v25  ;;  %v10863_v62 = vmul.bf16 %v8179_v22, %v8245_v6  ;;  %v10868_v25 = vld [vmem:[#allocation21_spill] sm:$0xff] }
 0x16b   :  { %1104 = vrot.lane.b32.xlu1 %v10858_v30, %s7751_s11  ;;  %1102 = vrot.lane.b32.xlu0 %v1082_v7, %s7751_s11  ;;  %v1577_v7 = vsel %vm140_vm1, %v1557_v42, %v1576_v59  ;;  %v10859_v42 = vmul.bf16 %v8179_v22, %v8220_v24  ;;  %v521_v24 = vrot.slane %v8149_v9, 4  ;;  %v8415_v9 = vsel %vm759_vm6, %v8088_v23, %v874_v50 }
 0x16c   :  { %v1578_v1 = vsel %vm184_vm5, %v1570_v55, %v1571_v20  ;;  %v520_v20 = vrot.slane %v8230_v45, 4  ;;  %v527_v55 = vrot.slane %v8158_v27, 4  ;;  %v10861_v27 = vmul.bf16 %v8179_v22, %v8232_v47  ;;  %v8432_v47 = vld [vmem:[%s10810_s2 + $0x8] ss:$12 sps:$4 sm:$0xff]  }
 0x16d   :  { %v513_v35 = vpop.permute.xlu1 %512  ;;  %v8377_v29 = vpop.permute.xlu0 %620  ;;  %v1579_v32 = vsel %vm140_vm1, %v1561_v58, %v1578_v1  ;;  %v523_v58 = vrot.slane %v8156_v44, 4  ;;  %v10862_v1 = vmul.bf16 %v8200_v51, %v8243_v63  ;;  %v641_v50 = vrot.slane %v8167_v28, 4 }
 0x16e   :  { %v524_v26 = vrot.slane %v513_v35, 4  ;;  %v7336_v0 = vcombine.high %v1577_v7, %v1579_v32  ;;  %v7335_v5 = vcombine.low %v1577_v7, %v1579_v32  ;;  %v643_v7 = vrot.slane %v8190_v21, 4 }
 0x16f   :  { %1108 = vrot.lane.b32.xlu1 %v10859_v42, %s7751_s11  ;;  %1106 = vrot.lane.b32.xlu0 %v10860_v54, %s7751_s11  ;;  %v531_v44 = vsel %vm184_vm5, %v522_v8, %v523_v58  ;;  %v528_v4 = vsel %vm184_vm5, %v520_v20, %v521_v24  ;;  %v640_v32 = vrot.slane %v8318_v18, 4  ;;  %v639_v54 = vrot.slane %v8279_v57, 4 }
 0x170   :  { %2269 = vmatprep.subr.bf16.mxu1 %v7336_v0  ;;  %v533_v30 = vsel %vm184_vm5, %v524_v26, %v525_v40  ;;  %v532_v41 = vsel %vm529_vm4, %v8281_v43, %v531_v44  ;;  %v650_v11 = vsel %vm184_vm5, %v642_v36, %v643_v7  ;;  %v530_v42 = vsel %vm529_vm4, %v8230_v45, %v528_v4 }
 0x171   :  { %v517_v59 = vpop.permute.xlu1 %516  ;;  %2270 = vmatpush1.bf16.msra.mxu1 %v7335_v5  ;;  %v8405_v33 = vpop.permute.xlu0 %624  ;;  %v534_v8 = vsel %vm529_vm4, %v513_v35, %v533_v30  ;;  %v7371_v35 = vld.sshfl [vmem:[%s10809_s1] sm:$0x11 pattern:$0x75316420]  ;;  %v636_v5 = vrot.slane %v8377_v29, 4  ;;  %v10864_v28 = vmul.bf16 %v8200_v51, %v8262_v49  ;;  %v182_v58 = vrot.slane %v8101_v48, 4 }
 0x172   :  { %v526_v61 = vrot.slane %v517_v59, 4  ;;  %2271 = vmatprep.subr.bf16.mxu1 %v7332_v12  ;;  %v638_v21 = vrot.slane %v8405_v33, 4  ;;  %v648_v20 = vsel %vm184_vm5, %v640_v32, %v641_v50  ;;  %v7284_v45 = vcombine.high %v530_v42, %v532_v41  ;;  %v8499_v32 = vld [vmem:[%s10810_s2 + $0x20] ss:$12 sps:$4 sm:$0xff]  }
 0x173   :  { %1096 = vrot.lane.b32.xlu1 %v10861_v27, %s7751_s11  ;;  %1094 = vrot.lane.b32.xlu0 %v10862_v1, %s7751_s11  ;;  %v7294_v57 = vcombine.high %v873_v38, %v8415_v9  ;;  %v637_v6 = vrot.slane %v8228_v14, 4  ;;  %v651_v22 = vsel %vm529_vm4, %v8345_v3, %v650_v11  ;;  %v7293_v44 = vcombine.low %v873_v38, %v8415_v9  ;;  %v10865_v14 = vld [vmem:[#allocation18_spill] sm:$0xff]  ;;  %v10870_v27 = vld [vmem:[#allocation15_spill] sm:$0xff]  ;;  %v10873_v38 = vld [vmem:[#allocation13_spill] sm:$0xff] }
 0x174   :  { %v535_v23 = vsel %vm184_vm5, %v526_v61, %v527_v55  ;;  %v646_v51 = vsel %vm184_vm5, %v638_v21, %v639_v54  ;;  %v3883_v55 = vcombine.high %v7371_v35, %v7371_v35  ;;  %v180_v36 = vrot.slane %v10865_v14, 4  ;;  %v10874_v11 = vld [vmem:[#allocation16_spill] sm:$0xff] }
 0x175   :  { %v536_v56 = vsel %vm529_vm4, %v517_v59, %v535_v23  ;;  %v8439_v26 = vpop.permute.xlu1 %1386  ;;  %2272 = vmatpush1.bf16.msra.mxu1 %v7331_v37  ;;  %v8441_v0 = vpop.permute.xlu0 %1384  ;;  %v7281_v59 = vcombine.low %v8354_v19, %v8358_v2  ;;  %v649_v3 = vsel %vm529_vm4, %v8318_v18, %v648_v20  ;;  %v644_v30 = vsel %vm184_vm5, %v636_v5, %v637_v6  ;;  %v10872_v23 = vld [vmem:[#allocation20_spill] sm:$0xff] }
 0x176   :  { %2310 = vmatprep.subr.bf16.mxu1 %v7298_v34  ;;  %v7288_v43 = vcombine.high %v534_v8, %v536_v56  ;;  %v7287_v40 = vcombine.low %v534_v8, %v536_v56  ;;  %v183_v34 = vrot.slane %v8074_v53, 4  ;;  %v10869_v53 = vmul.bf16 %v8212_v15, %v10868_v25 }
 0x177   :  { %1100 = vrot.lane.b32.xlu1 %v10863_v62, %s7751_s11  ;;  %1098 = vrot.lane.b32.xlu0 %v10864_v28, %s7751_s11  ;;  %v7283_v9 = vcombine.low %v530_v42, %v532_v41  ;;  %v181_v1 = vrot.slane %v10870_v27, 4  ;;  %v647_v18 = vsel %vm529_vm4, %v8405_v33, %v646_v51  ;;  %v7290_v7 = vcombine.high %v649_v3, %v651_v22  ;;  %v10875_v42 = vld [vmem:[#allocation17_spill] sm:$0xff] }
 0x178   :  { %2208 = vmatprep.subr.bf16.mxu0 %v7288_v43  ;;  %7339 = vmatmul.mubr.msk.bf16.vlgmr.msra.gmra.mxu1 %vm2197_vm8, %v8432_v47  ;;  %v192_v37 = vsel %vm184_vm5, %v182_v58, %v183_v34  ;;  %v10871_v4 = vmov 0   ;;  %v178_v8 = vrot.slane %v10872_v23, 4  ;;  %v7282_v21 = vcombine.high %v8354_v19, %v8358_v2 }
 0x179   :  { %v8471_v12 = vpop.permute.xlu1 %1390  ;;  %2209 = vmatpush1.bf16.msra.mxu0 %v7287_v40  ;;  %2311 = vmatpush1.bf16.msra.mxu1 %v7297_v31  ;;  %v8473_v24 = vpop.permute.xlu0 %1388  ;;  %v10866_v31 = vld [vmem:[#allocation23_spill] sm:$0xff]  ;;  %v8505_v50 = vrot.slane %v7371_v35, %v10873_v38  ;;  %v8508_v33 = vrot.slane %v3883_v55, %v10873_v38  ;;  %v177_v43 = vrot.slane %v10874_v11, 4  ;;  %v179_v54 = vrot.slane %v10875_v42, 4 }
 0x17a   :  { %2210 = vmatprep.subr.bf16.mxu0 %v7284_v45  ;;  %2312 = vmatprep.subr.bf16.mxu1 %v7294_v57  ;;  %v10867_v61 = vmul.bf16 %v8186_v52, %v10866_v31  ;;  %v190_v5 = vsel %vm184_vm5, %v180_v36, %v181_v1  ;;  %v645_v62 = vsel %vm529_vm4, %v8377_v29, %v644_v30  ;;  %v10877_v40 = vld [vmem:[#allocation19_spill] sm:$0xff]  ;;  %v10878_v45 = vld [vmem:[#allocation24_spill] sm:$0xff]  ;;  %v1399_v51 = vrot.slane %v8471_v12, 4 }
 0x17b   :  { %1671 = vrot.lane.b32.xlu0 %v10869_v53, %s7752_s12  ;;  %2299 = vmatprep.mubr.bf16.mxu1 %v10871_v4  ;;  %v10876_v28 = vcombine.high %v8236_v16, %v8254_v39  ;;  %v193_v35 = vsel %vm186_vm2, %v8101_v48, %v192_v37  ;;  %v176_v58 = vrot.slane %v10877_v40, 4  ;;  %v7289_v20 = vcombine.low %v649_v3, %v651_v22 }
 0x17c   :  { %1673 = vrot.lane.b32.xlu1 %v10867_v61, %s7752_s12  ;;  %v10879_v57 = vmul.bf16 %v8186_v52, %v10878_v45  ;;  %v10880_v29 = vmul.bf16 %v8212_v15, %v8222_v46  ;;  %v7286_v6 = vcombine.high %v645_v62, %v647_v18  ;;  %v1398_v55 = vrot.slane %v8473_v24, 4 }
 0x17d   :  { %v391_v56 = vpop.permute.xlu1 %390  ;;  %2211 = vmatpush1.bf16.msra.mxu0 %v7283_v9  ;;  %2313 = vmatpush1.bf16.msra.mxu1 %v7293_v44  ;;  %v389_v41 = vpop.permute.xlu0 %388  ;;  %v191_v22 = vsel %vm186_vm2, %v10865_v14, %v190_v5  ;;  %v188_v44 = vsel %vm184_vm5, %v178_v8, %v179_v54  ;;  %v10881_v46 = vcombine.low %v8236_v16, %v8254_v39  ;;  %v3899_v12 = vshrl.u32 %v8505_v50, 16  ;;  %v10882_v14 = vld [vmem:[#allocation25_spill] sm:$0xff] }
 0x17e   :  { %2212 = vmatprep.subr.bf16.mxu0 %v10876_v28  ;;  %2314 = vmatprep.subr.bf16.mxu1 %v7290_v7  ;;  %v405_v34 = vrot.slane %v391_v56, 4  ;;  %v404_v48 = vrot.slane %v389_v41, 4  ;;  %v3907_v30 = vshrl.u32 %v8508_v33, 16  ;;  %v1397_v31 = vrot.slane %v8439_v26, 4  ;;  %v10885_v7 = vld [vmem:[#allocation22_spill] sm:$0xff] }
 0x17f   :  { %1675 = vrot.lane.b32.xlu0 %v10880_v29, %s7752_s12  ;;  %v1396_v61 = vrot.slane %v8441_v0, 4  ;;  %v185_v16 = vsel %vm184_vm5, %v176_v58, %v177_v43  ;;  %v7285_v39 = vcombine.low %v645_v62, %v647_v18  ;;  %v10883_v9 = vmul.bf16 %v8186_v52, %v10882_v14 }
 0x180   :  { %1677 = vrot.lane.b32.xlu1 %v10879_v57, %s7752_s12  ;;  %7340 = vmatmul.mubr.msk.bf16.gmra.mxu1 %vm2197_vm8, %v8499_v32  ;;  %v10884_v26 = vmul.bf16 %v8212_v15, %v8243_v63  ;;  %v7272_v27 = vcombine.high %v191_v22, %v193_v35  ;;  %v189_v1 = vsel %vm186_vm2, %v10872_v23, %v188_v44 }
 0x181   :  { %v395_v36 = vpop.permute.xlu1 %394  ;;  %2213 = vmatpush1.bf16.msra.mxu0 %v10881_v46  ;;  %2315 = vmatpush1.bf16.msra.mxu1 %v7289_v20  ;;  %v393_v3 = vpop.permute.xlu0 %392  ;;  %v412_v37 = vsel %vm184_vm5, %v404_v48, %v405_v34  ;;  %v3900_v11 = vpack.i.b16 %v3899_v12, %v3899_v12  ;;  %v3908_v43 = vpack.i.b16 %v3907_v30, %v3907_v30  ;;  %v1784_v48 = vld [vmem:[%s10811_s3 + $0x8] sm:$0xff] }
 0x182   :  { %v407_v25 = vrot.slane %v395_v36, 4  ;;  %v406_v53 = vrot.slane %v393_v3, 4  ;;  %2214 = vmatprep.subr.bf16.mxu0 %v7276_v13  ;;  %2316 = vmatprep.subr.bf16.mxu1 %v7286_v6  ;;  %v1407_v13 = vsel %vm184_vm5, %v1398_v55, %v1399_v51  ;;  %v187_v23 = vsel %vm186_vm2, %v10877_v40, %v185_v16 }
 0x183   :  { %1663 = vrot.lane.b32.xlu0 %v10884_v26, %s7752_s12  ;;  %2342 = vmatprep.mubr.bf16.mxu1 %v10885_v7  ;;  %v1405_v42 = vsel %vm184_vm5, %v1396_v61, %v1397_v31  ;;  %v7271_v54 = vcombine.low %v191_v22, %v193_v35  ;;  %v1408_v5 = vsel %vm1401_vm9, %v8473_v24, %v1407_v13  ;;  %v1785_v24 = vld [vmem:[%s10811_s3 + $0x10] sm:$0xff]  ;;  %v1783_v22 = vld [vmem:[%s10811_s3] sm:$0xff] }
 0x184   :  { %1665 = vrot.lane.b32.xlu1 %v10883_v9, %s7752_s12  ;;  %v414_v18 = vsel %vm184_vm5, %v406_v53, %v407_v25  ;;  %v413_v62 = vsel %vm356_vm7, %v389_v41, %v412_v37  ;;  %v10887_v60 = vmul.bf16 %v8186_v52, %v10886_v10  ;;  %v7268_v28 = vcombine.high %v187_v23, %v189_v1  ;;  %v1786_v41 = vld [vmem:[%s10811_s3 + $0x18] sm:$0xff] }
 0x185   :  { %v415_v8 = vsel %vm356_vm7, %v393_v3, %v414_v18  ;;  %v1379_v56 = vpop.permute.xlu1 %1378  ;;  %2215 = vmatpush1.bf16.msra.mxu0 %v7275_v17  ;;  %2317 = vmatpush1.bf16.msra.mxu1 %v7285_v39  ;;  %v1377_v63 = vpop.permute.xlu0 %1376  ;;  %v10888_v17 = vmul.bf16 %v8212_v15, %v8262_v49  ;;  %v7267_v35 = vcombine.low %v187_v23, %v189_v1  ;;  %v10889_v49 = vld [vmem:[#allocation14_spill] sm:$0xff] }
 0x186   :  { %2216 = vmatprep.subr.bf16.mxu0 %v7272_v27  ;;  %2318 = vmatprep.subr.bf16.mxu1 %v7282_v21  ;;  %v1393_v40 = vrot.slane %v1379_v56, 4  ;;  %v1392_v58 = vrot.slane %v1377_v63, 4  ;;  %v7278_v21 = vcombine.high %v413_v62, %v415_v8  ;;  %v1406_v52 = vsel %vm1401_vm9, %v8441_v0, %v1405_v42 }
 0x187   :  { %1667 = vrot.lane.b32.xlu0 %v10888_v17, %s7752_s12  ;;  %v3905_v45 = vrot.slane %v3900_v11, %v10889_v49  ;;  %v3913_v57 = vrot.slane %v3908_v43, %v10889_v49  ;;  %v7328_v51 = vcombine.high %v1406_v52, %v1408_v5  ;;  %v3202_v55 = vpack.i.b16 %v8505_v50, %v8505_v50 }
 0x188   :  { %1669 = vrot.lane.b32.xlu1 %v10887_v60, %s7752_s12  ;;  %v7277_v0 = vcombine.low %v413_v62, %v415_v8  ;;  %v7327_v34 = vcombine.low %v1406_v52, %v1408_v5  ;;  %v3209_v19 = vpack.i.b16 %v8508_v33, %v8508_v33  ;;  %v1400_v2 = vsel %vm184_vm5, %v1392_v58, %v1393_v40 }
 0x189   :  { %v1383_v20 = vpop.permute.xlu1 %1382  ;;  %2217 = vmatpush1.bf16.msra.mxu0 %v7271_v54  ;;  %2319 = vmatpush1.bf16.msra.mxu1 %v7281_v59  ;;  %v1381_v15 = vpop.permute.xlu0 %1380  ;;  %v8605_v3 = vcombine.low %v3905_v45, %v3913_v57  ;;  %v3207_v12 = vrot.slane %v3202_v55, %v10889_v49  ;;  %v1402_v30 = vsel %vm1401_vm9, %v1377_v63, %v1400_v2 }
 0x18a   :  { %v1395_v29 = vrot.slane %v1383_v20, 4  ;;  %v1394_v6 = vrot.slane %v1381_v15, 4  ;;  %2218 = vmatprep.subr.bf16.mxu0 %v7268_v28  ;;  %2320 = vmatprep.subr.bf16.mxu1 %v7278_v21  ;;  %v3214_v31 = vrot.slane %v3209_v19, %v10889_v49 }
 0x18b   :  { %1799 = vperm.xlu0 %7617, %v1785_v24  }
 0x18c   :  { %1804 = vperm.xlu1 %7618, %v1786_v41   ;;  %v1403_v59 = vsel %vm184_vm5, %v1394_v6, %v1395_v29  ;;  %v7360_v9 = vcombine.low %v3207_v12, %v3214_v31 }
 0x18d   :  { %v1404_v50 = vsel %vm1401_vm9, %v1381_v15, %v1403_v59  ;;  %v286_v44 = vpop.permute.xlu1 %285  ;;  %2219 = vmatpush1.bf16.msra.mxu0 %v7267_v35  ;;  %2321 = vmatpush1.bf16.msra.mxu1 %v7277_v0  ;;  %v284_v36 = vpop.permute.xlu0 %283 }
 0x18e   :  { %v296_v46 = vrot.slane %v286_v44, 4  ;;  %v295_v33 = vrot.slane %v284_v36, 4  ;;  %2220 = vmatprep.subr.bf16.mxu0 %v7328_v51  ;;  %v7324_v61 = vcombine.high %v1402_v30, %v1404_v50  ;;  %v7323_v26 = vcombine.low %v1402_v30, %v1404_v50 }
 0x18f   :  { %1794 = vperm.xlu0 %7617, %v1784_v48  }
 0x190   :  { %1789 = vperm.xlu1 %7618, %v1783_v22   ;;  %v303_v16 = vsel %vm184_vm5, %v295_v33, %v296_v46 }
 0x191   :  { %v290_v25 = vpop.permute.xlu1 %289  ;;  %2221 = vmatpush2.bf16.msra.mxu0 %v7327_v34  ;;  %v288_v53 = vpop.permute.xlu0 %287  ;;  %v304_v1 = vsel %vm186_vm2, %v284_v36, %v303_v16 }
 0x192   :  { %v298_v39 = vrot.slane %v290_v25, 4  ;;  %v297_v14 = vrot.slane %v288_v53, 4  ;;  %2222 = vmatprep.subr.bf16.mxu0 %v7324_v61 }
 0x193   :  { %3919 = vrot.lane.b32.xlu0 %v8605_v3, %s7753_s13 }
 0x194   :  { %v305_v27 = vsel %vm184_vm5, %v297_v14, %v298_v39  ;;  %3107 = vrot.lane.b32.xlu1 %v7360_v9, %s7751_s11 }
 0x195   :  { %v306_v13 = vsel %vm186_vm2, %v288_v53, %v305_v27  ;;  %v1218_v37 = vpop.permute.xlu1 %1217  ;;  %2223 = vmatpush2.bf16.msra.mxu0 %v7323_v26  ;;  %v1216_v18 = vpop.permute.xlu0 %1215 }
 0x196   :  { %v7273_v7 = vcombine.low %v304_v1, %v306_v13  ;;  %v1228_v8 = vrot.slane %v1218_v37, 4  ;;  %v1227_v56 = vrot.slane %v1216_v18, 4  ;;  %v7274_v63 = vcombine.high %v304_v1, %v306_v13 }
 0x197   :  { %3220 = vrot.lane.b32.xlu0 %v7360_v9, %s7751_s11 }
 0x198   :  { %2322 = vmatprep.subr.bf16.mxu1 %v7274_v63  ;;  %2879 = vrot.lane.b32.xlu1 %v8605_v3, %s7755_s15  ;;  %v1235_v23 = vsel %vm184_vm5, %v1227_v56, %v1228_v8 }
 0x199   :  { %v1222_v11 = vpop.permute.xlu1 %1221  ;;  %2323 = vmatpush1.bf16.msra.mxu1 %v7273_v7  ;;  %v1220_v43 = vpop.permute.xlu0 %1219  ;;  %v1236_v62 = vsel %vm484_vm3, %v1216_v18, %v1235_v23 }
 0x19a   :  { %v1230_v42 = vrot.slane %v1222_v11, 4  ;;  %v1229_v54 = vrot.slane %v1220_v43, 4 }
 0x19b   :  { %2539 = vrot.lane.b32.xlu0 %v7360_v9, %s7752_s12 }
 0x19c   :  { %v1237_v5 = vsel %vm184_vm5, %v1229_v54, %v1230_v42  ;;  %2994 = vrot.lane.b32.xlu1 %v8605_v3, %s7755_s15 }
 0x19d   :  { %v1238_v10 = vsel %vm484_vm3, %v1220_v43, %v1237_v5  ;;  %v278_v60 = vpop.permute.xlu1 %277  ;;  %v276_v17 = vpop.permute.xlu0 %275 }
 0x19e   :  { %v292_v28 = vrot.slane %v278_v60, 4  ;;  %v291_v40 = vrot.slane %v276_v17, 4  ;;  %v7320_v58 = vcombine.high %v1236_v62, %v1238_v10  ;;  %v7319_v21 = vcombine.low %v1236_v62, %v1238_v10 }
 0x19f   :  { %3579 = vrot.lane.b32.xlu0 %v7360_v9, %s7754_s14 }
 0x1a0   :  { %2224 = vmatprep.subr.bf16.mxu0 %v7320_v58  ;;  %2652 = vrot.lane.b32.xlu1 %v7360_v9, %s7752_s12  ;;  %v299_v41 = vsel %vm184_vm5, %v291_v40, %v292_v28 }
 0x1a1   :  { %v282_v35 = vpop.permute.xlu1 %281  ;;  %2225 = vmatpush2.bf16.msra.mxu0 %v7319_v21  ;;  %v280_v24 = vpop.permute.xlu0 %279  ;;  %v300_v45 = vsel %vm186_vm2, %v276_v17, %v299_v41 }
 0x1a2   :  { %v294_v52 = vrot.slane %v282_v35, 4  ;;  %v293_v20 = vrot.slane %v280_v24, 4 }
 0x1a3   :  { %3692 = vrot.lane.b32.xlu0 %v7360_v9, %s7754_s14 }
 0x1a4   :  { %v301_v15 = vsel %vm184_vm5, %v293_v20, %v294_v52  ;;  %3351 = vrot.lane.b32.xlu1 %v8605_v3, %s7756_s16 }
 0x1a5   :  { %v302_v57 = vsel %vm186_vm2, %v280_v24, %v301_v15  ;;  %v1210_v29 = vpop.permute.xlu1 %1209  ;;  %v1208_v6 = vpop.permute.xlu0 %1207 }
 0x1a6   :  { %v7269_v51 = vcombine.low %v300_v45, %v302_v57  ;;  %v1224_v55 = vrot.slane %v1210_v29, 4  ;;  %v1223_v0 = vrot.slane %v1208_v6, 4  ;;  %v7270_v34 = vcombine.high %v300_v45, %v302_v57 }
 0x1a7   :  { %4034 = vrot.lane.b32.xlu0 %v8605_v3, %s7753_s13 }
 0x1a8   :  { %2324 = vmatprep.subr.bf16.mxu1 %v7270_v34  ;;  %3466 = vrot.lane.b32.xlu1 %v8605_v3, %s7756_s16  ;;  %v1231_v59 = vsel %vm184_vm5, %v1223_v0, %v1224_v55 }
 0x1a9   :  { %v1214_v19 = vpop.permute.xlu1 %1213  ;;  %2325 = vmatpush1.bf16.msra.mxu1 %v7269_v51  ;;  %v1212_v2 = vpop.permute.xlu0 %1211  ;;  %v1232_v44 = vsel %vm484_vm3, %v1208_v6, %v1231_v59 }
 0x1aa   :  { %v1226_v48 = vrot.slane %v1214_v19, 4  ;;  %v1225_v22 = vrot.slane %v1212_v2, 4 }
 0x1ac   :  { %v1233_v50 = vsel %vm184_vm5, %v1225_v22, %v1226_v48 }
 0x1ad   :  { %v1234_v36 = vsel %vm484_vm3, %v1212_v2, %v1233_v50  ;;  %v1444_v46 = vpop.permute.xlu1 %1443  ;;  %v1442_v33 = vpop.permute.xlu0 %1441 }
 0x1ae   :  { %v1454_v12 = vrot.slane %v1444_v46, 4  ;;  %v1453_v30 = vrot.slane %v1442_v33, 4  ;;  %v7316_v31 = vcombine.high %v1232_v44, %v1234_v36  ;;  %v7315_v61 = vcombine.low %v1232_v44, %v1234_v36 }
 0x1b0   :  { %2226 = vmatprep.subr.bf16.mxu0 %v7316_v31  ;;  %v1461_v53 = vsel %vm184_vm5, %v1453_v30, %v1454_v12  ;;  %v7620_v30 = vld [vmem:[#allocation2 + $0x28] ss:$16 sps:$4 sm:$0xff]  }
 0x1b1   :  { %v1448_v3 = vpop.permute.xlu1 %1447  ;;  %2227 = vmatpush2.bf16.msra.mxu0 %v7315_v61  ;;  %v1446_v25 = vpop.permute.xlu0 %1445  ;;  %v1462_v9 = vsel %vm1401_vm9, %v1442_v33, %v1461_v53 }
 0x1b2   :  { %v1456_v16 = vrot.slane %v1448_v3, 4  ;;  %v1455_v39 = vrot.slane %v1446_v25, 4  ;;  %v7622_v3 = vld [vmem:[#allocation2 + $0x24] ss:$16 sps:$4 sm:$0xff]  }
 0x1b4   :  { %v1463_v14 = vsel %vm184_vm5, %v1455_v39, %v1456_v16  ;;  %v7623_v39 = vld [vmem:[#allocation2 + $0x8] ss:$16 sps:$4 sm:$0xff]  }
 0x1b5   :  { %v1464_v26 = vsel %vm1401_vm9, %v1446_v25, %v1463_v14  ;;  %v990_v27 = vpop.permute.xlu1 %989  ;;  %v988_v1 = vpop.permute.xlu0 %987 }
 0x1b6   :  { %v7329_v13 = vcombine.low %v1462_v9, %v1464_v26  ;;  %v1000_v37 = vrot.slane %v990_v27, 4  ;;  %v999_v18 = vrot.slane %v988_v1, 4  ;;  %v7330_v7 = vcombine.high %v1462_v9, %v1464_v26 }
 0x1b8   :  { %2326 = vmatprep.subr.bf16.mxu1 %v7330_v7  ;;  %v1007_v63 = vsel %vm184_vm5, %v999_v18, %v1000_v37 }
 0x1b9   :  { %v994_v8 = vpop.permute.xlu1 %993  ;;  %2327 = vmatpush2.bf16.msra.mxu1 %v7329_v13  ;;  %v992_v56 = vpop.permute.xlu0 %991  ;;  %v1008_v42 = vsel %vm714_vm0, %v988_v1, %v1007_v63  ;;  %v7625_v13 = vld [vmem:[#allocation2 + $0x4] ss:$16 sps:$4 sm:$0xff]  }
 0x1ba   :  { %v1002_v11 = vrot.slane %v994_v8, 4  ;;  %v1001_v43 = vrot.slane %v992_v56, 4 }
 0x1bc   :  { %v1009_v23 = vsel %vm184_vm5, %v1001_v43, %v1002_v11  ;;  %v8672_v43 = vld [vmem:[%s10810_s2 + $0x1c] ss:$12 sps:$4 sm:$0xff]  }
 0x1bd   :  { %v1010_v54 = vsel %vm714_vm0, %v992_v56, %v1009_v23  ;;  %v1436_v5 = vpop.permute.xlu1 %1435  ;;  %v1434_v62 = vpop.permute.xlu0 %1433  ;;  %v8667_v56 = vld [vmem:[%s10810_s2] ss:$12 sps:$4 sm:$0xff]  }
 0x1be   :  { %v1450_v10 = vrot.slane %v1436_v5, 4  ;;  %v1449_v60 = vrot.slane %v1434_v62, 4  ;;  %v7312_v17 = vcombine.high %v1008_v42, %v1010_v54  ;;  %v7311_v28 = vcombine.low %v1008_v42, %v1010_v54 }
 0x1c0   :  { %2228 = vmatprep.subr.bf16.mxu0 %v7312_v17  ;;  %v1457_v21 = vsel %vm184_vm5, %v1449_v60, %v1450_v10 }
 0x1c1   :  { %v1440_v40 = vpop.permute.xlu1 %1439  ;;  %2229 = vmatpush2.bf16.msra.mxu0 %v7311_v28  ;;  %v1438_v58 = vpop.permute.xlu0 %1437  ;;  %v1458_v52 = vsel %vm1401_vm9, %v1434_v62, %v1457_v21 }
 0x1c2   :  { %v1452_v35 = vrot.slane %v1440_v40, 4  ;;  %v1451_v24 = vrot.slane %v1438_v58, 4 }
 0x1c4   :  { %v1459_v41 = vsel %vm184_vm5, %v1451_v24, %v1452_v35  ;;  %v8683_v35 = vld [vmem:[%s10810_s2 + $0x18] ss:$12 sps:$4 sm:$0xff]  }
 0x1c5   :  { %v1460_v20 = vsel %vm1401_vm9, %v1438_v58, %v1459_v41  ;;  %v982_v15 = vpop.permute.xlu1 %981  ;;  %v980_v45 = vpop.permute.xlu0 %979 }
 0x1c6   :  { %v7325_v57 = vcombine.low %v1458_v52, %v1460_v20  ;;  %v996_v29 = vrot.slane %v982_v15, 4  ;;  %v995_v6 = vrot.slane %v980_v45, 4  ;;  %v7326_v51 = vcombine.high %v1458_v52, %v1460_v20 }
 0x1c8   :  { %2328 = vmatprep.subr.bf16.mxu1 %v7326_v51  ;;  %v1003_v34 = vsel %vm184_vm5, %v995_v6, %v996_v29 }
 0x1c9   :  { %v986_v55 = vpop.permute.xlu1 %985  ;;  %2329 = vmatpush2.bf16.msra.mxu1 %v7325_v57  ;;  %v984_v0 = vpop.permute.xlu0 %983  ;;  %v1004_v48 = vsel %vm714_vm0, %v980_v45, %v1003_v34 }
 0x1ca   :  { %v998_v19 = vrot.slane %v986_v55, 4  ;;  %v997_v2 = vrot.slane %v984_v0, 4 }
 0x1cc   :  { %v1005_v59 = vsel %vm184_vm5, %v997_v2, %v998_v19 }
 0x1cd   :  { %v1006_v22 = vsel %vm714_vm0, %v984_v0, %v1005_v59  ;;  %v1331_v50 = vpop.permute.xlu1 %1330  ;;  %v1329_v44 = vpop.permute.xlu0 %1328 }
 0x1ce   :  { %v1341_v36 = vrot.slane %v1331_v50, 4  ;;  %v1340_v46 = vrot.slane %v1329_v44, 4  ;;  %v7308_v33 = vcombine.high %v1004_v48, %v1006_v22  ;;  %v7307_v12 = vcombine.low %v1004_v48, %v1006_v22 }
 0x1d0   :  { %2230 = vmatprep.subr.bf16.mxu0 %v7308_v33  ;;  %v1348_v25 = vsel %vm184_vm5, %v1340_v46, %v1341_v36 }
 0x1d1   :  { %v1335_v31 = vpop.permute.xlu1 %1334  ;;  %2231 = vmatpush2.bf16.msra.mxu0 %v7307_v12  ;;  %v1333_v61 = vpop.permute.xlu0 %1332  ;;  %v1349_v9 = vsel %vm484_vm3, %v1329_v44, %v1348_v25 }
 0x1d2   :  { %v1343_v53 = vrot.slane %v1335_v31, 4  ;;  %v1342_v16 = vrot.slane %v1333_v61, 4  ;;  %2232 = vmatprep.subr.bf16.mxu0 %v7620_v30  ;;  %v7671_v30 = vld [vmem:[#allocation2 + $0x64] sm:$0xff]  ;;  %v7672_v31 = vld [vmem:[#allocation2 + $0x74] sm:$0xff] }
 0x1d4   :  { %v1350_v14 = vsel %vm184_vm5, %v1342_v16, %v1343_v53 }
 0x1d5   :  { %v1351_v26 = vsel %vm484_vm3, %v1333_v61, %v1350_v14  ;;  %v1323_v27 = vpop.permute.xlu1 %1322  ;;  %2233 = vmatpush2.bf16.msra.mxu0 %v7622_v3  ;;  %v1321_v1 = vpop.permute.xlu0 %1320  ;;  %v7306_v61 = vcombine.high %v7671_v30, %v7672_v31 }
 0x1d6   :  { %v7321_v37 = vcombine.low %v1349_v9, %v1351_v26  ;;  %v1337_v18 = vrot.slane %v1323_v27, 4  ;;  %v1336_v7 = vrot.slane %v1321_v1, 4  ;;  %2234 = vmatprep.subr.bf16.mxu0 %v7623_v39  ;;  %v7322_v8 = vcombine.high %v1349_v9, %v1351_v26 }
 0x1d7   :  { %v7305_v9 = vcombine.low %v7671_v30, %v7672_v31  ;;  %v3873_v30 = vld [vmem:[#allocation2 + $0x3c] sm:$0xf] }
 0x1d8   :  { %2330 = vmatprep.subr.bf16.mxu1 %v7322_v8  ;;  %v1344_v23 = vsel %vm184_vm5, %v1336_v7, %v1337_v18 }
 0x1d9   :  { %v1327_v63 = vpop.permute.xlu1 %1326  ;;  %2235 = vmatpush2.bf16.msra.mxu0 %v7625_v13  ;;  %2331 = vmatpush2.bf16.msra.mxu1 %v7321_v37  ;;  %v1325_v11 = vpop.permute.xlu0 %1324  ;;  %v1345_v62 = vsel %vm484_vm3, %v1321_v1, %v1344_v23  ;;  %v7673_v13 = vld [vmem:[#allocation2 + $0x44] sm:$0xff]  ;;  %v7674_v37 = vld [vmem:[#allocation2 + $0x54] sm:$0xff] }
 0x1da   :  { %v1339_v42 = vrot.slane %v1327_v63, 4  ;;  %v1338_v54 = vrot.slane %v1325_v11, 4  ;;  %v7302_v18 = vcombine.high %v7673_v13, %v7674_v37 }
 0x1dc   :  { %v1346_v5 = vsel %vm184_vm5, %v1338_v54, %v1339_v42  ;;  %2237 = vmatmul.mubr.bf16.vlgmr.msra.gmra.mxu0 %v8667_v56  ;;  %v7301_v42 = vcombine.low %v7673_v13, %v7674_v37  ;;  %v3303_v13 = vld [vmem:[#allocation2 + $0x2c] sm:$0xf] }
 0x1dd   :  { %v1347_v10 = vsel %vm484_vm3, %v1325_v11, %v1346_v5  ;;  %v1105_v60 = vpop.permute.xlu1 %1104  ;;  %v1103_v17 = vpop.permute.xlu0 %1102  ;;  %2246 = vmatprep.mubr.bf16.mxu0 %v8672_v43 }
 0x1de   :  { %v7317_v28 = vcombine.low %v1345_v62, %v1347_v10  ;;  %v1115_v40 = vrot.slane %v1105_v60, 4  ;;  %v1114_v58 = vrot.slane %v1103_v17, 4  ;;  %v7318_v21 = vcombine.high %v1345_v62, %v1347_v10 }
 0x1e0   :  { %2332 = vmatprep.subr.bf16.mxu1 %v7318_v21  ;;  %v1122_v52 = vsel %vm184_vm5, %v1114_v58, %v1115_v40 }
 0x1e1   :  { %v1109_v24 = vpop.permute.xlu1 %1108  ;;  %2333 = vmatpush2.bf16.msra.mxu1 %v7317_v28  ;;  %v1107_v41 = vpop.permute.xlu0 %1106  ;;  %v1123_v57 = vsel %vm714_vm0, %v1103_v17, %v1122_v52 }
 0x1e2   :  { %v1117_v20 = vrot.slane %v1109_v24, 4  ;;  %v1116_v15 = vrot.slane %v1107_v41, 4 }
 0x1e4   :  { %v1124_v45 = vsel %vm184_vm5, %v1116_v15, %v1117_v20  ;;  %2247 = vmatmul.mubr.bf16.gmra.mxu0 %v8683_v35 }
 0x1e5   :  { %v1125_v29 = vsel %vm714_vm0, %v1107_v41, %v1124_v45  ;;  %v1097_v6 = vpop.permute.xlu1 %1096  ;;  %v1095_v51 = vpop.permute.xlu0 %1094  ;;  %2395 = vmatprep.mubr.bf16.mxu0 %v10871_v4  ;;  %v3867_v45 = vld [vmem:[#allocation2 + $0xc] sm:$0xf] }
 0x1e6   :  { %v7313_v55 = vcombine.low %v1123_v57, %v1125_v29  ;;  %v1111_v0 = vrot.slane %v1097_v6, 4  ;;  %v1110_v34 = vrot.slane %v1095_v51, 4  ;;  %v7314_v19 = vcombine.high %v1123_v57, %v1125_v29 }
 0x1e8   :  { %2334 = vmatprep.subr.bf16.mxu1 %v7314_v19  ;;  %v1118_v48 = vsel %vm184_vm5, %v1110_v34, %v1111_v0  ;;  %v3761_v34 = vld [vmem:[#allocation2 + $0x3c] sm:$0xf]  ;;  %v3755_v19 = vld [vmem:[#allocation2 + $0xc] sm:$0xf] }
 0x1e9   :  { %v1101_v2 = vpop.permute.xlu1 %1100  ;;  %2335 = vmatpush2.bf16.msra.mxu1 %v7313_v55  ;;  %v1099_v59 = vpop.permute.xlu0 %1098  ;;  %v1119_v36 = vsel %vm714_vm0, %v1095_v51, %v1118_v48 }
 0x1ea   :  { %v1113_v22 = vrot.slane %v1101_v2, 4  ;;  %v1112_v50 = vrot.slane %v1099_v59, 4 }
 0x1ec   :  { %v1120_v44 = vsel %vm184_vm5, %v1112_v50, %v1113_v22  ;;  %v3757_v22 = vld [vmem:[#allocation2 + $0x1c] sm:$0xf]  ;;  %v3533_v50 = vld [vmem:[#allocation2 + $0x2c] sm:$0xf] }
 0x1ed   :  { %v1121_v46 = vsel %vm714_vm0, %v1099_v59, %v1120_v44  ;;  %v1672_v12 = vpop.permute.xlu0 %1671 }
 0x1ee   :  { %v1674_v33 = vpop.permute.xlu1 %1673  ;;  %v7309_v3 = vcombine.low %v1119_v36, %v1121_v46  ;;  %v1683_v53 = vrot.slane %v1672_v12, 4  ;;  %v7310_v16 = vcombine.high %v1119_v36, %v1121_v46  ;;  %v3871_v36 = vld [vmem:[#allocation2 + $0x2c] sm:$0xf] }
 0x1ef   :  { %v1684_v25 = vrot.slane %v1674_v33, 4 }
 0x1f0   :  { %2336 = vmatprep.subr.bf16.mxu1 %v7310_v16  ;;  %v3531_v16 = vld [vmem:[#allocation2 + $0x1c] sm:$0xf] }
 0x1f1   :  { %2337 = vmatpush2.bf16.msra.mxu1 %v7309_v3  ;;  %v1676_v14 = vpop.permute.xlu0 %1675  ;;  %v1691_v26 = vsel %vm184_vm5, %v1683_v53, %v1684_v25  ;;  %v3529_v3 = vld [vmem:[#allocation2 + $0xc] sm:$0xf] }
 0x1f2   :  { %v1678_v39 = vpop.permute.xlu1 %1677  ;;  %v1685_v1 = vrot.slane %v1676_v14, 4  ;;  %2338 = vmatprep.subr.bf16.mxu1 %v7306_v61  ;;  %v1692_v8 = vsel %vm140_vm1, %v1672_v12, %v1691_v26  ;;  %v3535_v12 = vld [vmem:[#allocation2 + $0x3c] sm:$0xf] }
 0x1f3   :  { %v1686_v27 = vrot.slane %v1678_v39, 4 }
 0x1f5   :  { %v1693_v7 = vsel %vm184_vm5, %v1685_v1, %v1686_v27  ;;  %2339 = vmatpush2.bf16.msra.mxu1 %v7305_v9  ;;  %v1664_v23 = vpop.permute.xlu0 %1663  ;;  %v3815_v9 = vld [vmem:[#allocation2 + $0x6c] sm:$0xf]  ;;  %v3817_v1 = vld [vmem:[#allocation2 + $0x7c] sm:$0xf] }
 0x1f6   :  { %v1694_v63 = vsel %vm140_vm1, %v1676_v14, %v1693_v7  ;;  %v1666_v11 = vpop.permute.xlu1 %1665  ;;  %v1679_v62 = vrot.slane %v1664_v23, 4  ;;  %2340 = vmatprep.subr.bf16.mxu1 %v7302_v18  ;;  %v3305_v18 = vld [vmem:[#allocation2 + $0x3c] sm:$0xf] }
 0x1f7   :  { %v7337_v54 = vcombine.low %v1692_v8, %v1694_v63  ;;  %v1680_v5 = vrot.slane %v1666_v11, 4  ;;  %v7338_v10 = vcombine.high %v1692_v8, %v1694_v63  ;;  %v3811_v8 = vld [vmem:[#allocation2 + $0x4c] sm:$0xf]  ;;  %v3813_v63 = vld [vmem:[#allocation2 + $0x5c] sm:$0xf] }
 0x1f9   :  { %2375 = vmatprep.subr.bf16.mxu0 %v7338_v10  ;;  %2341 = vmatpush2.bf16.msra.mxu1 %v7301_v42  ;;  %v1668_v17 = vpop.permute.xlu0 %1667  ;;  %v1687_v28 = vsel %vm184_vm5, %v1679_v62, %v1680_v5 }
 0x1fa   :  { %v1670_v60 = vpop.permute.xlu1 %1669  ;;  %2376 = vmatpush1.bf16.msra.mxu0 %v7337_v54  ;;  %v1681_v58 = vrot.slane %v1668_v17, 4  ;;  %v1688_v24 = vsel %vm140_vm1, %v1664_v23, %v1687_v28 }
 0x1fb   :  { %v1682_v40 = vrot.slane %v1670_v60, 4 }
 0x1fc   :  { %2343 = vmatmul.mubr.bf16.vlgmr.msra.gmra.mxu1 %v8667_v56 }
 0x1fd   :  { %v1689_v21 = vsel %vm184_vm5, %v1681_v58, %v1682_v40  ;;  %2352 = vmatprep.mubr.bf16.mxu1 %v8672_v43 }
 0x1fe   :  { %v1690_v41 = vsel %vm140_vm1, %v1668_v17, %v1689_v21 }
 0x1ff   :  { %v7333_v52 = vcombine.low %v1688_v24, %v1690_v41  ;;  %v7334_v20 = vcombine.high %v1688_v24, %v1690_v41 }
 0x201   :  { %2377 = vmatprep.subr.bf16.mxu0 %v7334_v20 }
 0x202   :  { %2378 = vmatpush1.bf16.msra.mxu0 %v7333_v52 }
 0x204   :  { %2353 = vmatmul.mubr.bf16.gmra.mxu1 %v8683_v35  ;;  %v3869_v35 = vld [vmem:[#allocation2 + $0x1c] sm:$0xf] }
 0x205   :  { %7341 = vmatmul.mubr.msk.bf16.vlgmr.msra.gmra.mxu0 %vm2197_vm8, %v8432_v47 }
 0x206   :  { %2405 = vmatprep.mubr.bf16.mxu0 %v10871_v4  ;;  %v8709_v15 = vpop.permute.xlu0 %1799 }
 0x207   :  { %v8726_v51 = vpop.permute.xlu1 %1804 }
 0x20a   :  { %v8711_v56 = vpop.permute.xlu0 %1794 }
 0x20b   :  { %v8731_v0 = vpop.permute.xlu1 %1789 }
 0x20d   :  { %7342 = vmatmul.mubr.msk.bf16.gmra.mxu0 %vm2197_vm8, %v8499_v32  ;;  %v3759_v32 = vld [vmem:[#allocation2 + $0x2c] sm:$0xf] }
 0x20e   :  { %4683 = vmatprep.mubr.bf16.mxu0 %v10871_v4  ;;  %v8716_v43 = vpop.permute.xlu0 %3919 }
 0x20f   :  { %v8719_v57 = vrot.slane %v8716_v43, 4  ;;  %v8737_v59 = vpop.permute.xlu1 %3107 }
 0x211   :  { %v3926_v47 = vmul.bf16 %v8719_v57, %v3867_v45  ;;  %v3928_v29 = vmul.bf16 %v8719_v57, %v3869_v35  ;;  %v3930_v33 = vmul.bf16 %v8719_v57, %v3871_v36  ;;  %v3932_v61 = vmul.bf16 %v8719_v57, %v3873_v30 }
 0x212   :  { %v8724_v6 = vpop.permute.xlu0 %3220 }
 0x213   :  { %3943 = vrot.lane.b32.xlu0 %v3926_v47, %s7752_s12  ;;  %v8743_v44 = vpop.permute.xlu1 %2879  ;;  %3951 = vrot.lane.b32.xlu1 %v3930_v33, %s7752_s12 }
 0x216   :  { %v8729_v55 = vpop.permute.xlu0 %2539 }
 0x217   :  { %3947 = vrot.lane.b32.xlu0 %v3928_v29, %s7752_s12  ;;  %v8752_v25 = vpop.permute.xlu1 %2994  ;;  %3955 = vrot.lane.b32.xlu1 %v3932_v61, %s7752_s12 }
 0x21a   :  { %v8735_v2 = vpop.permute.xlu0 %3579 }
 0x21b   :  { %3780 = vrot.lane.b32.xlu0 %v3759_v32, %s7758_s18  ;;  %v8741_v48 = vrot.slane %v8735_v2, 4  ;;  %v8757_v39 = vpop.permute.xlu1 %2652 }
 0x21d   :  { %v3590_v46 = vmul.bf16 %v8741_v48, %v3533_v50  ;;  %v3592_v31 = vmul.bf16 %v8741_v48, %v3535_v12  ;;  %v3586_v53 = vmul.bf16 %v8741_v48, %v3529_v3  ;;  %v3588_v14 = vmul.bf16 %v8741_v48, %v3531_v16 }
 0x21e   :  { %v8785_v3 = vrot.slane %v8737_v59, 4 }
 0x21f   :  { %3784 = vrot.lane.b32.xlu0 %v3761_v34, %s7758_s18  ;;  %v3352_v26 = vpop.permute.xlu1 %3351 }
 0x220   :  { %v8763_v27 = vrot.slane %v3352_v26, 4 }
 0x222   :  { %v3362_v37 = vmul.bf16 %v8763_v27, %v3303_v13  ;;  %v3364_v7 = vmul.bf16 %v8763_v27, %v3305_v18 }
 0x223   :  { %3772 = vrot.lane.b32.xlu0 %v3755_v19, %s7758_s18 }
 0x227   :  { %3776 = vrot.lane.b32.xlu0 %v3757_v22, %s7758_s18 }
 0x22b   :  { %3611 = vrot.lane.b32.xlu0 %v3590_v46, %s7755_s15 }
 0x22f   :  { %3615 = vrot.lane.b32.xlu0 %v3592_v31, %s7755_s15 }
 0x233   :  { %3603 = vrot.lane.b32.xlu0 %v3586_v53, %s7755_s15 }
 0x237   :  { %3607 = vrot.lane.b32.xlu0 %v3588_v14, %s7755_s15 }
 0x238   :  { %v2291_v11 = vpop.f32.mrf.mxu1 }
 0x23a   :  { %v2293_v23 = vpop.f32.mrf.mxu1 }
 0x23b   :  { %3836 = vrot.lane.b32.xlu0 %v3815_v9, %s7758_s18 }
 0x23c   :  { %v2295_v42 = vpop.f32.mrf.mxu1 }
 0x23e   :  { %v2297_v5 = vpop.f32.mrf.mxu1 }
 0x23f   :  { %3840 = vrot.lane.b32.xlu0 %v3817_v1, %s7758_s18 }
 0x240   :  { %v2301_v60 = vpop.f32.mrf.mxu1 }
 0x242   :  { %v2303_v41 = vpop.f32.mrf.mxu1 }
 0x243   :  { %3383 = vrot.lane.b32.xlu0 %v3362_v37, %s7751_s11 }
 0x244   :  { %v2305_v22 = vpop.f32.mrf.mxu1 }
 0x246   :  { %v2307_v16 = vpop.f32.mrf.mxu1 }
 0x247   :  { %3387 = vrot.lane.b32.xlu0 %v3364_v7, %s7751_s11  ;;  %v8794_v7 = vsel %vm714_vm0, %v8785_v3, %v8737_v59  ;;  %v8809_v59 = vrot.slane %v8743_v44, 4 }
 0x24b   :  { %3828 = vrot.lane.b32.xlu0 %v3811_v8, %s7758_s18  ;;  %v8798_v8 = vsel %vm759_vm6, %v8763_v27, %v3352_v26 }
 0x24f   :  { %3832 = vrot.lane.b32.xlu0 %v3813_v63, %s7758_s18 }
 0x29c   :  { %v2238_v54 = vpop.f32.mrf.mxu0 }
 0x29d   :  { %v2239_v62 = vadd.f32 %v2238_v54, %v8731_v0  ;;  %v8806_v54 = vsel %vm529_vm4, %v8741_v48, %v8735_v2  ;;  %v8823_v2 = vrot.slane %v8729_v55, 4 }
 0x29e   :  { %v2240_v10 = vpop.f32.mrf.mxu0 }
 0x29f   :  { %v2292_v17 = vadd.f32 %v2291_v11, %v2239_v62  ;;  %v2241_v28 = vadd.f32 %v2240_v10, %v8731_v0 }
 0x2a0   :  { %v2242_v40 = vpop.f32.mrf.mxu0 }
 0x2a1   :  { %v2294_v58 = vadd.f32 %v2293_v23, %v2241_v28  ;;  %v2243_v21 = vadd.f32 %v2242_v40, %v8711_v56  ;;  %v2416_v52 = vmax.f32 %v2292_v17, 0.0 }
 0x2a2   :  { %v2244_v24 = vpop.f32.mrf.mxu0 }
 0x2a3   :  { %v2417_v20 = vmax.f32 %v2294_v58, 0.0  ;;  %v2296_v45 = vadd.f32 %v2295_v42, %v2243_v21  ;;  %v2245_v35 = vadd.f32 %v2244_v24, %v8711_v56  ;;  %v8832_v58 = vsel %vm186_vm2, %v8719_v57, %v8716_v43 }
 0x2a4   :  { %v2248_v47 = vpop.f32.mrf.mxu0 }
 0x2a5   :  { %v8776_v29 = vpack.c.bf16 %v2417_v20, %v2416_v52  ;;  %v2298_v32 = vadd.f32 %v2297_v5, %v2245_v35  ;;  %v2249_v34 = vadd.f32 %v2248_v47, %v8709_v15  ;;  %v2420_v50 = vmax.f32 %v2296_v45, 0.0 }
 0x2a6   :  { %v2250_v19 = vpop.f32.mrf.mxu0  ;;  %v8842_v52 = vsel %vm484_vm3, %v8809_v59, %v8743_v44  ;;  %v8852_v45 = vsel %vm140_vm1, %v8823_v2, %v8729_v55 }
 0x2a7   :  { %2460 = vst [vmem:[#allocation2 + $0x4] sm:$0xff] %v8776_v29  ;;  %v2421_v36 = vmax.f32 %v2298_v32, 0.0  ;;  %v2251_v46 = vadd.f32 %v2250_v19, %v8709_v15  ;;  %v2302_v33 = vadd.f32 %v2301_v60, %v2249_v34  ;;  %v3925_v21 = vmul.bf16 %v8776_v29, %v8832_v58 }
 0x2a8   :  { %v2252_v12 = vpop.f32.mrf.mxu0 }
 0x2a9   :  { %v8781_v30 = vpack.c.bf16 %v2421_v36, %v2420_v50  ;;  %v2253_v31 = vadd.f32 %v2252_v12, %v8726_v51  ;;  %v2304_v61 = vadd.f32 %v2303_v41, %v2251_v46  ;;  %v2424_v14 = vmax.f32 %v2302_v33, 0.0  ;;  %v8837_v41 = vpop.permute.xlu0 %3692 }
 0x2aa   :  { %v2254_v53 = vpop.f32.mrf.mxu0 }
 0x2ab   :  { %2461 = vst [vmem:[#allocation2 + $0x14] sm:$0xff] %v8781_v30  ;;  %v2425_v9 = vmax.f32 %v2304_v61, 0.0  ;;  %v2255_v1 = vadd.f32 %v2254_v53, %v8726_v51  ;;  %v2306_v13 = vadd.f32 %v2305_v22, %v2253_v31  ;;  %v3585_v53 = vmul.bf16 %v8776_v29, %v8806_v54 }
 0x2ad   :  { %v8789_v37 = vpack.c.bf16 %v2425_v9, %v2424_v14  ;;  %v2308_v18 = vadd.f32 %v2307_v16, %v2255_v1  ;;  %v2428_v23 = vmax.f32 %v2306_v13, 0.0  ;;  %v8847_v57 = vpop.permute.xlu0 %4034 }
 0x2ae   :  { %v2714_v63 = vld [vmem:[#allocation2] sm:$0xff]  ;;  %v2715_v11 = vld [vmem:[#allocation2 + $0x8] sm:$0xf] }
 0x2af   :  { %2462 = vst [vmem:[#allocation2 + $0x24] sm:$0xff] %v8789_v37  ;;  %v2429_v42 = vmax.f32 %v2308_v18, 0.0  ;;  %2730 = vrot.lane.b32.xlu1 %v2714_v63, %s7757_s17  ;;  %2732 = vrot.lane.b32.xlu0 %v2715_v11, %s7757_s17  ;;  %v3113_v5 = vmul.bf16 %v8794_v7, %v2714_v63  ;;  %v3589_v62 = vmul.bf16 %v8789_v37, %v8806_v54  ;;  %v3057_v60 = vld [vmem:[#allocation2 + $0x8] sm:$0xf] }
 0x2b0   :  { %v3361_v10 = vmul.bf16 %v8789_v37, %v8798_v8  ;;  %v2827_v17 = vld [vmem:[#allocation2 + $0x8] sm:$0xf]  ;;  %v3114_v48 = vmul.bf16 %v8785_v3, %v3057_v60  ;;  %v2885_v43 = vmul.bf16 %v8842_v52, %v2714_v63  ;;  %v2545_v34 = vmul.bf16 %v2714_v63, %v8852_v45 }
 0x2b1   :  { %v8811_v26 = vpack.c.bf16 %v2429_v42, %v2428_v23  ;;  %v2886_v28 = vmul.bf16 %v8809_v59, %v2827_v17  ;;  %v2489_v40 = vld [vmem:[#allocation2 + $0x8] sm:$0xf]  ;;  %v8861_v22 = vpop.permute.xlu0 %3943 }
 0x2b2   :  { %v2546_v24 = vmul.bf16 %v8823_v2, %v2489_v40  ;;  %v2717_v47 = vld [vmem:[#allocation2 + $0x18] sm:$0xf]  ;;  %v8854_v32 = vld [vmem:[#allocation2 + $0x10] sm:$0xff] }
 0x2b3   :  { %2463 = vst [vmem:[#allocation2 + $0x34] sm:$0xff] %v8811_v26  ;;  %3770 = vrot.lane.b32.xlu1 %v8776_v29, %s7758_s18  ;;  %3129 = vrot.lane.b32.xlu0 %v3113_v5, %s7756_s16  ;;  %v3115_v19 = vmul.bf16 %v8794_v7, %v8854_v32  ;;  %v2829_v36 = vld [vmem:[#allocation2 + $0x18] sm:$0xf] }
 0x2b4   :  { %v2888_v61 = vmul.bf16 %v8809_v59, %v2829_v36  ;;  %v2491_v16 = vld [vmem:[#allocation2 + $0x18] sm:$0xf] }
 0x2b5   :  { %v8873_v18 = vpop.permute.xlu0 %3947 }
 0x2b7   :  { %3131 = vrot.lane.b32.xlu1 %v3114_v48, %s7756_s16  ;;  %2903 = vrot.lane.b32.xlu0 %v2886_v28, %s7754_s14 }
 0x2bb   :  { %3941 = vrot.lane.b32.xlu1 %v3925_v21, %s7752_s12  ;;  %2563 = vrot.lane.b32.xlu0 %v2546_v24, %s7753_s13 }
 0x2bc   :  { %v2344_v20 = vpop.f32.mrf.mxu1 }
 0x2bd   :  { %v2345_v55 = vadd.f32 %v2344_v20, %v8731_v0 }
 0x2be   :  { %v2346_v35 = vpop.f32.mrf.mxu1 }
 0x2bf   :  { %2901 = vrot.lane.b32.xlu1 %v2885_v43, %s7754_s14  ;;  %2736 = vrot.lane.b32.xlu0 %v2717_v47, %s7757_s17  ;;  %v2347_v12 = vadd.f32 %v2346_v35, %v8731_v0  ;;  %v2548_v0 = vmul.bf16 %v8823_v2, %v2491_v16  ;;  %v8885_v43 = vld [vmem:[#allocation2 + $0x20] sm:$0xff]  ;;  %v3059_v35 = vld [vmem:[#allocation2 + $0x18] sm:$0xf]  ;;  %v8887_v47 = vpop.permute.xlu0 %3780 }
 0x2c0   :  { %v2348_v44 = vpop.f32.mrf.mxu1  ;;  %10890 = vst [vmem:[#allocation18_spill] sm:$0xff] %v8887_v47 }
 0x2c1   :  { %v2349_v1 = vadd.f32 %v2348_v44, %v8711_v56 }
 0x2c2   :  { %v2350_v50 = vpop.f32.mrf.mxu1 }
 0x2c3   :  { %2561 = vrot.lane.b32.xlu1 %v2545_v34, %s7753_s13  ;;  %3133 = vrot.lane.b32.xlu0 %v3115_v19, %s7756_s16  ;;  %v2351_v11 = vadd.f32 %v2350_v50, %v8711_v56  ;;  %v2719_v19 = vld [vmem:[#allocation2 + $0x28] sm:$0xf] }
 0x2c4   :  { %v2354_v46 = vpop.f32.mrf.mxu1 }
 0x2c5   :  { %v2397_v33 = vpop.f32.mrf.mxu0  ;;  %v2355_v17 = vadd.f32 %v2354_v46, %v8709_v15  ;;  %v3117_v46 = vmul.bf16 %v8794_v7, %v8885_v43 }
 0x2c6   :  { %v2398_v31 = vadd.f32 %v2397_v33, %v2345_v55  ;;  %v2356_v14 = vpop.f32.mrf.mxu1  ;;  %v3116_v33 = vmul.bf16 %v8785_v3, %v3059_v35 }
 0x2c7   :  { %v2399_v9 = vpop.f32.mrf.mxu0  ;;  %2907 = vrot.lane.b32.xlu0 %v2888_v61, %s7754_s14  ;;  %3601 = vrot.lane.b32.xlu1 %v3585_v53, %s7755_s15  ;;  %v2357_v21 = vadd.f32 %v2356_v14, %v8709_v15 }
 0x2c8   :  { %v2400_v13 = vadd.f32 %v2399_v9, %v2347_v12  ;;  %v2418_v23 = vmax.f32 %v2398_v31, 0.0  ;;  %v2358_v5 = vpop.f32.mrf.mxu1 }
 0x2c9   :  { %v2401_v63 = vpop.f32.mrf.mxu0  ;;  %v2359_v50 = vadd.f32 %v2358_v5, %v8726_v51  ;;  %v2493_v5 = vld [vmem:[#allocation2 + $0x28] sm:$0xf] }
 0x2ca   :  { %v2419_v42 = vmax.f32 %v2400_v13, 0.0  ;;  %v2402_v29 = vadd.f32 %v2401_v63, %v2349_v1  ;;  %v2360_v44 = vpop.f32.mrf.mxu1  ;;  %v8904_v1 = vpop.permute.xlu0 %3784 }
 0x2cb   :  { %v2403_v60 = vpop.f32.mrf.mxu0  ;;  %2567 = vrot.lane.b32.xlu0 %v2548_v0, %s7753_s13  ;;  %2734 = vrot.lane.b32.xlu1 %v8854_v32, %s7757_s17  ;;  %v2361_v12 = vadd.f32 %v2360_v44, %v8726_v51  ;;  %v3929_v51 = vmul.bf16 %v8789_v37, %v8832_v58  ;;  %v3927_v0 = vmul.bf16 %v8781_v30, %v8832_v58 }
 0x2cc   :  { %v8878_v48 = vpack.c.bf16 %v2419_v42, %v2418_v23  ;;  %v2404_v28 = vadd.f32 %v2403_v60, %v2351_v11  ;;  %v2422_v56 = vmax.f32 %v2402_v29, 0.0  ;;  %v2889_v23 = vmul.bf16 %v8885_v43, %v8842_v52 }
 0x2cd   :  { %v2407_v40 = vpop.f32.mrf.mxu0  ;;  %v2887_v42 = vmul.bf16 %v8854_v32, %v8842_v52  ;;  %v2550_v60 = vmul.bf16 %v8823_v2, %v2493_v5  ;;  %v2833_v5 = vld [vmem:[#allocation2 + $0x38] sm:$0xf] }
 0x2ce   :  { %2484 = vst [vmem:[#allocation2 + $0x44] sm:$0xff] %v8878_v48  ;;  %v2423_v24 = vmax.f32 %v2404_v28, 0.0  ;;  %v2408_v20 = vadd.f32 %v2407_v40, %v2355_v17  ;;  %v8920_v29 = vpop.permute.xlu0 %3772  ;;  %v2547_v17 = vmul.bf16 %v8854_v32, %v8852_v45  ;;  %v3587_v40 = vmul.bf16 %v8781_v30, %v8806_v54 }
 0x2cf   :  { %v2409_v34 = vpop.f32.mrf.mxu0  ;;  %2740 = vrot.lane.b32.xlu0 %v2719_v19, %s7757_s17  ;;  %3774 = vrot.lane.b32.xlu1 %v8781_v30, %s7758_s18  ;;  %10891 = vst [vmem:[#allocation23_spill] sm:$0xff] %v8920_v29  ;;  %v3931_v30 = vmul.bf16 %v8811_v26, %v8832_v58  ;;  %v2831_v19 = vld [vmem:[#allocation2 + $0x28] sm:$0xf] }
 0x2d0   :  { %v8890_v36 = vpack.c.bf16 %v2423_v24, %v2422_v56  ;;  %v2410_v55 = vadd.f32 %v2409_v34, %v2357_v21  ;;  %v2426_v31 = vmax.f32 %v2408_v20, 0.0  ;;  %v2721_v21 = vld [vmem:[#allocation2 + $0x38] sm:$0xf]  ;;  %v8933_v56 = vld [vmem:[#allocation2 + $0x30] sm:$0xff]  ;;  %v3061_v20 = vld [vmem:[#allocation2 + $0x28] sm:$0xf] }
 0x2d1   :  { %v2411_v15 = vpop.f32.mrf.mxu0  ;;  %v3119_v24 = vmul.bf16 %v8794_v7, %v8933_v56  ;;  %v2891_v7 = vmul.bf16 %v8933_v56, %v8842_v52  ;;  %v3118_v44 = vmul.bf16 %v8785_v3, %v3061_v20  ;;  %v2495_v34 = vld [vmem:[#allocation2 + $0x38] sm:$0xf]  ;;  %v2549_v52 = vmul.bf16 %v8885_v43, %v8852_v45 }
 0x2d2   :  { %2485 = vst [vmem:[#allocation2 + $0x54] sm:$0xff] %v8890_v36  ;;  %v2427_v61 = vmax.f32 %v2410_v55, 0.0  ;;  %v2412_v53 = vadd.f32 %v2411_v15, %v2359_v50  ;;  %v8929_v28 = vpop.permute.xlu0 %3776  ;;  %v2552_v58 = vmul.bf16 %v8823_v2, %v2495_v34  ;;  %v2890_v50 = vmul.bf16 %v8809_v59, %v2831_v19 }
 0x2d3   :  { %v2413_v16 = vpop.f32.mrf.mxu0  ;;  %3137 = vrot.lane.b32.xlu0 %v3117_v46, %s7756_s16  ;;  %3135 = vrot.lane.b32.xlu1 %v3116_v33, %s7756_s16  ;;  %10892 = vst [vmem:[#allocation21_spill] sm:$0xff] %v8929_v28  ;;  %v8965_v33 = vrot.slane %v8724_v6, 4  ;;  %v3988_v28 = vld [vmem:[#allocation2 + $0x7c] sm:$0xf] }
 0x2d4   :  { %v8900_v14 = vpack.c.bf16 %v2427_v61, %v2426_v31  ;;  %v2414_v9 = vadd.f32 %v2413_v16, %v2361_v12  ;;  %v2430_v13 = vmax.f32 %v2412_v53, 0.0  ;;  %v8973_v61 = vrot.slane %v8752_v25, 4 }
 0x2d5   :  { %v2771_v15 = vld [vmem:[#allocation2 + $0x48] sm:$0xf] }
 0x2d6   :  { %2486 = vst [vmem:[#allocation2 + $0x64] sm:$0xff] %v8900_v14  ;;  %v2431_v63 = vmax.f32 %v2414_v9, 0.0  ;;  %v8939_v32 = vpop.permute.xlu0 %3611  ;;  %v3170_v46 = vld [vmem:[#allocation2 + $0x48] sm:$0xf]  ;;  %v8984_v9 = vrot.slane %v8757_v39, 4 }
 0x2d7   :  { %3949 = vrot.lane.b32.xlu0 %v3929_v51, %s7752_s12  ;;  %3945 = vrot.lane.b32.xlu1 %v3927_v0, %s7752_s12  ;;  %10893 = vst [vmem:[#allocation15_spill] sm:$0xff] %v8939_v32  ;;  %v3227_v12 = vmul.bf16 %v8965_v33, %v3170_v46  ;;  %v2942_v31 = vld [vmem:[#allocation2 + $0x48] sm:$0xf]  ;;  %v3063_v0 = vld [vmem:[#allocation2 + $0x38] sm:$0xf] }
 0x2d8   :  { %v8911_v11 = vpack.c.bf16 %v2431_v63, %v2430_v13  ;;  %v2602_v16 = vld [vmem:[#allocation2 + $0x48] sm:$0xf] }
 0x2d9   :  { %v2659_v13 = vmul.bf16 %v8984_v9, %v2602_v16  ;;  %v2773_v63 = vld [vmem:[#allocation2 + $0x58] sm:$0xf] }
 0x2da   :  { %2487 = vst [vmem:[#allocation2 + $0x74] sm:$0xff] %v8911_v11  ;;  %v8949_v35 = vpop.permute.xlu0 %3615  ;;  %v3172_v51 = vld [vmem:[#allocation2 + $0x58] sm:$0xf] }
 0x2db   :  { %2909 = vrot.lane.b32.xlu0 %v2889_v23, %s7754_s14  ;;  %2905 = vrot.lane.b32.xlu1 %v2887_v42, %s7754_s14  ;;  %10894 = vst [vmem:[#allocation20_spill] sm:$0xff] %v8949_v35  ;;  %v2944_v42 = vld [vmem:[#allocation2 + $0x58] sm:$0xf] }
 0x2dd   :  { %v2606_v46 = vld [vmem:[#allocation2 + $0x68] sm:$0xf] }
 0x2de   :  { %v8958_v55 = vpop.permute.xlu0 %3603 }
 0x2df   :  { %2571 = vrot.lane.b32.xlu0 %v2550_v60, %s7753_s13  ;;  %2565 = vrot.lane.b32.xlu1 %v2547_v17, %s7753_s13  ;;  %10895 = vst [vmem:[#allocation13_spill] sm:$0xff] %v8958_v55  ;;  %v3003_v60 = vmul.bf16 %v8973_v61, %v2944_v42  ;;  %v2892_v17 = vmul.bf16 %v8809_v59, %v2833_v5  ;;  %v2775_v59 = vld [vmem:[#allocation2 + $0x68] sm:$0xf]  ;;  %v3299_v5 = vld [vmem:[#allocation2 + $0xc] sm:$0xf] }
 0x2e1   :  { %v9170_v55 = vld [vmem:[#allocation2 + $0x70] sm:$0xff] }
 0x2e2   :  { %v8969_v2 = vpop.permute.xlu0 %3607 }
 0x2e3   :  { %2744 = vrot.lane.b32.xlu0 %v2721_v21, %s7757_s17  ;;  %3605 = vrot.lane.b32.xlu1 %v3587_v40, %s7755_s15  ;;  %10896 = vst [vmem:[#allocation16_spill] sm:$0xff] %v8969_v2  ;;  %v2604_v40 = vld [vmem:[#allocation2 + $0x58] sm:$0xf] }
 0x2e6   :  { %v8981_v53 = vpop.permute.xlu0 %3836 }
 0x2e7   :  { %3141 = vrot.lane.b32.xlu0 %v3119_v24, %s7756_s16  ;;  %2738 = vrot.lane.b32.xlu1 %v8885_v43, %s7757_s17  ;;  %v3001_v43 = vmul.bf16 %v8973_v61, %v2942_v31  ;;  %10897 = vst [vmem:[#allocation17_spill] sm:$0xff] %v8981_v53  ;;  %v2551_v24 = vmul.bf16 %v8933_v56, %v8852_v45 }
 0x2e8   :  { %v3591_v45 = vmul.bf16 %v8811_v26, %v8806_v54  ;;  %v2663_v31 = vmul.bf16 %v8984_v9, %v2606_v46 }
 0x2eb   :  { %3953 = vrot.lane.b32.xlu0 %v3931_v30, %s7752_s12  ;;  %3778 = vrot.lane.b32.xlu1 %v8789_v37, %s7758_s18  ;;  %v3229_v37 = vmul.bf16 %v8965_v33, %v3172_v51  ;;  %v9015_v30 = vpop.permute.xlu1 %3466  ;;  %v3176_v51 = vld [vmem:[#allocation2 + $0x78] sm:$0xf] }
 0x2ec   :  { %v3233_v42 = vmul.bf16 %v8965_v33, %v3176_v51 }
 0x2ef   :  { %2913 = vrot.lane.b32.xlu0 %v2891_v7, %s7754_s14  ;;  %3139 = vrot.lane.b32.xlu1 %v3118_v44, %s7756_s16  ;;  %v2770_v7 = vld [vmem:[#allocation2 + $0x40] sm:$0xff]  ;;  %v3174_v44 = vld [vmem:[#allocation2 + $0x68] sm:$0xf]  ;;  %v9021_v34 = vpop.permute.xlu1 %3951 }
 0x2f0   :  { %v3231_v19 = vmul.bf16 %v8965_v33, %v3174_v44  ;;  %v2772_v44 = vld [vmem:[#allocation2 + $0x50] sm:$0xff] }
 0x2f3   :  { %2575 = vrot.lane.b32.xlu0 %v2552_v58, %s7753_s13  ;;  %2911 = vrot.lane.b32.xlu1 %v2890_v50, %s7754_s14  ;;  %v9032_v50 = vpop.permute.xlu1 %3955 }
 0x2f4   :  { %v3964_v29 = vrot.slane %v9032_v50, 4 }
 0x2f7   :  { %2788 = vrot.lane.b32.xlu0 %v2771_v15, %s7757_s17  ;;  %2569 = vrot.lane.b32.xlu1 %v2549_v52, %s7753_s13  ;;  %v3363_v15 = vmul.bf16 %v8811_v26, %v8798_v8 }
 0x2fb   :  { %3244 = vrot.lane.b32.xlu0 %v3227_v12, %s7756_s16  ;;  %3609 = vrot.lane.b32.xlu1 %v3589_v62, %s7755_s15  ;;  %v8995_v62 = vpop.permute.xlu0 %3840 }
 0x2fc   :  { %10898 = vst [vmem:[#allocation19_spill] sm:$0xff] %v8995_v62  ;;  %v3414_v62 = vld [vmem:[#allocation2 + $0x4c] sm:$0xf] }
 0x2ff   :  { %3018 = vrot.lane.b32.xlu0 %v3001_v43, %s7754_s14  ;;  %3381 = vrot.lane.b32.xlu1 %v3361_v10, %s7751_s11  ;;  %v3120_v10 = vmul.bf16 %v8785_v3, %v3063_v0  ;;  %v9002_v23 = vpop.permute.xlu0 %3383  ;;  %v2661_v3 = vmul.bf16 %v8984_v9, %v2604_v40  ;;  %v9062_v0 = vsel %vm484_vm3, %v8973_v61, %v8752_v25 }
 0x300   :  { %10899 = vst [vmem:[#allocation24_spill] sm:$0xff] %v9002_v23  ;;  %v3416_v23 = vld [vmem:[#allocation2 + $0x5c] sm:$0xf] }
 0x303   :  { %2676 = vrot.lane.b32.xlu0 %v2659_v13, %s7753_s13  ;;  %2742 = vrot.lane.b32.xlu1 %v8933_v56, %s7757_s17  ;;  %v9010_v21 = vpop.permute.xlu0 %3387  ;;  %v2946_v56 = vld [vmem:[#allocation2 + $0x68] sm:$0xf] }
 0x304   :  { %10900 = vst [vmem:[#allocation25_spill] sm:$0xff] %v9010_v21  ;;  %v3005_v52 = vmul.bf16 %v8973_v61, %v2946_v56 }
 0x307   :  { %2792 = vrot.lane.b32.xlu0 %v2773_v63, %s7757_s17  ;;  %3782 = vrot.lane.b32.xlu1 %v8811_v26, %s7758_s18  ;;  %v9019_v20 = vpop.permute.xlu0 %3828  ;;  %v9050_v26 = vsel %vm714_vm0, %v8965_v33, %v8724_v6  ;;  %v2777_v63 = vld [vmem:[#allocation2 + $0x78] sm:$0xf] }
 0x308   :  { %10901 = vst [vmem:[#allocation22_spill] sm:$0xff] %v9019_v20  ;;  %v3226_v13 = vmul.bf16 %v9050_v26, %v2770_v7  ;;  %v3420_v20 = vld [vmem:[#allocation2 + $0x7c] sm:$0xf] }
 0x30b   :  { %3248 = vrot.lane.b32.xlu0 %v3229_v37, %s7756_s16  ;;  %3143 = vrot.lane.b32.xlu1 %v3120_v10, %s7756_s16  ;;  %v9030_v58 = vpop.permute.xlu0 %3832  ;;  %v3000_v10 = vmul.bf16 %v9062_v0, %v2770_v7 }
 0x30c   :  { %10902 = vst [vmem:[#allocation26_spill] sm:$0xff] %v9030_v58 }
 0x30f   :  { %3022 = vrot.lane.b32.xlu0 %v3003_v60, %s7754_s14  ;;  %2915 = vrot.lane.b32.xlu1 %v2892_v17, %s7754_s14  ;;  %v9075_v60 = vsel %vm140_vm1, %v8984_v9, %v8757_v39 }
 0x310   :  { %v2658_v40 = vmul.bf16 %v2770_v7, %v9075_v60 }
 0x313   :  { %2680 = vrot.lane.b32.xlu0 %v2661_v3, %s7753_s13  ;;  %2573 = vrot.lane.b32.xlu1 %v2551_v24, %s7753_s13  ;;  %v3358_v3 = vmul.bf16 %v8763_v27, %v3299_v5  ;;  %v2948_v24 = vld [vmem:[#allocation2 + $0x78] sm:$0xf] }
 0x314   :  { %v3007_v39 = vmul.bf16 %v8973_v61, %v2948_v24  ;;  %v2608_v5 = vld [vmem:[#allocation2 + $0x78] sm:$0xf]  ;;  %v2660_v24 = vmul.bf16 %v2772_v44, %v9075_v60 }
 0x317   :  { %2796 = vrot.lane.b32.xlu0 %v2775_v59, %s7757_s17  ;;  %2786 = vrot.lane.b32.xlu1 %v2770_v7, %s7757_s17 }
 0x31b   :  { %3252 = vrot.lane.b32.xlu0 %v3231_v19, %s7756_s16  ;;  %3613 = vrot.lane.b32.xlu1 %v3591_v45, %s7755_s15  ;;  %v3301_v19 = vld [vmem:[#allocation2 + $0x1c] sm:$0xf] }
 0x31c   :  { %v3360_v56 = vmul.bf16 %v8763_v27, %v3301_v19  ;;  %v3642_v19 = vld [vmem:[#allocation2 + $0x4c] sm:$0xf] }
 0x31f   :  { %3026 = vrot.lane.b32.xlu0 %v3005_v52, %s7754_s14  ;;  %3385 = vrot.lane.b32.xlu1 %v3363_v15, %s7751_s11  ;;  %v3646_v52 = vld [vmem:[#allocation2 + $0x6c] sm:$0xf]  ;;  %v9098_v15 = vrot.slane %v8837_v41, 4 }
 0x321   :  { %v9039_v54 = vpop.permute.xlu1 %2730  ;;  %v9041_v12 = vpop.permute.xlu0 %2732 }
 0x323   :  { %2684 = vrot.lane.b32.xlu0 %v2663_v31, %s7753_s13  ;;  %3826 = vrot.lane.b32.xlu1 %v8878_v48, %s7758_s18  ;;  %v3228_v31 = vmul.bf16 %v9050_v26, %v2772_v44 }
 0x325   :  { %v9052_v43 = vpop.permute.xlu1 %3770  ;;  %v9054_v16 = vpop.permute.xlu0 %3129 }
 0x326   :  { %10903 = vst [vmem:[#allocation14_spill] sm:$0xff] %v9052_v43 }
 0x327   :  { %2800 = vrot.lane.b32.xlu0 %v2777_v63, %s7757_s17  ;;  %3242 = vrot.lane.b32.xlu1 %v3226_v13, %s7756_s16  ;;  %v3703_v13 = vmul.bf16 %v9098_v15, %v3646_v52  ;;  %v3648_v63 = vld [vmem:[#allocation2 + $0x7c] sm:$0xf] }
 0x329   :  { %v9064_v37 = vpop.permute.xlu1 %3131  ;;  %v9066_v6 = vpop.permute.xlu0 %2903 }
 0x32b   :  { %3016 = vrot.lane.b32.xlu1 %v3000_v10, %s7754_s14  ;;  %3256 = vrot.lane.b32.xlu0 %v3233_v42, %s7756_s16  ;;  %v3002_v10 = vmul.bf16 %v9062_v0, %v2772_v44  ;;  %v3705_v42 = vmul.bf16 %v9098_v15, %v3648_v63  ;;  %v3644_v63 = vld [vmem:[#allocation2 + $0x5c] sm:$0xf] }
 0x32d   :  { %v9077_v25 = vpop.permute.xlu1 %3941  ;;  %v9079_v17 = vpop.permute.xlu0 %2563 }
 0x32f   :  { %2674 = vrot.lane.b32.xlu1 %v2658_v40, %s7753_s13  ;;  %3375 = vrot.lane.b32.xlu0 %v3358_v3, %s7751_s11 }
 0x331   :  { %v9085_v33 = vpop.permute.xlu1 %2901  ;;  %v9087_v59 = vpop.permute.xlu0 %2736 }
 0x333   :  { %2790 = vrot.lane.b32.xlu1 %v2772_v44, %s7757_s17  ;;  %3030 = vrot.lane.b32.xlu0 %v3007_v39, %s7754_s14  ;;  %v2665_v39 = vmul.bf16 %v8984_v9, %v2608_v5  ;;  %v3701_v9 = vmul.bf16 %v9098_v15, %v3644_v63  ;;  %v9136_v5 = vrot.slane %v9015_v30, 4 }
 0x335   :  { %v9092_v7 = vpop.permute.xlu1 %2561  ;;  %v9094_v45 = vpop.permute.xlu0 %3133 }
 0x337   :  { %3830 = vrot.lane.b32.xlu1 %v8890_v36, %s7758_s18  ;;  %3379 = vrot.lane.b32.xlu0 %v3360_v56, %s7751_s11 }
 0x339   :  { %v9103_v61 = vpop.permute.xlu1 %3601  ;;  %v9105_v46 = vpop.permute.xlu0 %2907 }
 0x33a   :  { %10904 = vst [vmem:[#allocation27_spill] sm:$0xff] %v9103_v61 }
 0x33b   :  { %3246 = vrot.lane.b32.xlu1 %v3228_v31, %s7756_s16  ;;  %3724 = vrot.lane.b32.xlu0 %v3703_v13, %s7755_s15  ;;  %v3699_v31 = vmul.bf16 %v9098_v15, %v3642_v19  ;;  %v2774_v13 = vld [vmem:[#allocation2 + $0x60] sm:$0xff] }
 0x33c   :  { %v3230_v19 = vmul.bf16 %v9050_v26, %v2774_v13  ;;  %v3004_v53 = vmul.bf16 %v9062_v0, %v2774_v13 }
 0x33d   :  { %v9111_v27 = vpop.permute.xlu1 %2734  ;;  %v9113_v51 = vpop.permute.xlu0 %2567 }
 0x33f   :  { %3020 = vrot.lane.b32.xlu1 %v3002_v10, %s7754_s14  ;;  %3728 = vrot.lane.b32.xlu0 %v3705_v42, %s7755_s15  ;;  %v3418_v42 = vld [vmem:[#allocation2 + $0x6c] sm:$0xf] }
 0x341   :  { %v9119_v40 = vpop.permute.xlu1 %3774  ;;  %v9121_v3 = vpop.permute.xlu0 %2740 }
 0x342   :  { %10905 = vst [vmem:[#allocation28_spill] sm:$0xff] %v9119_v40 }
 0x343   :  { %2678 = vrot.lane.b32.xlu1 %v2660_v24, %s7753_s13  ;;  %2688 = vrot.lane.b32.xlu0 %v2665_v39, %s7753_s13 }
 0x345   :  { %v9127_v56 = vpop.permute.xlu1 %3135  ;;  %v9129_v52 = vpop.permute.xlu0 %3137 }
 0x347   :  { %2794 = vrot.lane.b32.xlu1 %v2774_v13, %s7757_s17  ;;  %3716 = vrot.lane.b32.xlu0 %v3699_v31, %s7755_s15  ;;  %v3477_v31 = vmul.bf16 %v9136_v5, %v3418_v42 }
 0x349   :  { %v3946_v44 = vpop.permute.xlu1 %3945  ;;  %v3950_v10 = vpop.permute.xlu0 %3949 }
 0x34a   :  { %v3961_v2 = vrot.slane %v3950_v10, 4 }
 0x34b   :  { %3834 = vrot.lane.b32.xlu1 %v8900_v14, %s7758_s18  ;;  %3720 = vrot.lane.b32.xlu0 %v3701_v9, %s7755_s15  ;;  %v3479_v9 = vmul.bf16 %v9136_v5, %v3420_v20 }
 0x34d   :  { %v9141_v24 = vpop.permute.xlu1 %2905  ;;  %v9143_v39 = vpop.permute.xlu0 %2909 }
 0x34f   :  { %3250 = vrot.lane.b32.xlu1 %v3230_v19, %s7756_s16  ;;  %3498 = vrot.lane.b32.xlu0 %v3477_v31, %s7751_s11  ;;  %v2662_v19 = vmul.bf16 %v2774_v13, %v9075_v60  ;;  %v3473_v31 = vmul.bf16 %v9136_v5, %v3414_v62  ;;  %v9173_v13 = vrot.slane %v8847_v57, 4  ;;  %v3960_v62 = vrot.slane %v8873_v18, 4 }
 0x351   :  { %v9149_v63 = vpop.permute.xlu1 %2565  ;;  %v9151_v58 = vpop.permute.xlu0 %2571 }
 0x353   :  { %3024 = vrot.lane.b32.xlu1 %v3004_v53, %s7754_s14  ;;  %3502 = vrot.lane.b32.xlu0 %v3479_v9, %s7751_s11  ;;  %v3475_v53 = vmul.bf16 %v9136_v5, %v3416_v23  ;;  %v3959_v9 = vrot.slane %v3946_v44, 4  ;;  %v3958_v23 = vrot.slane %v8861_v22, 4 }
 0x355   :  { %v9157_v21 = vpop.permute.xlu1 %3605  ;;  %v9159_v42 = vpop.permute.xlu0 %2744  ;;  %v3967_v40 = vsel %vm184_vm5, %v3959_v9, %v3960_v62 }
 0x356   :  { %10906 = vst [vmem:[#allocation29_spill] sm:$0xff] %v9157_v21  ;;  %v3986_v21 = vld [vmem:[#allocation2 + $0x6c] sm:$0xf] }
 0x357   :  { %2682 = vrot.lane.b32.xlu1 %v2662_v19, %s7753_s13  ;;  %3490 = vrot.lane.b32.xlu0 %v3473_v31, %s7751_s11  ;;  %v3962_v19 = vrot.slane %v9021_v34, 4  ;;  %v3957_v31 = vrot.slane %v9077_v25, 4  ;;  %v4045_v43 = vmul.bf16 %v9173_v13, %v3986_v21  ;;  %v4047_v34 = vmul.bf16 %v9173_v13, %v3988_v28 }
 0x358   :  { %v3968_v21 = vsel %vm140_vm1, %v3946_v44, %v3967_v40 }
 0x359   :  { %v9165_v61 = vpop.permute.xlu1 %2738  ;;  %v9167_v20 = vpop.permute.xlu0 %3141  ;;  %v3965_v22 = vsel %vm184_vm5, %v3957_v31, %v3958_v23  ;;  %v9203_v31 = vld [vmem:[#allocation2 + $0x4] sm:$0xff] }
 0x35b   :  { %2798 = vrot.lane.b32.xlu1 %v9170_v55, %s7757_s17  ;;  %3494 = vrot.lane.b32.xlu0 %v3475_v53, %s7751_s11  ;;  %v3969_v53 = vsel %vm184_vm5, %v3961_v2, %v3962_v19  ;;  %v3232_v19 = vmul.bf16 %v9050_v26, %v9170_v55  ;;  %v3357_v26 = vmul.bf16 %v8798_v8, %v9203_v31 }
 0x35c   :  { %v3970_v50 = vsel %vm140_vm1, %v3950_v10, %v3969_v53  ;;  %v3984_v10 = vld [vmem:[#allocation2 + $0x5c] sm:$0xf] }
 0x35d   :  { %v9182_v35 = vpop.permute.xlu1 %3778  ;;  %v3954_v32 = vpop.permute.xlu0 %3953 }
 0x35e   :  { %10907 = vst [vmem:[#allocation30_spill] sm:$0xff] %v9182_v35  ;;  %v3963_v47 = vrot.slane %v3954_v32, 4 }
 0x35f   :  { %3838 = vrot.lane.b32.xlu1 %v8911_v11, %s7758_s18  ;;  %4066 = vrot.lane.b32.xlu0 %v4045_v43, %s7752_s12 }
 0x360   :  { %v3971_v18 = vsel %vm184_vm5, %v3963_v47, %v3964_v29  ;;  %v3982_v47 = vld [vmem:[#allocation2 + $0x4c] sm:$0xf]  ;;  %v3966_v29 = vsel %vm140_vm1, %v9077_v25, %v3965_v22  ;;  %v3006_v22 = vmul.bf16 %v9062_v0, %v9170_v55 }
 0x361   :  { %v3972_v9 = vsel %vm140_vm1, %v3954_v32, %v3971_v18  ;;  %v9197_v62 = vpop.permute.xlu1 %3139  ;;  %v9199_v2 = vpop.permute.xlu0 %2913  ;;  %v7458_v28 = vcombine.high %v3966_v29, %v3968_v21  ;;  %v4041_v44 = vmul.bf16 %v9173_v13, %v3982_v47  ;;  %v7457_v23 = vcombine.low %v3966_v29, %v3968_v21  ;;  %v7386_v21 = vld [vmem:[%s10811_s3 + $0x38] sm:$0xff] }
 0x362   :  { %v7461_v43 = vcombine.low %v3970_v50, %v3972_v9  ;;  %v7462_v35 = vcombine.high %v3970_v50, %v3972_v9  ;;  %v4043_v18 = vmul.bf16 %v9173_v13, %v3984_v10 }
 0x363   :  { %3254 = vrot.lane.b32.xlu1 %v3232_v19, %s7756_s16  ;;  %4070 = vrot.lane.b32.xlu0 %v4047_v34, %s7752_s12  ;;  %v9228_v34 = vld [vmem:[#allocation2 + $0x14] sm:$0xff]  ;;  %v9247_v19 = vsel %vm529_vm4, %v9098_v15, %v8837_v41 }
 0x364   :  { %4663 = vmatprep.subr.bf16.mxu0 %v7462_v35  ;;  %v7637_v35 = vld [vmem:[%s10810_s2 + $0x38] ss:$12 sps:$4 sm:$0xff]   ;;  %v3359_v0 = vmul.bf16 %v8798_v8, %v9228_v34  ;;  %v3702_v8 = vmul.bf16 %v8900_v14, %v9247_v19  ;;  %v3698_v41 = vmul.bf16 %v8878_v48, %v9247_v19  ;;  %v7645_v15 = vld [vmem:[%s10810_s2 + $0x34] ss:$12 sps:$4 sm:$0xff]  }
 0x365   :  { %v9209_v32 = vpop.permute.xlu1 %2911  ;;  %4664 = vmatpush1.bf16.msra.mxu0 %v7461_v43  ;;  %v9211_v40 = vpop.permute.xlu0 %2575  ;;  %v7384_v43 = vld [vmem:[%s10811_s3 + $0x28] sm:$0xff]  ;;  %4630 = vmatprep.mubr.bf16.mxu1 %v7645_v15 }
 0x366   :  { %4665 = vmatprep.subr.bf16.mxu0 %v7458_v28 }
 0x367   :  { %3373 = vrot.lane.b32.xlu1 %v3357_v26, %s7751_s11  ;;  %4058 = vrot.lane.b32.xlu0 %v4041_v44, %s7752_s12  ;;  %v3148_v44 = vrot.slane %v9127_v56, 4  ;;  %v9284_v56 = vsel %vm759_vm6, %v9136_v5, %v9015_v30 }
 0x368   :  { %v3476_v30 = vmul.bf16 %v8900_v14, %v9284_v56 }
 0x369   :  { %v9221_v25 = vpop.permute.xlu1 %2569  ;;  %4666 = vmatpush1.bf16.msra.mxu0 %v7457_v23  ;;  %v9223_v53 = vpop.permute.xlu0 %2788 }
 0x36b   :  { %3028 = vrot.lane.b32.xlu1 %v3006_v22, %s7754_s14  ;;  %4062 = vrot.lane.b32.xlu0 %v4043_v18, %s7752_s12  ;;  %v3150_v22 = vrot.slane %v9197_v62, 4  ;;  %v3147_v18 = vrot.slane %v9094_v45, 4  ;;  %v3151_v62 = vrot.slane %v9167_v20, 4 }
 0x36c   :  { %7465 = vmatmul.mubr.msk.bf16.vlgmr.msra.gmra.mxu0 %vm2197_vm8, %v7637_v35  ;;  %v2664_v35 = vmul.bf16 %v9170_v55, %v9075_v60  ;;  %v3700_v55 = vmul.bf16 %v8890_v36, %v9247_v19  ;;  %v3145_v60 = vrot.slane %v9054_v16, 4 }
 0x36d   :  { %v9236_v50 = vpop.permute.xlu1 %3609  ;;  %v9238_v9 = vpop.permute.xlu0 %3244  ;;  %4693 = vmatprep.mubr.bf16.mxu0 %v10871_v4  ;;  %v2919_v4 = vrot.slane %v9141_v24, 4 }
 0x36f   :  { %3377 = vrot.lane.b32.xlu1 %v3359_v0, %s7751_s11  ;;  %4199 = vperm.xlu0 %7617, %v7386_v21   ;;  %v3146_v21 = vrot.slane %v9064_v37, 4  ;;  %v3149_v0 = vrot.slane %v9129_v52, 4 }
 0x371   :  { %v9252_v47 = vpop.permute.xlu1 %3381  ;;  %v9254_v29 = vpop.permute.xlu0 %3018  ;;  %v3157_v37 = vsel %vm184_vm5, %v3149_v0, %v3150_v22  ;;  %v3153_v5 = vsel %vm184_vm5, %v3145_v60, %v3146_v21 }
 0x373   :  { %3722 = vrot.lane.b32.xlu1 %v3702_v8, %s7755_s15  ;;  %4189 = vperm.xlu0 %7617, %v7384_v43   ;;  %v3155_v43 = vsel %vm184_vm5, %v3147_v18, %v3148_v44  ;;  %v2922_v44 = vrot.slane %v9209_v32, 4  ;;  %v2923_v32 = vrot.slane %v9199_v2, 4 }
 0x374   :  { %v3156_v36 = vsel %vm759_vm6, %v9094_v45, %v3155_v43  ;;  %v7649_v45 = vld [vmem:[%s10810_s2 + $0x50] ss:$12 sps:$4 sm:$0xff]   ;;  %v2917_v43 = vrot.slane %v9085_v33, 4 }
 0x375   :  { %v9259_v28 = vpop.permute.xlu1 %2742  ;;  %v9261_v26 = vpop.permute.xlu0 %2676  ;;  %7466 = vmatmul.mubr.msk.bf16.gmra.mxu0 %vm2197_vm8, %v7649_v45  ;;  %v2747_v45 = vrot.slane %v9041_v12, 4 }
 0x376   :  { %10908 = vst [vmem:[#allocation31_spill] sm:$0xff] %v9261_v26  ;;  %v2921_v26 = vrot.slane %v9143_v39, 4  ;;  %4736 = vmatprep.mubr.bf16.mxu0 %v7645_v15 }
 0x377   :  { %3714 = vrot.lane.b32.xlu1 %v3698_v41, %s7755_s15 }
 0x379   :  { %v9270_v10 = vpop.permute.xlu1 %3782  ;;  %v9272_v23 = vpop.permute.xlu0 %2792 }
 0x37b   :  { %2686 = vrot.lane.b32.xlu1 %v2664_v35, %s7753_s13 }
 0x37d   :  { %v3144_v8 = vpop.permute.xlu1 %3143  ;;  %v9287_v41 = vpop.permute.xlu0 %3248 }
 0x37e   :  { %v3152_v35 = vrot.slane %v3144_v8, 4  ;;  %v3158_v8 = vsel %vm759_vm6, %v9129_v52, %v3157_v37  ;;  %v2920_v52 = vrot.slane %v9105_v46, 4  ;;  %v2918_v46 = vrot.slane %v9066_v6, 4 }
 0x37f   :  { %3718 = vrot.lane.b32.xlu1 %v3700_v55, %s7755_s15 }
 0x380   :  { %v3159_v18 = vsel %vm184_vm5, %v3151_v62, %v3152_v35  ;;  %v3154_v62 = vsel %vm759_vm6, %v9054_v16, %v3153_v5  ;;  %v2752_v5 = vrot.slane %v9259_v28, 4 }
 0x381   :  { %v2916_v22 = vpop.permute.xlu1 %2915  ;;  %v9304_v0 = vpop.permute.xlu0 %3022  ;;  %v3160_v14 = vsel %vm759_vm6, %v9167_v20, %v3159_v18  ;;  %v2929_v20 = vsel %vm184_vm5, %v2921_v26, %v2922_v44  ;;  %v7418_v35 = vcombine.high %v3154_v62, %v3156_v36  ;;  %v2927_v26 = vsel %vm184_vm5, %v2919_v4, %v2920_v52 }
 0x382   :  { %v2924_v21 = vrot.slane %v2916_v22, 4  ;;  %v7421_v55 = vcombine.low %v3158_v8, %v3160_v14  ;;  %v7422_v60 = vcombine.high %v3158_v8, %v3160_v14  ;;  %v7417_v44 = vcombine.low %v3154_v62, %v3156_v36 }
 0x383   :  { %3496 = vrot.lane.b32.xlu1 %v3476_v30, %s7751_s11  ;;  %v3472_v30 = vmul.bf16 %v8878_v48, %v9284_v56  ;;  %v2930_v8 = vsel %vm529_vm4, %v9143_v39, %v2929_v20  ;;  %v2925_v14 = vsel %vm184_vm5, %v2917_v43, %v2918_v46  ;;  %v2753_v48 = vrot.slane %v9159_v42, 4  ;;  %v7497_v39 = vld.sshfl [vmem:[%s10809_s1] sm:$0x11 pattern:$0x75316420] }
 0x384   :  { %v2931_v37 = vsel %vm184_vm5, %v2923_v32, %v2924_v21  ;;  %4598 = vmatprep.subr.bf16.mxu1 %v7422_v60  ;;  %v2928_v6 = vsel %vm529_vm4, %v9141_v24, %v2927_v26  ;;  %v3704_v36 = vmul.bf16 %v8911_v11, %v9247_v19  ;;  %v2746_v42 = vrot.slane %v9039_v54, 4  ;;  %v9354_v60 = vld [vmem:[#allocation2 + $0x54] sm:$0xff] }
 0x385   :  { %v9322_v18 = vpop.permute.xlu1 %2573  ;;  %4599 = vmatpush1.bf16.msra.mxu1 %v7421_v55  ;;  %v9324_v22 = vpop.permute.xlu0 %2680  ;;  %v2932_v16 = vsel %vm529_vm4, %v9199_v2, %v2931_v37  ;;  %v2750_v2 = vrot.slane %v9165_v61, 4  ;;  %v2748_v21 = vrot.slane %v9111_v27, 4  ;;  %v2751_v55 = vrot.slane %v9121_v3, 4 }
 0x386   :  { %4600 = vmatprep.subr.bf16.mxu1 %v7418_v35  ;;  %v7414_v15 = vcombine.high %v2930_v8, %v2932_v16  ;;  %v2760_v24 = vsel %vm184_vm5, %v2752_v5, %v2753_v48  ;;  %v2926_v19 = vsel %vm529_vm4, %v9085_v33, %v2925_v14  ;;  %v7413_v43 = vcombine.low %v2930_v8, %v2932_v16 }
 0x387   :  { %3488 = vrot.lane.b32.xlu1 %v3472_v30, %s7751_s11  ;;  %v6277_v62 = vcombine.high %v7497_v39, %v7497_v39  ;;  %v2749_v52 = vrot.slane %v9087_v59, 4  ;;  %v2758_v20 = vsel %vm184_vm5, %v2750_v2, %v2751_v55  ;;  %v7410_v37 = vcombine.high %v2926_v19, %v2928_v6  ;;  %v9402_v55 = vld [vmem:[#allocation2 + $0x64] sm:$0xff] }
 0x388   :  { %v9363_v3 = vrot.slane %v7497_v39, %v10873_v38  ;;  %v2761_v35 = vsel %vm356_vm7, %v9259_v28, %v2760_v24  ;;  %v3474_v33 = vmul.bf16 %v9284_v56, %v9354_v60  ;;  %v2583_v46 = vrot.slane %v9322_v18, 4 }
 0x389   :  { %v9341_v4 = vpop.permute.xlu1 %2786  ;;  %4601 = vmatpush1.bf16.msra.mxu1 %v7417_v44  ;;  %v9343_v32 = vpop.permute.xlu0 %2796  ;;  %v9374_v16 = vrot.slane %v6277_v62, %v10873_v38  ;;  %v2756_v59 = vsel %vm184_vm5, %v2748_v21, %v2749_v52  ;;  %v2754_v28 = vsel %vm184_vm5, %v2746_v42, %v2747_v45  ;;  %v7409_v5 = vcombine.low %v2926_v19, %v2928_v6 }
 0x38a   :  { %4602 = vmatprep.subr.bf16.mxu1 %v7414_v15  ;;  %v6293_v26 = vshrl.u32 %v9363_v3, 16  ;;  %v2759_v44 = vsel %vm356_vm7, %v9165_v61, %v2758_v20  ;;  %v2584_v38 = vrot.slane %v9211_v40, 4  ;;  %v2581_v14 = vrot.slane %v9221_v25, 4 }
 0x38b   :  { %3726 = vrot.lane.b32.xlu1 %v3704_v36, %s7755_s15  ;;  %v6301_v8 = vshrl.u32 %v9374_v16, 16  ;;  %v7406_v48 = vcombine.high %v2759_v44, %v2761_v35  ;;  %v2757_v15 = vsel %vm356_vm7, %v9111_v27, %v2756_v59  ;;  %v3478_v61 = vmul.bf16 %v8911_v11, %v9284_v56 }
 0x38c   :  { %v6294_v2 = vpack.i.b16 %v6293_v26, %v6293_v26  ;;  %v9397_v40 = vsel %vm186_vm2, %v9173_v13, %v8847_v57  ;;  %v2579_v42 = vrot.slane %v9149_v63, 4  ;;  %v2582_v21 = vrot.slane %v9151_v58, 4  ;;  %v10909_v26 = vld [vmem:[#allocation30_spill] sm:$0xff] }
 0x38d   :  { %v9367_v30 = vpop.permute.xlu1 %3613  ;;  %4603 = vmatpush1.bf16.msra.mxu1 %v7413_v43  ;;  %v9369_v12 = vpop.permute.xlu0 %3252  ;;  %v6302_v39 = vpack.i.b16 %v6301_v8, %v6301_v8  ;;  %v2591_v27 = vsel %vm184_vm5, %v2583_v46, %v2584_v38  ;;  %v2755_v24 = vsel %vm356_vm7, %v9039_v54, %v2754_v28  ;;  %v7405_v45 = vcombine.low %v2759_v44, %v2761_v35 }
 0x38e   :  { %4604 = vmatprep.subr.bf16.mxu1 %v7410_v37  ;;  %v6299_v11 = vrot.slane %v6294_v2, %v10889_v49  ;;  %v2577_v13 = vrot.slane %v9092_v7, 4  ;;  %v2580_v56 = vrot.slane %v9113_v51, 4  ;;  %v2589_v58 = vsel %vm184_vm5, %v2581_v14, %v2582_v21  ;;  %v10910_v14 = vld [vmem:[#allocation18_spill] sm:$0xff]  ;;  %v10911_v2 = vld [vmem:[#allocation28_spill] sm:$0xff] }
 0x38f   :  { %3492 = vrot.lane.b32.xlu1 %v3474_v33, %s7751_s11  ;;  %v6307_v57 = vrot.slane %v6302_v39, %v10889_v49  ;;  %v7402_v19 = vcombine.high %v2755_v24, %v2757_v15  ;;  %v2592_v43 = vsel %vm186_vm2, %v9322_v18, %v2591_v27  ;;  %v4044_v52 = vmul.bf16 %v9397_v40, %v9402_v55  ;;  %v9425_v33 = vld [vmem:[#allocation2 + $0x44] sm:$0xff]  ;;  %v10913_v27 = vld [vmem:[#allocation21_spill] sm:$0xff] }
 0x390   :  { %v2578_v37 = vrot.slane %v9079_v17, 4  ;;  %v2587_v51 = vsel %vm184_vm5, %v2579_v42, %v2580_v56  ;;  %v3792_v35 = vrot.slane %v9270_v10, 4  ;;  %v7401_v18 = vcombine.low %v2755_v24, %v2757_v15  ;;  %v10912_v39 = vld [vmem:[#allocation23_spill] sm:$0xff] }
 0x391   :  { %v9388_v36 = vpop.permute.xlu1 %3385  ;;  %4605 = vmatpush1.bf16.msra.mxu1 %v7409_v5  ;;  %v9390_v6 = vpop.permute.xlu0 %3026  ;;  %v9420_v20 = vcombine.low %v6299_v11, %v6307_v57  ;;  %v2590_v59 = vsel %vm186_vm2, %v9221_v25, %v2589_v58  ;;  %v3793_v46 = vrot.slane %v8904_v1, 4  ;;  %v3790_v28 = vrot.slane %v10909_v26, 4 }
 0x392   :  { %4606 = vmatprep.subr.bf16.mxu1 %v7406_v48  ;;  %v2585_v17 = vsel %vm184_vm5, %v2577_v13, %v2578_v37  ;;  %v7398_v5 = vcombine.high %v2590_v59, %v2592_v43  ;;  %v2588_v44 = vsel %vm186_vm2, %v9149_v63, %v2587_v51  ;;  %v4040_v25 = vmul.bf16 %v9397_v40, %v9425_v33  ;;  %v10915_v37 = vld [vmem:[#allocation15_spill] sm:$0xff] }
 0x393   :  { %3500 = vrot.lane.b32.xlu1 %v3478_v61, %s7751_s11  ;;  %6313 = vrot.lane.b32.xlu0 %v9420_v20, %s7753_s13  ;;  %v3791_v48 = vrot.slane %v10910_v14, 4  ;;  %v3788_v1 = vrot.slane %v10911_v2, 4  ;;  %v3800_v15 = vsel %vm184_vm5, %v3792_v35, %v3793_v46  ;;  %v9446_v61 = vld [vmem:[#allocation2 + $0x74] sm:$0xff]  ;;  %v3787_v42 = vrot.slane %v10912_v39, 4 }
 0x394   :  { %v2586_v63 = vsel %vm186_vm2, %v9092_v7, %v2585_v17  ;;  %v7397_v21 = vcombine.low %v2590_v59, %v2592_v43  ;;  %v3789_v24 = vrot.slane %v10913_v27, 4  ;;  %v3801_v56 = vsel %vm1401_vm9, %v9270_v10, %v3800_v15  ;;  %v10916_v17 = vld [vmem:[#allocation20_spill] sm:$0xff]  ;;  %v10918_v39 = vld [vmem:[#allocation13_spill] sm:$0xff] }
 0x395   :  { %v9414_v62 = vpop.permute.xlu1 %3826  ;;  %4607 = vmatpush1.bf16.msra.mxu1 %v7405_v45  ;;  %v9416_v54 = vpop.permute.xlu0 %2684  ;;  %v10914_v45 = vld [vmem:[#allocation14_spill] sm:$0xff]  ;;  %v3798_v57 = vsel %vm184_vm5, %v3790_v28, %v3791_v48  ;;  %v7394_v13 = vcombine.high %v2586_v63, %v2588_v44  ;;  %v4046_v7 = vmul.bf16 %v9397_v40, %v9446_v61  ;;  %v5596_v43 = vpack.i.b16 %v9363_v3, %v9363_v3 }
 0x396   :  { %4608 = vmatprep.subr.bf16.mxu1 %v7402_v19  ;;  %v3786_v11 = vrot.slane %v10914_v45, 4  ;;  %v3622_v51 = vrot.slane %v10915_v37, 4  ;;  %v3796_v35 = vsel %vm184_vm5, %v3788_v1, %v3789_v24  ;;  %v3623_v10 = vrot.slane %v9367_v30, 4  ;;  %v10920_v24 = vld [vmem:[#allocation27_spill] sm:$0xff]  ;;  %v10922_v37 = vld [vmem:[#allocation25_spill] sm:$0xff] }
 0x397   :  { %4064 = vrot.lane.b32.xlu1 %v4044_v52, %s7752_s12  ;;  %v5603_v52 = vpack.i.b16 %v9374_v16, %v9374_v16  ;;  %v3799_v59 = vsel %vm1401_vm9, %v10909_v26, %v3798_v57  ;;  %v5601_v46 = vrot.slane %v5596_v43, %v10889_v49  ;;  %v3624_v28 = vrot.slane %v10916_v17, 4  ;;  %v10921_v43 = vld [vmem:[#allocation24_spill] sm:$0xff] }
 0x398   :  { %v3794_v16 = vsel %vm184_vm5, %v3786_v11, %v3787_v42  ;;  %v3797_v14 = vsel %vm1401_vm9, %v10911_v2, %v3796_v35  ;;  %v3617_v11 = vrot.slane %v10920_v24, 4  ;;  %v7453_v57 = vcombine.low %v3799_v59, %v3801_v56 }
 0x399   :  { %v9437_v8 = vpop.permute.xlu1 %3242  ;;  %4609 = vmatpush1.bf16.msra.mxu1 %v7401_v18  ;;  %v9439_v38 = vpop.permute.xlu0 %2800  ;;  %v7393_v18 = vcombine.low %v2586_v63, %v2588_v44  ;;  %v5608_v3 = vrot.slane %v5603_v52, %v10889_v49  ;;  %v10917_v44 = vld [vmem:[#allocation29_spill] sm:$0xff]  ;;  %v4042_v49 = vmul.bf16 %v9397_v40, %v9354_v60  ;;  %v3618_v63 = vrot.slane %v10918_v39, 4 }
 0x39a   :  { %4610 = vmatprep.subr.bf16.mxu1 %v7398_v5  ;;  %v3621_v5 = vrot.slane %v9236_v50, 4  ;;  %v3619_v48 = vrot.slane %v10917_v44, 4  ;;  %v3631_v42 = vsel %vm184_vm5, %v3623_v10, %v3624_v28  ;;  %v3795_v2 = vsel %vm1401_vm9, %v10914_v45, %v3794_v16 }
 0x39b   :  { %4056 = vrot.lane.b32.xlu1 %v4040_v25, %s7752_s12  ;;  %v7454_v25 = vcombine.high %v3799_v59, %v3801_v56  ;;  %v7488_v15 = vcombine.low %v5601_v46, %v5608_v3  ;;  %v3394_v52 = vrot.slane %v10921_v43, 4  ;;  %v3396_v35 = vrot.slane %v10922_v37, 4 }
 0x39c   :  { %v3629_v40 = vsel %vm184_vm5, %v3621_v5, %v3622_v51  ;;  %v3632_v56 = vsel %vm484_vm3, %v9367_v30, %v3631_v42  ;;  %v3395_v51 = vrot.slane %v9388_v36, 4  ;;  %v3625_v59 = vsel %vm184_vm5, %v3617_v11, %v3618_v63  ;;  %v7383_v30 = vld [vmem:[%s10811_s3 + $0x20] sm:$0xff] }
 0x39d   :  { %v9457_v58 = vpop.permute.xlu1 %3016  ;;  %4611 = vmatpush1.bf16.msra.mxu1 %v7397_v21  ;;  %v9459_v19 = vpop.permute.xlu0 %3256  ;;  %v10919_v21 = vld [vmem:[#allocation16_spill] sm:$0xff]  ;;  %5614 = vrot.lane.b32.xlu0 %v7488_v15, %s7751_s11  ;;  %v7449_v46 = vcombine.low %v3795_v2, %v3797_v14  ;;  %v3630_v3 = vsel %vm484_vm3, %v9236_v50, %v3629_v40 }
 0x39e   :  { %4612 = vmatprep.subr.bf16.mxu1 %v7394_v13  ;;  %v3620_v27 = vrot.slane %v10919_v21, 4  ;;  %v7450_v13 = vcombine.high %v3795_v2, %v3797_v14  ;;  %v7446_v28 = vcombine.high %v3630_v3, %v3632_v56  ;;  %v3403_v14 = vsel %vm184_vm5, %v3395_v51, %v3396_v35 }
 0x39f   :  { %4068 = vrot.lane.b32.xlu1 %v4046_v7, %s7752_s12  ;;  %v7385_v7 = vld [vmem:[%s10811_s3 + $0x30] sm:$0xff]  ;;  %v3404_v39 = vsel %vm714_vm0, %v9388_v36, %v3403_v14 }
 0x3a0   :  { %v3627_v45 = vsel %vm184_vm5, %v3619_v48, %v3620_v27  ;;  %v7445_v48 = vcombine.low %v3630_v3, %v3632_v56  ;;  %v3259_v3 = vrot.slane %v9238_v9, 4 }
 0x3a1   :  { %v9481_v1 = vpop.permute.xlu1 %2674  ;;  %4613 = vmatpush1.bf16.msra.mxu1 %v7393_v18  ;;  %v9483_v26 = vpop.permute.xlu0 %3375  ;;  %v3393_v18 = vrot.slane %v9252_v47, 4  ;;  %4933 = vrot.lane.b32.xlu0 %v7488_v15, %s7752_s12  ;;  %v3628_v16 = vsel %vm484_vm3, %v10917_v44, %v3627_v45 }
 0x3a2   :  { %4614 = vmatprep.subr.bf16.mxu1 %v7454_v25  ;;  %v3626_v25 = vsel %vm484_vm3, %v10920_v24, %v3625_v59  ;;  %v3261_v59 = vrot.slane %v9287_v41, 4 }
 0x3a3   :  { %4060 = vrot.lane.b32.xlu1 %v4042_v49, %s7752_s12  ;;  %v3401_v50 = vsel %vm184_vm5, %v3393_v18, %v3394_v52  ;;  %v7442_v49 = vcombine.high %v3626_v25, %v3628_v16  ;;  %v7441_v42 = vcombine.low %v3626_v25, %v3628_v16 }
 0x3a4   :  { %v3402_v21 = vsel %vm714_vm0, %v9252_v47, %v3401_v50 }
 0x3a5   :  { %v9504_v10 = vpop.permute.xlu1 %2790  ;;  %4615 = vmatpush2.bf16.msra.mxu1 %v7453_v57  ;;  %v9511_v17 = vpop.permute.xlu0 %3030  ;;  %5973 = vrot.lane.b32.xlu0 %v7488_v15, %s7754_s14  ;;  %v7438_v27 = vcombine.high %v3402_v21, %v3404_v39  ;;  %v7437_v24 = vcombine.low %v3402_v21, %v3404_v39 }
 0x3a6   :  { %4616 = vmatprep.subr.bf16.mxu1 %v7450_v13 }
 0x3a7   :  { %4194 = vperm.xlu1 %7618, %v7385_v7  }
 0x3a9   :  { %v9519_v5 = vpop.permute.xlu1 %3830  ;;  %4617 = vmatpush2.bf16.msra.mxu1 %v7449_v46  ;;  %v9527_v63 = vpop.permute.xlu0 %3379  ;;  %6086 = vrot.lane.b32.xlu0 %v7488_v15, %s7754_s14  ;;  %v3263_v46 = vrot.slane %v9369_v12, 4 }
 0x3aa   :  { %4618 = vmatprep.subr.bf16.mxu1 %v7446_v28 }
 0x3ab   :  { %4184 = vperm.xlu1 %7618, %v7383_v30   ;;  %v3265_v30 = vrot.slane %v9459_v19, 4 }
 0x3ad   :  { %v3247_v44 = vpop.permute.xlu1 %3246  ;;  %4619 = vmatpush2.bf16.msra.mxu1 %v7445_v48  ;;  %v9535_v36 = vpop.permute.xlu0 %3724  ;;  %6428 = vrot.lane.b32.xlu0 %v9420_v20, %s7753_s13 }
 0x3ae   :  { %4620 = vmatprep.subr.bf16.mxu1 %v7442_v49  ;;  %v3260_v18 = vrot.slane %v3247_v44, 4 }
 0x3af   :  { %5501 = vrot.lane.b32.xlu1 %v7488_v15, %s7751_s11 }
 0x3b0   :  { %v3268_v16 = vsel %vm184_vm5, %v3260_v18, %v3261_v59  ;;  %v3032_v18 = vrot.slane %v9457_v58, 4  ;;  %v3037_v59 = vrot.slane %v9390_v6, 4 }
 0x3b1   :  { %v9533_v2 = vpop.permute.xlu1 %3020  ;;  %4621 = vmatpush2.bf16.msra.mxu1 %v7441_v42  ;;  %v9546_v47 = vpop.permute.xlu0 %3728  ;;  %v3269_v12 = vsel %vm759_vm6, %v3247_v44, %v3268_v16 }
 0x3b2   :  { %4622 = vmatprep.subr.bf16.mxu1 %v7438_v27  ;;  %v3034_v19 = vrot.slane %v9533_v2, 4 }
 0x3b3   :  { %5273 = vrot.lane.b32.xlu1 %v9420_v20, %s7755_s15 }
 0x3b5   :  { %v9540_v11 = vpop.permute.xlu1 %2678  ;;  %4623 = vmatpush2.bf16.msra.mxu1 %v7437_v24  ;;  %v9553_v13 = vpop.permute.xlu0 %2688 }
 0x3b7   :  { %5388 = vrot.lane.b32.xlu1 %v9420_v20, %s7755_s15 }
 0x3b9   :  { %v9548_v57 = vpop.permute.xlu1 %2794  ;;  %v9559_v43 = vpop.permute.xlu0 %3716 }
 0x3bb   :  { %5046 = vrot.lane.b32.xlu1 %v7488_v15, %s7752_s12 }
 0x3bd   :  { %v9551_v40 = vpop.permute.xlu1 %3834  ;;  %v9563_v35 = vpop.permute.xlu0 %3720 }
 0x3bf   :  { %5745 = vrot.lane.b32.xlu1 %v9420_v20, %s7756_s16 }
 0x3c1   :  { %v3251_v7 = vpop.permute.xlu1 %3250  ;;  %v9567_v15 = vpop.permute.xlu0 %3498 }
 0x3c2   :  { %v3262_v51 = vrot.slane %v3251_v7, 4 }
 0x3c3   :  { %5860 = vrot.lane.b32.xlu1 %v9420_v20, %s7756_s16  ;;  %v3258_v20 = vrot.slane %v9437_v8, 4 }
 0x3c4   :  { %v3270_v25 = vsel %vm184_vm5, %v3262_v51, %v3263_v46  ;;  %v3035_v51 = vrot.slane %v9304_v0, 4  ;;  %v2807_v46 = vrot.slane %v9343_v32, 4  ;;  %v3390_v32 = vrot.slane %v9483_v26, 4 }
 0x3c5   :  { %v3025_v52 = vpop.permute.xlu1 %3024  ;;  %v9578_v14 = vpop.permute.xlu0 %3502  ;;  %v3266_v48 = vsel %vm184_vm5, %v3258_v20, %v3259_v3  ;;  %v3271_v49 = vsel %vm759_vm6, %v3251_v7, %v3270_v25  ;;  %v3033_v7 = vrot.slane %v9254_v29, 4  ;;  %v3039_v20 = vrot.slane %v9511_v17, 4 }
 0x3c6   :  { %v3036_v42 = vrot.slane %v3025_v52, 4  ;;  %v3267_v24 = vsel %vm759_vm6, %v9437_v8, %v3266_v48  ;;  %v3042_v8 = vsel %vm184_vm5, %v3034_v19, %v3035_v51  ;;  %v2809_v25 = vrot.slane %v9439_v38, 4 }
 0x3c7   :  { %v7420_v44 = vcombine.high %v3267_v24, %v3269_v12  ;;  %v3040_v29 = vsel %vm184_vm5, %v3032_v18, %v3033_v7  ;;  %v7419_v17 = vcombine.low %v3267_v24, %v3269_v12  ;;  %v3392_v48 = vrot.slane %v9527_v63, 4 }
 0x3c8   :  { %v3044_v0 = vsel %vm184_vm5, %v3036_v42, %v3037_v59  ;;  %v2805_v24 = vrot.slane %v9272_v23, 4  ;;  %v3041_v18 = vsel %vm529_vm4, %v9457_v58, %v3040_v29  ;;  %v2803_v58 = vrot.slane %v9223_v53, 4 }
 0x3c9   :  { %v9561_v37 = vpop.permute.xlu1 %2682  ;;  %v9594_v3 = vpop.permute.xlu0 %3490  ;;  %v3045_v19 = vsel %vm529_vm4, %v3025_v52, %v3044_v0 }
 0x3cd   :  { %v9565_v45 = vpop.permute.xlu1 %2798  ;;  %v9615_v51 = vpop.permute.xlu0 %3494 }
 0x3d1   :  { %v9569_v56 = vpop.permute.xlu1 %3838  ;;  %v9633_v29 = vpop.permute.xlu0 %4066 }
 0x3d5   :  { %v3255_v28 = vpop.permute.xlu1 %3254 }
 0x3d6   :  { %v3264_v50 = vrot.slane %v3255_v28, 4 }
 0x3d8   :  { %v3272_v41 = vsel %vm184_vm5, %v3264_v50, %v3265_v30  ;;  %v2804_v50 = vrot.slane %v9504_v10, 4 }
 0x3d9   :  { %v3273_v9 = vsel %vm759_vm6, %v3255_v28, %v3272_v41  ;;  %v3374_v39 = vpop.permute.xlu1 %3373  ;;  %v2808_v28 = vrot.slane %v9565_v45, 4  ;;  %v2806_v41 = vrot.slane %v9548_v57, 4 }
 0x3da   :  { %v7423_v21 = vcombine.low %v3271_v49, %v3273_v9  ;;  %v7424_v27 = vcombine.high %v3271_v49, %v3273_v9  ;;  %v3389_v16 = vrot.slane %v3374_v39, 4  ;;  %v3043_v9 = vsel %vm529_vm4, %v9533_v2, %v3042_v8 }
 0x3db   :  { %v2816_v38 = vsel %vm184_vm5, %v2808_v28, %v2809_v25  ;;  %v2802_v2 = vrot.slane %v9341_v4, 4  ;;  %v2814_v52 = vsel %vm184_vm5, %v2806_v41, %v2807_v46  ;;  %v7411_v0 = vcombine.low %v3041_v18, %v3043_v9 }
 0x3dc   :  { %4704 = vmatprep.subr.bf16.mxu0 %v7424_v27  ;;  %v3397_v26 = vsel %vm184_vm5, %v3389_v16, %v3390_v32  ;;  %v2817_v7 = vsel %vm356_vm7, %v9565_v45, %v2816_v38  ;;  %v2815_v16 = vsel %vm356_vm7, %v9548_v57, %v2814_v52  ;;  %v2692_v32 = vrot.slane %v9540_v11, 4  ;;  %v10923_v38 = vld [vmem:[#allocation31_spill] sm:$0xff] }
 0x3dd   :  { %v3029_v30 = vpop.permute.xlu1 %3028  ;;  %4705 = vmatpush1.bf16.msra.mxu0 %v7423_v21  ;;  %v2810_v45 = vsel %vm184_vm5, %v2802_v2, %v2803_v58  ;;  %v2693_v41 = vrot.slane %v9324_v22, 4  ;;  %v3846_v52 = vrot.slane %v9551_v40, 4 }
 0x3de   :  { %v3038_v6 = vrot.slane %v3029_v30, 4  ;;  %4706 = vmatprep.subr.bf16.mxu0 %v7420_v44  ;;  %v7412_v44 = vcombine.high %v3041_v18, %v3043_v9  ;;  %v2811_v57 = vsel %vm356_vm7, %v9341_v4, %v2810_v45  ;;  %v2690_v9 = vrot.slane %v9481_v1, 4  ;;  %v10924_v18 = vld [vmem:[#allocation19_spill] sm:$0xff] }
 0x3df   :  { %v2700_v4 = vsel %vm184_vm5, %v2692_v32, %v2693_v41 }
 0x3e0   :  { %v3046_v49 = vsel %vm184_vm5, %v3038_v6, %v3039_v20  ;;  %v3398_v20 = vsel %vm714_vm0, %v3374_v39, %v3397_v26  ;;  %v7638_v39 = vld [vmem:[#allocation2 + $0x28] ss:$16 sps:$4 sm:$0xff]   ;;  %v7408_v6 = vcombine.high %v2815_v16, %v2817_v7 }
 0x3e1   :  { %v3047_v42 = vsel %vm529_vm4, %v3029_v30, %v3046_v49  ;;  %v3378_v21 = vpop.permute.xlu1 %3377  ;;  %4707 = vmatpush1.bf16.msra.mxu0 %v7419_v17  ;;  %v2812_v30 = vsel %vm184_vm5, %v2804_v50, %v2805_v24  ;;  %v2694_v17 = vrot.slane %v9561_v37, 4  ;;  %v7407_v50 = vcombine.low %v2815_v16, %v2817_v7  ;;  %v10925_v7 = vld [vmem:[#allocation17_spill] sm:$0xff] }
 0x3e2   :  { %v7415_v12 = vcombine.low %v3045_v19, %v3047_v42  ;;  %v3391_v27 = vrot.slane %v3378_v21, 4  ;;  %v7416_v63 = vcombine.high %v3045_v19, %v3047_v42  ;;  %v2813_v25 = vsel %vm356_vm7, %v9504_v10, %v2812_v30  ;;  %v9673_v30 = vld [vmem:[%s10810_s2 + $0x4c] ss:$12 sps:$4 sm:$0xff]  }
 0x3e3   :  { %v7426_v10 = vcombine.high %v9203_v31, %v9228_v34  ;;  %v2695_v49 = vrot.slane %v9416_v54, 4  ;;  %v7404_v19 = vcombine.high %v2811_v57, %v2813_v25  ;;  %v2691_v42 = vrot.slane %v10923_v38, 4  ;;  %v9651_v54 = vpop.permute.xlu0 %4070 }
 0x3e4   :  { %v3399_v59 = vsel %vm184_vm5, %v3391_v27, %v3392_v48  ;;  %4708 = vmatprep.subr.bf16.mxu0 %v7416_v63  ;;  %v7640_v48 = vld [vmem:[#allocation2 + $0x24] ss:$16 sps:$4 sm:$0xff]   ;;  %v3848_v27 = vrot.slane %v9569_v56, 4  ;;  %v7403_v22 = vcombine.low %v2811_v57, %v2813_v25  ;;  %v7425_v24 = vcombine.low %v9203_v31, %v9228_v34 }
 0x3e5   :  { %v3400_v23 = vsel %vm714_vm0, %v3378_v21, %v3399_v59  ;;  %v9624_v28 = vpop.permute.xlu1 %3722  ;;  %4709 = vmatpush1.bf16.msra.mxu0 %v7415_v12  ;;  %v2697_v21 = vrot.slane %v9553_v13, 4  ;;  %v2702_v12 = vsel %vm184_vm5, %v2694_v17, %v2695_v49  ;;  %v3849_v13 = vrot.slane %v10924_v18, 4 }
 0x3e6   :  { %v7433_v8 = vcombine.low %v3398_v20, %v3400_v23  ;;  %4710 = vmatprep.subr.bf16.mxu0 %v7412_v44  ;;  %v7434_v46 = vcombine.high %v3398_v20, %v3400_v23  ;;  %v2698_v2 = vsel %vm184_vm5, %v2690_v9, %v2691_v42  ;;  %v9662_v44 = vld [vmem:[%s10810_s2 + $0x30] ss:$12 sps:$4 sm:$0xff]   ;;  %v3847_v20 = vrot.slane %v10925_v7, 4 }
 0x3e7   :  { %v2701_v23 = vsel %vm186_vm2, %v9540_v11, %v2700_v4  ;;  %v2703_v31 = vsel %vm186_vm2, %v9561_v37, %v2702_v12  ;;  %v2699_v11 = vsel %vm186_vm2, %v9481_v1, %v2698_v2  ;;  %v10926_v37 = vld [vmem:[#allocation26_spill] sm:$0xff]  ;;  %v9685_v17 = vpop.permute.xlu0 %4058  ;;  %v3734_v42 = vrot.slane %v9624_v28, 4 }
 0x3e8   :  { %4624 = vmatprep.subr.bf16.mxu1 %v7434_v46  ;;  %v3856_v46 = vsel %vm184_vm5, %v3848_v27, %v3849_v13  ;;  %v3845_v45 = vrot.slane %v10926_v37, 4  ;;  %v7396_v25 = vcombine.high %v2699_v11, %v2701_v23  ;;  %v10927_v1 = vld [vmem:[#allocation22_spill] sm:$0xff]  ;;  %v3735_v12 = vrot.slane %v9535_v36, 4 }
 0x3e9   :  { %v9635_v53 = vpop.permute.xlu1 %3714  ;;  %4625 = vmatpush2.bf16.msra.mxu1 %v7433_v8  ;;  %4711 = vmatpush1.bf16.msra.mxu0 %v7411_v0  ;;  %v3844_v8 = vrot.slane %v9519_v5, 4  ;;  %v3857_v32 = vsel %vm1401_vm9, %v9569_v56, %v3856_v46  ;;  %v9698_v56 = vld [vmem:[%s10810_s2 + $0x48] ss:$12 sps:$4 sm:$0xff]   ;;  %v3733_v27 = vrot.slane %v9563_v35, 4  ;;  %v10928_v18 = vmov 0  }
 0x3ea   :  { %4626 = vmatprep.subr.bf16.mxu1 %v7638_v39  ;;  %4712 = vmatprep.subr.bf16.mxu0 %v7408_v6  ;;  %v3842_v39 = vrot.slane %v9414_v62, 4  ;;  %v3854_v6 = vsel %vm184_vm5, %v3846_v52, %v3847_v20  ;;  %v3742_v13 = vsel %vm184_vm5, %v3734_v42, %v3735_v12  ;;  %v3511_v37 = vrot.slane %v9578_v14, 4 }
 0x3eb   :  { %v3855_v41 = vsel %vm1401_vm9, %v9551_v40, %v3854_v6  ;;  %v9707_v4 = vpop.permute.xlu0 %4062  ;;  %v3505_v6 = vrot.slane %v9594_v3, 4 }
 0x3ec   :  { %v7456_v9 = vcombine.high %v3855_v41, %v3857_v32 }
 0x3ed   :  { %v2687_v26 = vpop.permute.xlu1 %2686  ;;  %4627 = vmatpush2.bf16.msra.mxu1 %v7640_v48  ;;  %4713 = vmatpush1.bf16.msra.mxu0 %v7407_v50  ;;  %v3843_v50 = vrot.slane %v10927_v1, 4  ;;  %v3852_v48 = vsel %vm184_vm5, %v3844_v8, %v3845_v45 }
 0x3ee   :  { %v2696_v63 = vrot.slane %v2687_v26, 4  ;;  %4628 = vmatprep.subr.bf16.mxu1 %v7426_v10  ;;  %4714 = vmatprep.subr.bf16.mxu0 %v7404_v19  ;;  %v7395_v10 = vcombine.low %v2699_v11, %v2701_v23  ;;  %v3853_v19 = vsel %vm1401_vm9, %v9519_v5, %v3852_v48  ;;  %v3507_v11 = vrot.slane %v9615_v51, 4 }
 0x3ef   :  { %v3850_v49 = vsel %vm184_vm5, %v3842_v39, %v3843_v50  ;;  %v9718_v52 = vpop.permute.xlu0 %4199 }
 0x3f0   :  { %v2704_v59 = vsel %vm184_vm5, %v2696_v63, %v2697_v21  ;;  %v3851_v40 = vsel %vm1401_vm9, %v9414_v62, %v3850_v49  ;;  %v3730_v63 = vrot.slane %v9635_v53, 4  ;;  %v3731_v62 = vrot.slane %v9559_v43, 4 }
 0x3f1   :  { %v2705_v34 = vsel %vm186_vm2, %v2687_v26, %v2704_v59  ;;  %v3719_v58 = vpop.permute.xlu1 %3718  ;;  %4629 = vmatpush2.bf16.msra.mxu1 %v7425_v24  ;;  %4715 = vmatpush1.bf16.msra.mxu0 %v7403_v22  ;;  %v7455_v26 = vcombine.low %v3855_v41, %v3857_v32  ;;  %v7452_v5 = vcombine.high %v3851_v40, %v3853_v19  ;;  %v3737_v22 = vrot.slane %v9546_v47, 4  ;;  %v6261_v41 = vld [vmem:[#allocation2 + $0xc] sm:$0xf] }
 0x3f2   :  { %v7399_v0 = vcombine.low %v2703_v31, %v2705_v34  ;;  %v7400_v16 = vcombine.high %v2703_v31, %v2705_v34  ;;  %v3732_v21 = vrot.slane %v3719_v58, 4  ;;  %v7451_v35 = vcombine.low %v3851_v40, %v3853_v19 }
 0x3f3   :  { %v3738_v59 = vsel %vm184_vm5, %v3730_v63, %v3731_v62  ;;  %v3743_v47 = vsel %vm484_vm3, %v9624_v28, %v3742_v13  ;;  %v9733_v45 = vpop.permute.xlu0 %4189 }
 0x3f4   :  { %4631 = vmatmul.mubr.bf16.vlgmr.msra.gmra.mxu1 %v9662_v44  ;;  %4716 = vmatprep.subr.bf16.mxu0 %v7400_v16  ;;  %v3740_v2 = vsel %vm184_vm5, %v3732_v21, %v3733_v27  ;;  %v3509_v16 = vrot.slane %v9567_v15, 4  ;;  %v6263_v21 = vld [vmem:[#allocation2 + $0x1c] sm:$0xf] }
 0x3f5   :  { %v9687_v57 = vpop.permute.xlu1 %3496  ;;  %4717 = vmatpush1.bf16.msra.mxu0 %v7399_v0  ;;  %4640 = vmatprep.mubr.bf16.mxu1 %v9673_v30  ;;  %v3741_v20 = vsel %vm484_vm3, %v3719_v58, %v3740_v2  ;;  %v3739_v0 = vsel %vm484_vm3, %v9635_v53, %v3738_v59 }
 0x3f6   :  { %4718 = vmatprep.subr.bf16.mxu0 %v7396_v25  ;;  %v3508_v31 = vrot.slane %v9687_v57, 4  ;;  %v7444_v58 = vcombine.high %v3739_v0, %v3741_v20  ;;  %v7443_v15 = vcombine.low %v3739_v0, %v3741_v20 }
 0x3f8   :  { %v3516_v25 = vsel %vm184_vm5, %v3508_v31, %v3509_v16 }
 0x3f9   :  { %v9702_v38 = vpop.permute.xlu1 %3488  ;;  %4719 = vmatpush1.bf16.msra.mxu0 %v7395_v10  ;;  %v3517_v14 = vsel %vm714_vm0, %v9687_v57, %v3516_v25  ;;  %v5929_v25 = vld [vmem:[#allocation2 + $0x3c] sm:$0xf] }
 0x3fa   :  { %4720 = vmatprep.subr.bf16.mxu0 %v7456_v9  ;;  %v3504_v28 = vrot.slane %v9702_v38, 4 }
 0x3fc   :  { %4641 = vmatmul.mubr.bf16.gmra.mxu1 %v9698_v56  ;;  %v3512_v51 = vsel %vm184_vm5, %v3504_v28, %v3505_v6 }
 0x3fd   :  { %v3727_v24 = vpop.permute.xlu1 %3726  ;;  %4721 = vmatpush2.bf16.msra.mxu0 %v7455_v26  ;;  %4789 = vmatprep.mubr.bf16.mxu1 %v10928_v18  ;;  %v3513_v42 = vsel %vm714_vm0, %v9702_v38, %v3512_v51  ;;  %v7676_v51 = vld [vmem:[%s10810_s2 + $0x50] ss:$12 sps:$4 sm:$0xff]  }
 0x3fe   :  { %v3736_v36 = vrot.slane %v3727_v24, 4  ;;  %4722 = vmatprep.subr.bf16.mxu0 %v7452_v5  ;;  %v4077_v5 = vrot.slane %v9633_v29, 4  ;;  %v4073_v29 = vrot.slane %v9685_v17, 4 }
 0x400   :  { %v3744_v7 = vsel %vm184_vm5, %v3736_v36, %v3737_v22  ;;  %v7432_v22 = vcombine.high %v9402_v55, %v9446_v61  ;;  %v7431_v36 = vcombine.low %v9402_v55, %v9446_v61 }
 0x401   :  { %v3745_v43 = vsel %vm484_vm3, %v3727_v24, %v3744_v7  ;;  %v3493_v23 = vpop.permute.xlu1 %3492  ;;  %4723 = vmatpush2.bf16.msra.mxu0 %v7451_v35  ;;  %v4079_v24 = vrot.slane %v9651_v54, 4  ;;  %v6153_v35 = vld [vmem:[#allocation2 + $0x2c] sm:$0xf]  ;;  %v7428_v7 = vcombine.high %v9425_v33, %v9354_v60  ;;  %v4075_v54 = vrot.slane %v9707_v4, 4  ;;  %v6155_v4 = vld [vmem:[#allocation2 + $0x3c] sm:$0xf] }
 0x402   :  { %v7447_v34 = vcombine.low %v3743_v47, %v3745_v43  ;;  %v3506_v8 = vrot.slane %v3493_v23, 4  ;;  %v7448_v46 = vcombine.high %v3743_v47, %v3745_v43 }
 0x404   :  { %4724 = vmatprep.subr.bf16.mxu0 %v7448_v46  ;;  %v3514_v53 = vsel %vm184_vm5, %v3506_v8, %v3507_v11 }
 0x405   :  { %v3501_v39 = vpop.permute.xlu1 %3500  ;;  %4725 = vmatpush2.bf16.msra.mxu0 %v7447_v34  ;;  %v3515_v50 = vsel %vm714_vm0, %v3493_v23, %v3514_v53  ;;  %v9744_v3 = vpop.permute.xlu0 %6313  ;;  %v7427_v34 = vcombine.low %v9425_v33, %v9354_v60  ;;  %v6151_v33 = vld [vmem:[#allocation2 + $0x1c] sm:$0xf] }
 0x406   :  { %v3510_v32 = vrot.slane %v3501_v39, 4  ;;  %4726 = vmatprep.subr.bf16.mxu0 %v7444_v58  ;;  %v9747_v19 = vrot.slane %v9744_v3, 4  ;;  %v7436_v57 = vcombine.high %v3513_v42, %v3515_v50  ;;  %v7435_v63 = vcombine.low %v3513_v42, %v3515_v50  ;;  %v6149_v58 = vld [vmem:[#allocation2 + $0xc] sm:$0xf] }
 0x408   :  { %v3518_v1 = vsel %vm184_vm5, %v3510_v32, %v3511_v37  ;;  %v6320_v40 = vmul.bf16 %v9747_v19, %v6261_v41  ;;  %v6322_v27 = vmul.bf16 %v9747_v19, %v6263_v21  ;;  %v5927_v37 = vld [vmem:[#allocation2 + $0x2c] sm:$0xf] }
 0x409   :  { %v3519_v48 = vsel %vm714_vm0, %v3501_v39, %v3518_v1  ;;  %v4065_v10 = vpop.permute.xlu1 %4064  ;;  %4727 = vmatpush2.bf16.msra.mxu0 %v7443_v15  ;;  %v7675_v39 = vld [vmem:[%s10810_s2 + $0x38] ss:$12 sps:$4 sm:$0xff]   ;;  %v5923_v15 = vld [vmem:[#allocation2 + $0xc] sm:$0xf] }
 0x40a   :  { %v7439_v49 = vcombine.low %v3517_v14, %v3519_v48  ;;  %v7440_v9 = vcombine.high %v3517_v14, %v3519_v48  ;;  %v4076_v12 = vrot.slane %v4065_v10, 4  ;;  %6337 = vrot.lane.b32.xlu0 %v6320_v40, %s7752_s12  ;;  %v5925_v14 = vld [vmem:[#allocation2 + $0x1c] sm:$0xf]  ;;  %v6209_v41 = vld [vmem:[#allocation2 + $0x6c] sm:$0xf] }
 0x40b   :  { %v5697_v21 = vld [vmem:[#allocation2 + $0x2c] sm:$0xf] }
 0x40c   :  { %4728 = vmatprep.subr.bf16.mxu0 %v7440_v9  ;;  %v4084_v62 = vsel %vm184_vm5, %v4076_v12, %v4077_v5  ;;  %v6211_v9 = vld [vmem:[#allocation2 + $0x7c] sm:$0xf] }
 0x40d   :  { %v4057_v26 = vpop.permute.xlu1 %4056  ;;  %4729 = vmatpush2.bf16.msra.mxu0 %v7439_v49  ;;  %v4085_v47 = vsel %vm140_vm1, %v4065_v10, %v4084_v62  ;;  %v5699_v12 = vld [vmem:[#allocation2 + $0x3c] sm:$0xf] }
 0x40e   :  { %4730 = vmatprep.subr.bf16.mxu0 %v7436_v57  ;;  %v4072_v13 = vrot.slane %v4057_v26, 4  ;;  %6341 = vrot.lane.b32.xlu0 %v6322_v27, %s7752_s12  ;;  %v6267_v5 = vld [vmem:[#allocation2 + $0x3c] sm:$0xf] }
 0x40f   :  { %v9769_v23 = vpop.permute.xlu0 %5614 }
 0x410   :  { %v4080_v55 = vsel %vm184_vm5, %v4072_v13, %v4073_v29 }
 0x411   :  { %v4069_v38 = vpop.permute.xlu1 %4068  ;;  %4731 = vmatpush2.bf16.msra.mxu0 %v7435_v63  ;;  %v4081_v46 = vsel %vm140_vm1, %v4057_v26, %v4080_v55  ;;  %v6265_v26 = vld [vmem:[#allocation2 + $0x2c] sm:$0xf] }
 0x412   :  { %v4078_v2 = vrot.slane %v4069_v38, 4  ;;  %4732 = vmatprep.subr.bf16.mxu0 %v7432_v22  ;;  %6174 = vrot.lane.b32.xlu0 %v6153_v35, %s7758_s18  ;;  %v6324_v27 = vmul.bf16 %v9747_v19, %v6265_v26  ;;  %v6326_v22 = vmul.bf16 %v9747_v19, %v6267_v5 }
 0x413   :  { %v9779_v28 = vpop.permute.xlu0 %4933 }
 0x414   :  { %v4086_v59 = vsel %vm184_vm5, %v4078_v2, %v4079_v24  ;;  %6345 = vrot.lane.b32.xlu1 %v6324_v27, %s7752_s12  ;;  %v6207_v24 = vld [vmem:[#allocation2 + $0x5c] sm:$0xf] }
 0x415   :  { %v4087_v20 = vsel %vm140_vm1, %v4069_v38, %v4086_v59  ;;  %v4061_v43 = vpop.permute.xlu1 %4060  ;;  %4733 = vmatpush2.bf16.msra.mxu0 %v7431_v36  ;;  %v6205_v38 = vld [vmem:[#allocation2 + $0x4c] sm:$0xf] }
 0x416   :  { %v7463_v61 = vcombine.low %v4085_v47, %v4087_v20  ;;  %v4074_v31 = vrot.slane %v4061_v43, 4  ;;  %4734 = vmatprep.subr.bf16.mxu0 %v7428_v7  ;;  %v7464_v17 = vcombine.high %v4085_v47, %v4087_v20  ;;  %6178 = vrot.lane.b32.xlu0 %v6155_v4, %s7758_s18 }
 0x417   :  { %v9784_v60 = vpop.permute.xlu0 %5973 }
 0x418   :  { %v4082_v8 = vsel %vm184_vm5, %v4074_v31, %v4075_v54  ;;  %4769 = vmatprep.subr.bf16.mxu1 %v7464_v17  ;;  %v9791_v6 = vrot.slane %v9784_v60, 4  ;;  %6349 = vrot.lane.b32.xlu1 %v6326_v22, %s7752_s12 }
 0x419   :  { %v4083_v0 = vsel %vm140_vm1, %v4061_v43, %v4082_v8  ;;  %4735 = vmatpush2.bf16.msra.mxu0 %v7427_v34  ;;  %4770 = vmatpush1.bf16.msra.mxu1 %v7463_v61 }
 0x41a   :  { %v7459_v16 = vcombine.low %v4081_v46, %v4083_v0  ;;  %v7460_v11 = vcombine.high %v4081_v46, %v4083_v0  ;;  %6166 = vrot.lane.b32.xlu0 %v6149_v58, %s7758_s18  ;;  %v5986_v32 = vmul.bf16 %v9791_v6, %v5929_v25  ;;  %v5982_v48 = vmul.bf16 %v9791_v6, %v5925_v14 }
 0x41c   :  { %4737 = vmatmul.mubr.bf16.vlgmr.msra.gmra.mxu0 %v9662_v44  ;;  %4771 = vmatprep.subr.bf16.mxu1 %v7460_v11 }
 0x41d   :  { %4772 = vmatpush1.bf16.msra.mxu1 %v7459_v16  ;;  %4746 = vmatprep.mubr.bf16.mxu0 %v9673_v30  ;;  %v5984_v30 = vmul.bf16 %v9791_v6, %v5927_v37 }
 0x41e   :  { %6170 = vrot.lane.b32.xlu0 %v6151_v33, %s7758_s18 }
 0x420   :  { %7467 = vmatmul.mubr.msk.bf16.vlgmr.msra.gmra.mxu1 %vm2197_vm8, %v7675_v39 }
 0x421   :  { %4799 = vmatprep.mubr.bf16.mxu1 %v10928_v18 }
 0x422   :  { %v9794_v44 = vpop.permute.xlu1 %4194  ;;  %6005 = vrot.lane.b32.xlu0 %v5984_v30, %s7755_s15 }
 0x424   :  { %4747 = vmatmul.mubr.bf16.gmra.mxu0 %v9698_v56  ;;  %v5980_v56 = vmul.bf16 %v9791_v6, %v5923_v15 }
 0x425   :  { %7075 = vmatprep.mubr.bf16.mxu0 %v10928_v18 }
 0x426   :  { %v9800_v53 = vpop.permute.xlu1 %4184  ;;  %6009 = vrot.lane.b32.xlu0 %v5986_v32, %s7755_s15 }
 0x428   :  { %7468 = vmatmul.mubr.msk.bf16.gmra.mxu1 %vm2197_vm8, %v7676_v51 }
 0x42a   :  { %v9808_v1 = vpop.permute.xlu1 %5501  ;;  %5997 = vrot.lane.b32.xlu0 %v5980_v56, %s7755_s15 }
 0x42b   :  { %v9851_v14 = vrot.slane %v9808_v1, 4 }
 0x42c   :  { %v4685_v62 = vpop.f32.mrf.mxu0 }
 0x42e   :  { %v9812_v50 = vpop.permute.xlu1 %5273  ;;  %6001 = vrot.lane.b32.xlu0 %v5982_v48, %s7755_s15  ;;  %v4687_v13 = vpop.f32.mrf.mxu0 }
 0x430   :  { %v4689_v2 = vpop.f32.mrf.mxu0 }
 0x432   :  { %v9816_v10 = vpop.permute.xlu1 %5388  ;;  %6230 = vrot.lane.b32.xlu0 %v6209_v41, %s7758_s18  ;;  %v4691_v35 = vpop.f32.mrf.mxu0 }
 0x435   :  { %v4695_v7 = vpop.f32.mrf.mxu0 }
 0x436   :  { %v9819_v49 = vpop.permute.xlu1 %5046  ;;  %6234 = vrot.lane.b32.xlu0 %v6211_v9, %s7758_s18 }
 0x437   :  { %v4697_v31 = vpop.f32.mrf.mxu0 }
 0x439   :  { %v4699_v33 = vpop.f32.mrf.mxu0 }
 0x43a   :  { %v9822_v42 = vpop.permute.xlu1 %5745 }
 0x43b   :  { %v9826_v57 = vrot.slane %v9822_v42, 4  ;;  %v4701_v41 = vpop.f32.mrf.mxu0 }
 0x43d   :  { %v5756_v40 = vmul.bf16 %v9826_v57, %v5697_v21  ;;  %v5758_v63 = vmul.bf16 %v9826_v57, %v5699_v12  ;;  %v9865_v5 = vsel %vm759_vm6, %v9826_v57, %v9822_v42 }
 0x43f   :  { %5777 = vrot.lane.b32.xlu0 %v5756_v40, %s7751_s11 }
 0x443   :  { %5781 = vrot.lane.b32.xlu0 %v5758_v63, %s7751_s11  ;;  %v9860_v63 = vsel %vm714_vm0, %v9851_v14, %v9808_v1  ;;  %v9873_v1 = vsel %vm529_vm4, %v9791_v6, %v9784_v60 }
 0x447   :  { %6222 = vrot.lane.b32.xlu0 %v6205_v38, %s7758_s18 }
 0x44b   :  { %6226 = vrot.lane.b32.xlu0 %v6207_v24, %s7758_s18 }
 0x4b4   :  { %v4632_v36 = vpop.f32.mrf.mxu1 }
 0x4b5   :  { %v4633_v29 = vadd.f32 %v4632_v36, %v9800_v53 }
 0x4b6   :  { %v4634_v59 = vpop.f32.mrf.mxu1 }
 0x4b7   :  { %v4686_v54 = vadd.f32 %v4685_v62, %v4633_v29  ;;  %v4635_v47 = vadd.f32 %v4634_v59, %v9800_v53 }
 0x4b8   :  { %v4636_v20 = vpop.f32.mrf.mxu1 }
 0x4b9   :  { %v4688_v43 = vadd.f32 %v4687_v13, %v4635_v47  ;;  %v4637_v55 = vadd.f32 %v4636_v20, %v9733_v45  ;;  %v4810_v17 = vmax.f32 %v4686_v54, 0.0  ;;  %v9876_v13 = vrot.slane %v9812_v50, 4 }
 0x4ba   :  { %v4638_v61 = vpop.f32.mrf.mxu1 }
 0x4bb   :  { %v4811_v34 = vmax.f32 %v4688_v43, 0.0  ;;  %v4690_v4 = vadd.f32 %v4689_v2, %v4637_v55  ;;  %v4639_v8 = vadd.f32 %v4638_v61, %v9733_v45  ;;  %v9907_v61 = vsel %vm186_vm2, %v9747_v19, %v9744_v3 }
 0x4bc   :  { %v4642_v46 = vpop.f32.mrf.mxu1 }
 0x4bd   :  { %v9842_v0 = vpack.c.bf16 %v4811_v34, %v4810_v17  ;;  %v4692_v16 = vadd.f32 %v4691_v35, %v4639_v8  ;;  %v4643_v11 = vadd.f32 %v4642_v46, %v9794_v44  ;;  %v4814_v37 = vmax.f32 %v4690_v4, 0.0  ;;  %v9912_v34 = vpop.permute.xlu0 %6086 }
 0x4be   :  { %v4644_v58 = vpop.f32.mrf.mxu1  ;;  %v9917_v4 = vsel %vm484_vm3, %v9876_v13, %v9812_v50 }
 0x4bf   :  { %4854 = vst [vmem:[#allocation2 + $0x4] sm:$0xff] %v9842_v0  ;;  %v4815_v39 = vmax.f32 %v4692_v16, 0.0  ;;  %v4645_v30 = vadd.f32 %v4644_v58, %v9794_v44  ;;  %v4696_v25 = vadd.f32 %v4695_v7, %v4643_v11  ;;  %v9894_v7 = vrot.slane %v9779_v28, 4 }
 0x4c0   :  { %v4646_v32 = vpop.f32.mrf.mxu1 }
 0x4c1   :  { %v9847_v15 = vpack.c.bf16 %v4815_v39, %v4814_v37  ;;  %v4647_v51 = vadd.f32 %v4646_v32, %v9718_v52  ;;  %v4698_v56 = vadd.f32 %v4697_v31, %v4645_v30  ;;  %v4818_v9 = vmax.f32 %v4696_v25, 0.0  ;;  %v9922_v3 = vpop.permute.xlu0 %6428 }
 0x4c2   :  { %v4648_v48 = vpop.f32.mrf.mxu1  ;;  %v6319_v31 = vmul.bf16 %v9842_v0, %v9907_v61  ;;  %v9927_v19 = vsel %vm140_vm1, %v9894_v7, %v9779_v28  ;;  %v5979_v39 = vmul.bf16 %v9842_v0, %v9873_v1 }
 0x4c3   :  { %4855 = vst [vmem:[#allocation2 + $0x14] sm:$0xff] %v9847_v15  ;;  %v4819_v21 = vmax.f32 %v4698_v56, 0.0  ;;  %v4649_v40 = vadd.f32 %v4648_v48, %v9718_v52  ;;  %v4700_v26 = vadd.f32 %v4699_v33, %v4647_v51 }
 0x4c5   :  { %v9855_v12 = vpack.c.bf16 %v4819_v21, %v4818_v9  ;;  %v4702_v27 = vadd.f32 %v4701_v41, %v4649_v40  ;;  %v4822_v24 = vmax.f32 %v4700_v26, 0.0  ;;  %v9936_v58 = vpop.permute.xlu0 %6337 }
 0x4c6   :  { %v5108_v22 = vld [vmem:[#allocation2] sm:$0xff]  ;;  %v5109_v38 = vld [vmem:[#allocation2 + $0x8] sm:$0xf] }
 0x4c7   :  { %4856 = vst [vmem:[#allocation2 + $0x24] sm:$0xff] %v9855_v12  ;;  %v4823_v62 = vmax.f32 %v4702_v27, 0.0  ;;  %5124 = vrot.lane.b32.xlu1 %v5108_v22, %s7757_s17  ;;  %5126 = vrot.lane.b32.xlu0 %v5109_v38, %s7757_s17  ;;  %v5507_v2 = vmul.bf16 %v9860_v63, %v5108_v22  ;;  %v5983_v36 = vmul.bf16 %v9855_v12, %v9873_v1  ;;  %v5451_v29 = vld [vmem:[#allocation2 + $0x8] sm:$0xf] }
 0x4c8   :  { %v5755_v35 = vmul.bf16 %v9855_v12, %v9865_v5  ;;  %v5221_v59 = vld [vmem:[#allocation2 + $0x8] sm:$0xf]  ;;  %v5508_v54 = vmul.bf16 %v9851_v14, %v5451_v29  ;;  %v5279_v8 = vmul.bf16 %v9917_v4, %v5108_v22  ;;  %v4939_v50 = vmul.bf16 %v5108_v22, %v9927_v19 }
 0x4c9   :  { %v9878_v42 = vpack.c.bf16 %v4823_v62, %v4822_v24  ;;  %v9891_v6 = vld [vmem:[#allocation2 + $0x4] sm:$0xff]  ;;  %v5280_v47 = vmul.bf16 %v9876_v13, %v5221_v59  ;;  %v9946_v51 = vpop.permute.xlu0 %6341 }
 0x4ca   :  { %v9889_v60 = vld [vmem:[#allocation2 + $0x14] sm:$0xff]  ;;  %v4883_v43 = vld [vmem:[#allocation2 + $0x8] sm:$0xf] }
 0x4cb   :  { %4857 = vst [vmem:[#allocation2 + $0x34] sm:$0xff] %v9878_v42  ;;  %6164 = vrot.lane.b32.xlu1 %v9842_v0, %s7758_s18  ;;  %5523 = vrot.lane.b32.xlu0 %v5507_v2, %s7756_s16  ;;  %v4940_v17 = vmul.bf16 %v9894_v7, %v4883_v43  ;;  %v5111_v46 = vld [vmem:[#allocation2 + $0x18] sm:$0xf]  ;;  %v9929_v16 = vld [vmem:[#allocation2 + $0x10] sm:$0xff] }
 0x4cc   :  { %v5509_v11 = vmul.bf16 %v9860_v63, %v9929_v16  ;;  %v5223_v33 = vld [vmem:[#allocation2 + $0x18] sm:$0xf] }
 0x4cd   :  { %v5282_v37 = vmul.bf16 %v9876_v13, %v5223_v33  ;;  %v4885_v25 = vld [vmem:[#allocation2 + $0x18] sm:$0xf] }
 0x4ce   :  { %v4942_v21 = vmul.bf16 %v9894_v7, %v4885_v25  ;;  %v9955_v29 = vld [vmem:[#allocation2 + $0x20] sm:$0xff]  ;;  %v5453_v59 = vld [vmem:[#allocation2 + $0x18] sm:$0xf] }
 0x4cf   :  { %5525 = vrot.lane.b32.xlu1 %v5508_v54, %s7756_s16  ;;  %5297 = vrot.lane.b32.xlu0 %v5280_v47, %s7754_s14  ;;  %v9957_v54 = vpop.permute.xlu0 %6174  ;;  %v5510_v33 = vmul.bf16 %v9851_v14, %v5453_v59  ;;  %v5283_v59 = vmul.bf16 %v9955_v29, %v9917_v4 }
 0x4d3   :  { %6335 = vrot.lane.b32.xlu1 %v6319_v31, %s7752_s12  ;;  %4957 = vrot.lane.b32.xlu0 %v4940_v17, %s7753_s13  ;;  %v5113_v31 = vld [vmem:[#allocation2 + $0x28] sm:$0xf] }
 0x4d7   :  { %5295 = vrot.lane.b32.xlu1 %v5279_v8, %s7754_s14  ;;  %5130 = vrot.lane.b32.xlu0 %v5111_v46, %s7757_s17 }
 0x4db   :  { %4955 = vrot.lane.b32.xlu1 %v4939_v50, %s7753_s13  ;;  %5527 = vrot.lane.b32.xlu0 %v5509_v11, %s7756_s16  ;;  %v5511_v11 = vmul.bf16 %v9860_v63, %v9955_v29 }
 0x4dc   :  { %v4738_v28 = vpop.f32.mrf.mxu0 }
 0x4dd   :  { %v4739_v32 = vadd.f32 %v4738_v28, %v9800_v53 }
 0x4de   :  { %v4740_v30 = vpop.f32.mrf.mxu0 }
 0x4df   :  { %5301 = vrot.lane.b32.xlu0 %v5282_v37, %s7754_s14  ;;  %5995 = vrot.lane.b32.xlu1 %v5979_v39, %s7755_s15  ;;  %v4741_v41 = vadd.f32 %v4740_v30, %v9800_v53 }
 0x4e0   :  { %v4742_v56 = vpop.f32.mrf.mxu0  ;;  %v4791_v48 = vpop.f32.mrf.mxu1 }
 0x4e1   :  { %v4792_v9 = vadd.f32 %v4791_v48, %v4739_v32  ;;  %v4743_v0 = vadd.f32 %v4742_v56, %v9733_v45 }
 0x4e2   :  { %v4744_v40 = vpop.f32.mrf.mxu0  ;;  %v4793_v26 = vpop.f32.mrf.mxu1 }
 0x4e3   :  { %v4794_v27 = vadd.f32 %v4793_v26, %v4741_v41  ;;  %4961 = vrot.lane.b32.xlu0 %v4942_v21, %s7753_s13  ;;  %5128 = vrot.lane.b32.xlu1 %v9929_v16, %s7757_s17  ;;  %v4812_v24 = vmax.f32 %v4792_v9, 0.0  ;;  %v4745_v62 = vadd.f32 %v4744_v40, %v9733_v45  ;;  %v9975_v9 = vpop.permute.xlu0 %6178  ;;  %v6323_v40 = vmul.bf16 %v9855_v12, %v9907_v61 }
 0x4e4   :  { %v4748_v22 = vpop.f32.mrf.mxu0  ;;  %v4795_v38 = vpop.f32.mrf.mxu1 }
 0x4e5   :  { %v4813_v2 = vmax.f32 %v4794_v27, 0.0  ;;  %v4796_v53 = vadd.f32 %v4795_v38, %v4743_v0  ;;  %v4749_v8 = vadd.f32 %v4748_v22, %v9794_v44 }
 0x4e6   :  { %v4750_v47 = vpop.f32.mrf.mxu0  ;;  %v4797_v43 = vpop.f32.mrf.mxu1 }
 0x4e7   :  { %v9959_v17 = vpack.c.bf16 %v4813_v2, %v4812_v24  ;;  %v4798_v46 = vadd.f32 %v4797_v43, %v4745_v62  ;;  %5134 = vrot.lane.b32.xlu0 %v5113_v31, %s7757_s17  ;;  %6168 = vrot.lane.b32.xlu1 %v9847_v15, %s7758_s18  ;;  %v4816_v28 = vmax.f32 %v4796_v53, 0.0  ;;  %v4751_v37 = vadd.f32 %v4750_v47, %v9794_v44  ;;  %v9992_v47 = vpop.permute.xlu0 %6166  ;;  %v4887_v43 = vld [vmem:[#allocation2 + $0x28] sm:$0xf] }
 0x4e8   :  { %v4752_v45 = vpop.f32.mrf.mxu0  ;;  %v4801_v50 = vpop.f32.mrf.mxu1  ;;  %v6321_v44 = vmul.bf16 %v9847_v15, %v9907_v61 }
 0x4e9   :  { %4878 = vst [vmem:[#allocation2 + $0x44] sm:$0xff] %v9959_v17  ;;  %v4817_v39 = vmax.f32 %v4798_v46, 0.0  ;;  %v4802_v30 = vadd.f32 %v4801_v50, %v4749_v8  ;;  %v4753_v48 = vadd.f32 %v4752_v45, %v9718_v52  ;;  %v4944_v8 = vmul.bf16 %v9894_v7, %v4887_v43 }
 0x4ea   :  { %v4754_v25 = vpop.f32.mrf.mxu0  ;;  %v4803_v32 = vpop.f32.mrf.mxu1  ;;  %v4941_v46 = vmul.bf16 %v9929_v16, %v9927_v19  ;;  %v10064_v43 = vrot.slane %v9816_v10, 4 }
 0x4eb   :  { %v9970_v56 = vpack.c.bf16 %v4817_v39, %v4816_v28  ;;  %v4804_v41 = vadd.f32 %v4803_v32, %v4751_v37  ;;  %5531 = vrot.lane.b32.xlu0 %v5511_v11, %s7756_s16  ;;  %5529 = vrot.lane.b32.xlu1 %v5510_v33, %s7756_s16  ;;  %v4820_v26 = vmax.f32 %v4802_v30, 0.0  ;;  %v4755_v0 = vadd.f32 %v4754_v25, %v9718_v52  ;;  %v10008_v11 = vpop.permute.xlu0 %6170  ;;  %v10016_v39 = vld [vmem:[#allocation2 + $0x30] sm:$0xff]  ;;  %v6042_v28 = vld [vmem:[#allocation2 + $0x7c] sm:$0xf] }
 0x4ec   :  { %v4805_v21 = vpop.f32.mrf.mxu1  ;;  %v5281_v52 = vmul.bf16 %v9929_v16, %v9917_v4  ;;  %v5981_v37 = vmul.bf16 %v9847_v15, %v9873_v1  ;;  %v5115_v16 = vld [vmem:[#allocation2 + $0x38] sm:$0xf]  ;;  %v5513_v30 = vmul.bf16 %v9860_v63, %v10016_v39  ;;  %v6325_v63 = vmul.bf16 %v9878_v42, %v9907_v61 }
 0x4ed   :  { %4879 = vst [vmem:[#allocation2 + $0x54] sm:$0xff] %v9970_v56  ;;  %v4821_v27 = vmax.f32 %v4804_v41, 0.0  ;;  %v4806_v22 = vadd.f32 %v4805_v21, %v4753_v48  ;;  %v5455_v21 = vld [vmem:[#allocation2 + $0x28] sm:$0xf] }
 0x4ee   :  { %v4807_v38 = vpop.f32.mrf.mxu1 }
 0x4ef   :  { %v9983_v24 = vpack.c.bf16 %v4821_v27, %v4820_v26  ;;  %v4808_v62 = vadd.f32 %v4807_v38, %v4755_v0  ;;  %6343 = vrot.lane.b32.xlu0 %v6323_v40, %s7752_s12  ;;  %6339 = vrot.lane.b32.xlu1 %v6321_v44, %s7752_s12  ;;  %v4824_v2 = vmax.f32 %v4806_v22, 0.0  ;;  %v10022_v25 = vpop.permute.xlu0 %6005  ;;  %v5285_v44 = vmul.bf16 %v10016_v39, %v9917_v4  ;;  %v4889_v0 = vld [vmem:[#allocation2 + $0x38] sm:$0xf]  ;;  %v5225_v27 = vld [vmem:[#allocation2 + $0x28] sm:$0xf] }
 0x4f0   :  { %v10004_v50 = vld [vmem:[#allocation2 + $0x44] sm:$0xff]  ;;  %10929 = vst [vmem:[#allocation30_spill] sm:$0xff] %v10022_v25  ;;  %v5512_v26 = vmul.bf16 %v9851_v14, %v5455_v21  ;;  %v4946_v61 = vmul.bf16 %v9894_v7, %v4889_v0  ;;  %v5284_v22 = vmul.bf16 %v9876_v13, %v5225_v27  ;;  %v4943_v4 = vmul.bf16 %v9955_v29, %v9927_v19  ;;  %v5457_v21 = vld [vmem:[#allocation2 + $0x38] sm:$0xf] }
 0x4f1   :  { %4880 = vst [vmem:[#allocation2 + $0x64] sm:$0xff] %v9983_v24  ;;  %v4825_v53 = vmax.f32 %v4808_v62, 0.0  ;;  %v5165_v62 = vld [vmem:[#allocation2 + $0x48] sm:$0xf]  ;;  %v5227_v0 = vld [vmem:[#allocation2 + $0x38] sm:$0xf] }
 0x4f3   :  { %v9994_v31 = vpack.c.bf16 %v4825_v53, %v4824_v2  ;;  %5303 = vrot.lane.b32.xlu0 %v5283_v59, %s7754_s14  ;;  %5299 = vrot.lane.b32.xlu1 %v5281_v52, %s7754_s14  ;;  %v10040_v40 = vpop.permute.xlu0 %6009  ;;  %v5564_v2 = vld [vmem:[#allocation2 + $0x48] sm:$0xf]  ;;  %v10056_v53 = vrot.slane %v9769_v23, 4 }
 0x4f4   :  { %v10002_v45 = vld [vmem:[#allocation2 + $0x54] sm:$0xff]  ;;  %10931 = vst [vmem:[#allocation28_spill] sm:$0xff] %v10040_v40  ;;  %v5336_v52 = vld [vmem:[#allocation2 + $0x48] sm:$0xf]  ;;  %v6382_v40 = vld [vmem:[#allocation2 + $0x7c] sm:$0xf] }
 0x4f5   :  { %4881 = vst [vmem:[#allocation2 + $0x74] sm:$0xff] %v9994_v31  ;;  %v5621_v59 = vmul.bf16 %v10056_v53, %v5564_v2  ;;  %v10106_v2 = vpop.permute.xlu1 %5860 }
 0x4f7   :  { %4965 = vrot.lane.b32.xlu0 %v4944_v8, %s7753_s13  ;;  %4959 = vrot.lane.b32.xlu1 %v4941_v46, %s7753_s13  ;;  %v10049_v38 = vpop.permute.xlu0 %5997  ;;  %v4996_v46 = vld [vmem:[#allocation2 + $0x48] sm:$0xf] }
 0x4f8   :  { %v10026_v48 = vld [vmem:[#allocation2 + $0x64] sm:$0xff]  ;;  %10932 = vst [vmem:[#allocation23_spill] sm:$0xff] %v10049_v38 }
 0x4fb   :  { %5138 = vrot.lane.b32.xlu0 %v5115_v16, %s7757_s17  ;;  %5999 = vrot.lane.b32.xlu1 %v5981_v37, %s7755_s15  ;;  %v10060_v7 = vpop.permute.xlu0 %6001  ;;  %v10075_v37 = vrot.slane %v9819_v49, 4 }
 0x4fc   :  { %v10024_v32 = vld [vmem:[#allocation2 + $0x74] sm:$0xff]  ;;  %10933 = vst [vmem:[#allocation21_spill] sm:$0xff] %v10060_v7 }
 0x4fd   :  { %10930 = vst [vmem:[#allocation18_spill] sm:$0xff] %v10024_v32  ;;  %v5053_v16 = vmul.bf16 %v10075_v37, %v4996_v46  ;;  %v10112_v46 = vpop.permute.xlu1 %6345  ;;  %v5002_v41 = vld [vmem:[#allocation2 + $0x78] sm:$0xf] }
 0x4ff   :  { %5535 = vrot.lane.b32.xlu0 %v5513_v30, %s7756_s16  ;;  %5132 = vrot.lane.b32.xlu1 %v9955_v29, %s7757_s17  ;;  %v5395_v29 = vmul.bf16 %v10064_v43, %v5336_v52  ;;  %v10072_v8 = vpop.permute.xlu0 %6230  ;;  %v5167_v30 = vld [vmem:[#allocation2 + $0x58] sm:$0xf]  ;;  %v5164_v52 = vld [vmem:[#allocation2 + $0x40] sm:$0xff] }
 0x500   :  { %10934 = vst [vmem:[#allocation14_spill] sm:$0xff] %v10072_v8  ;;  %v6036_v8 = vld [vmem:[#allocation2 + $0x4c] sm:$0xf] }
 0x503   :  { %6347 = vrot.lane.b32.xlu0 %v6325_v63, %s7752_s12  ;;  %6172 = vrot.lane.b32.xlu1 %v9855_v12, %s7758_s18  ;;  %v5566_v63 = vld [vmem:[#allocation2 + $0x58] sm:$0xf] }
 0x504   :  { %v5623_v12 = vmul.bf16 %v10056_v53, %v5566_v63  ;;  %v10123_v63 = vpop.permute.xlu1 %6349 }
 0x507   :  { %5307 = vrot.lane.b32.xlu0 %v5285_v44, %s7754_s14  ;;  %5533 = vrot.lane.b32.xlu1 %v5512_v26, %s7756_s16  ;;  %v5338_v26 = vld [vmem:[#allocation2 + $0x58] sm:$0xf] }
 0x508   :  { %v5397_v27 = vmul.bf16 %v10064_v43, %v5338_v26 }
 0x50b   :  { %4969 = vrot.lane.b32.xlu0 %v4946_v61, %s7753_s13  ;;  %5305 = vrot.lane.b32.xlu1 %v5284_v22, %s7754_s14  ;;  %v5286_v61 = vmul.bf16 %v9876_v13, %v5227_v0  ;;  %v4998_v22 = vld [vmem:[#allocation2 + $0x58] sm:$0xf]  ;;  %v5169_v13 = vld [vmem:[#allocation2 + $0x68] sm:$0xf] }
 0x50f   :  { %5182 = vrot.lane.b32.xlu0 %v5165_v62, %s7757_s17  ;;  %4963 = vrot.lane.b32.xlu1 %v4943_v4, %s7753_s13  ;;  %v4945_v62 = vmul.bf16 %v10016_v39, %v9927_v19  ;;  %v5985_v19 = vmul.bf16 %v9878_v42, %v9873_v1 }
 0x513   :  { %5638 = vrot.lane.b32.xlu0 %v5621_v59, %s7756_s16  ;;  %6003 = vrot.lane.b32.xlu1 %v5983_v36, %s7755_s15  ;;  %v10086_v36 = vpop.permute.xlu0 %6234 }
 0x514   :  { %10935 = vst [vmem:[#allocation15_spill] sm:$0xff] %v10086_v36 }
 0x517   :  { %5412 = vrot.lane.b32.xlu0 %v5395_v29, %s7754_s14  ;;  %5775 = vrot.lane.b32.xlu1 %v5755_v35, %s7751_s11  ;;  %v5514_v35 = vmul.bf16 %v9851_v14, %v5457_v21  ;;  %v10093_v44 = vpop.permute.xlu0 %5777  ;;  %v5055_v14 = vmul.bf16 %v10075_v37, %v4998_v22  ;;  %v5568_v29 = vld [vmem:[#allocation2 + $0x68] sm:$0xf] }
 0x518   :  { %10936 = vst [vmem:[#allocation20_spill] sm:$0xff] %v10093_v44  ;;  %v6038_v44 = vld [vmem:[#allocation2 + $0x5c] sm:$0xf] }
 0x51b   :  { %5070 = vrot.lane.b32.xlu0 %v5053_v16, %s7753_s13  ;;  %5136 = vrot.lane.b32.xlu1 %v10016_v39, %s7757_s17  ;;  %v10101_v4 = vpop.permute.xlu0 %5781  ;;  %v5625_v16 = vmul.bf16 %v10056_v53, %v5568_v29  ;;  %v5340_v39 = vld [vmem:[#allocation2 + $0x68] sm:$0xf] }
 0x51c   :  { %10937 = vst [vmem:[#allocation29_spill] sm:$0xff] %v10101_v4  ;;  %v5399_v21 = vmul.bf16 %v10064_v43, %v5340_v39  ;;  %v5693_v39 = vld [vmem:[#allocation2 + $0xc] sm:$0xf] }
 0x51f   :  { %5186 = vrot.lane.b32.xlu0 %v5167_v30, %s7757_s17  ;;  %6176 = vrot.lane.b32.xlu1 %v9878_v42, %s7758_s18  ;;  %v10110_v59 = vpop.permute.xlu0 %6222 }
 0x520   :  { %10938 = vst [vmem:[#allocation13_spill] sm:$0xff] %v10110_v59 }
 0x523   :  { %5642 = vrot.lane.b32.xlu0 %v5623_v12, %s7756_s16  ;;  %5537 = vrot.lane.b32.xlu1 %v5514_v35, %s7756_s16  ;;  %v10121_v30 = vpop.permute.xlu0 %6226  ;;  %v5757_v12 = vmul.bf16 %v9878_v42, %v9865_v5  ;;  %v5000_v35 = vld [vmem:[#allocation2 + $0x68] sm:$0xf]  ;;  %v10141_v42 = vsel %vm714_vm0, %v10056_v53, %v9769_v23 }
 0x524   :  { %10939 = vst [vmem:[#allocation16_spill] sm:$0xff] %v10121_v30  ;;  %v5057_v0 = vmul.bf16 %v10075_v37, %v5000_v35  ;;  %v5620_v22 = vmul.bf16 %v10141_v42, %v5164_v52 }
 0x527   :  { %5416 = vrot.lane.b32.xlu0 %v5397_v27, %s7754_s14  ;;  %5309 = vrot.lane.b32.xlu1 %v5286_v61, %s7754_s14 }
 0x52b   :  { %5074 = vrot.lane.b32.xlu0 %v5055_v14, %s7753_s13  ;;  %4967 = vrot.lane.b32.xlu1 %v4945_v62, %s7753_s13  ;;  %v5171_v14 = vld [vmem:[#allocation2 + $0x78] sm:$0xf] }
 0x52c   :  { %v5570_v62 = vld [vmem:[#allocation2 + $0x78] sm:$0xf] }
 0x52f   :  { %5190 = vrot.lane.b32.xlu0 %v5169_v13, %s7757_s17  ;;  %5180 = vrot.lane.b32.xlu1 %v5164_v52, %s7757_s17  ;;  %v10153_v13 = vsel %vm484_vm3, %v10064_v43, %v9816_v10 }
 0x533   :  { %5646 = vrot.lane.b32.xlu0 %v5625_v16, %s7756_s16  ;;  %6007 = vrot.lane.b32.xlu1 %v5985_v19, %s7755_s15  ;;  %v5394_v16 = vmul.bf16 %v10153_v13, %v5164_v52  ;;  %v5627_v19 = vmul.bf16 %v10056_v53, %v5570_v62  ;;  %v5166_v62 = vld [vmem:[#allocation2 + $0x50] sm:$0xff] }
 0x534   :  { %v5622_v33 = vmul.bf16 %v10141_v42, %v5166_v62  ;;  %v5396_v15 = vmul.bf16 %v10153_v13, %v5166_v62 }
 0x537   :  { %5420 = vrot.lane.b32.xlu0 %v5399_v21, %s7754_s14  ;;  %5779 = vrot.lane.b32.xlu1 %v5757_v12, %s7751_s11  ;;  %v10164_v21 = vsel %vm140_vm1, %v10075_v37, %v9819_v49 }
 0x538   :  { %v5052_v35 = vmul.bf16 %v5164_v52, %v10164_v21 }
 0x539   :  { %v10130_v1 = vpop.permute.xlu1 %5124  ;;  %v10132_v26 = vpop.permute.xlu0 %5126 }
 0x53b   :  { %5078 = vrot.lane.b32.xlu0 %v5057_v0, %s7753_s13  ;;  %6220 = vrot.lane.b32.xlu1 %v9959_v17, %s7758_s18  ;;  %v5752_v0 = vmul.bf16 %v9826_v57, %v5693_v39 }
 0x53d   :  { %v10143_v27 = vpop.permute.xlu1 %6164  ;;  %v10145_v61 = vpop.permute.xlu0 %5523 }
 0x53f   :  { %5194 = vrot.lane.b32.xlu0 %v5171_v14, %s7757_s17  ;;  %5636 = vrot.lane.b32.xlu1 %v5620_v22, %s7756_s16  ;;  %v5342_v22 = vld [vmem:[#allocation2 + $0x78] sm:$0xf] }
 0x540   :  { %v5401_v49 = vmul.bf16 %v10064_v43, %v5342_v22 }
 0x541   :  { %v5526_v29 = vpop.permute.xlu1 %5525  ;;  %v10155_v23 = vpop.permute.xlu0 %5297 }
 0x542   :  { %v5540_v55 = vrot.slane %v5526_v29, 4 }
 0x543   :  { %5410 = vrot.lane.b32.xlu1 %v5394_v16, %s7754_s14  ;;  %5650 = vrot.lane.b32.xlu0 %v5627_v19, %s7756_s16  ;;  %v5695_v16 = vld [vmem:[#allocation2 + $0x1c] sm:$0xf] }
 0x544   :  { %v5754_v39 = vmul.bf16 %v9826_v57, %v5695_v16 }
 0x545   :  { %v10166_v12 = vpop.permute.xlu1 %6335  ;;  %v10168_v10 = vpop.permute.xlu0 %4957 }
 0x546   :  { %v4972_v38 = vrot.slane %v10168_v10, 4 }
 0x547   :  { %5068 = vrot.lane.b32.xlu1 %v5052_v35, %s7753_s13  ;;  %5769 = vrot.lane.b32.xlu0 %v5752_v0, %s7751_s11  ;;  %v6040_v35 = vld [vmem:[#allocation2 + $0x6c] sm:$0xf]  ;;  %v10185_v0 = vrot.slane %v9912_v34, 4 }
 0x549   :  { %v10174_v53 = vpop.permute.xlu1 %5295  ;;  %v10176_v14 = vpop.permute.xlu0 %5130 }
 0x54b   :  { %5184 = vrot.lane.b32.xlu1 %v5166_v62, %s7757_s17  ;;  %5424 = vrot.lane.b32.xlu0 %v5401_v49, %s7754_s14  ;;  %v6097_v49 = vmul.bf16 %v10185_v0, %v6040_v35 }
 0x54d   :  { %v10181_v52 = vpop.permute.xlu1 %4955  ;;  %v5528_v19 = vpop.permute.xlu0 %5527 }
 0x54e   :  { %v5541_v59 = vrot.slane %v5528_v19, 4 }
 0x54f   :  { %6224 = vrot.lane.b32.xlu1 %v9970_v56, %s7758_s18  ;;  %5773 = vrot.lane.b32.xlu0 %v5754_v39, %s7751_s11  ;;  %v6099_v39 = vmul.bf16 %v10185_v0, %v6042_v28  ;;  %v5539_v28 = vrot.slane %v10145_v61, 4 }
 0x551   :  { %v10190_v43 = vpop.permute.xlu1 %5995  ;;  %v5302_v22 = vpop.permute.xlu0 %5301  ;;  %v5547_v30 = vsel %vm184_vm5, %v5539_v28, %v5540_v55  ;;  %v5814_v28 = vld [vmem:[#allocation2 + $0x7c] sm:$0xf] }
 0x552   :  { %10940 = vst [vmem:[#allocation27_spill] sm:$0xff] %v10190_v43  ;;  %v5314_v43 = vrot.slane %v5302_v22, 4 }
 0x553   :  { %5640 = vrot.lane.b32.xlu1 %v5622_v33, %s7756_s16  ;;  %6118 = vrot.lane.b32.xlu0 %v6097_v49, %s7755_s15  ;;  %v5054_v33 = vmul.bf16 %v5166_v62, %v10164_v21  ;;  %v5059_v49 = vmul.bf16 %v10075_v37, %v5002_v41  ;;  %v5168_v62 = vld [vmem:[#allocation2 + $0x60] sm:$0xff] }
 0x554   :  { %v5398_v10 = vmul.bf16 %v10153_v13, %v5168_v62 }
 0x555   :  { %v10196_v57 = vpop.permute.xlu1 %5128  ;;  %v10198_v16 = vpop.permute.xlu0 %4961 }
 0x557   :  { %5414 = vrot.lane.b32.xlu1 %v5396_v15, %s7754_s14  ;;  %6122 = vrot.lane.b32.xlu0 %v6099_v39, %s7755_s15  ;;  %v6093_v39 = vmul.bf16 %v10185_v0, %v6036_v8  ;;  %v10227_v8 = vsel %vm759_vm6, %v10145_v61, %v5547_v30  ;;  %v4971_v30 = vrot.slane %v10181_v52, 4 }
 0x559   :  { %v10204_v20 = vpop.permute.xlu1 %6168  ;;  %v10206_v35 = vpop.permute.xlu0 %5134 }
 0x55b   :  { %5072 = vrot.lane.b32.xlu1 %v5054_v33, %s7753_s13  ;;  %5082 = vrot.lane.b32.xlu0 %v5059_v49, %s7753_s13  ;;  %v6095_v33 = vmul.bf16 %v10185_v0, %v6038_v44  ;;  %v5812_v49 = vld [vmem:[#allocation2 + $0x6c] sm:$0xf]  ;;  %v5312_v44 = vrot.slane %v10155_v23, 4 }
 0x55d   :  { %v5530_v36 = vpop.permute.xlu1 %5529  ;;  %v10213_v15 = vpop.permute.xlu0 %5531 }
 0x55e   :  { %v5542_v4 = vrot.slane %v5530_v36, 4  ;;  %v5311_v36 = vrot.slane %v10174_v53, 4 }
 0x55f   :  { %5188 = vrot.lane.b32.xlu1 %v5168_v62, %s7757_s17  ;;  %6110 = vrot.lane.b32.xlu0 %v6093_v39, %s7755_s15  ;;  %v5624_v39 = vmul.bf16 %v10141_v42, %v5168_v62 }
 0x560   :  { %v5549_v41 = vsel %vm184_vm5, %v5541_v59, %v5542_v4  ;;  %v10238_v59 = vrot.slane %v10106_v2, 4  ;;  %v5319_v4 = vsel %vm184_vm5, %v5311_v36, %v5312_v44 }
 0x561   :  { %v10220_v37 = vpop.permute.xlu1 %6339  ;;  %v10222_v29 = vpop.permute.xlu0 %6343  ;;  %v10230_v55 = vsel %vm759_vm6, %v5528_v19, %v5549_v41  ;;  %v10257_v25 = vsel %vm529_vm4, %v10174_v53, %v5319_v4 }
 0x562   :  { %v5871_v41 = vmul.bf16 %v10238_v59, %v5812_v49  ;;  %v4979_v49 = vsel %vm184_vm5, %v4971_v30, %v4972_v38 }
 0x563   :  { %6228 = vrot.lane.b32.xlu1 %v9983_v24, %s7758_s18  ;;  %6114 = vrot.lane.b32.xlu0 %v6095_v33, %s7755_s15  ;;  %v5873_v33 = vmul.bf16 %v10238_v59, %v5814_v28  ;;  %v5808_v28 = vld [vmem:[#allocation2 + $0x4c] sm:$0xf]  ;;  %v10276_v4 = vsel %vm186_vm2, %v10181_v52, %v4979_v49 }
 0x564   :  { %10941 = vst [vmem:[#allocation24_spill] sm:$0xff] %v10276_v4 }
 0x565   :  { %v5300_v61 = vpop.permute.xlu1 %5299  ;;  %v10245_v19 = vpop.permute.xlu0 %5303 }
 0x566   :  { %v5313_v7 = vrot.slane %v5300_v61, 4 }
 0x567   :  { %5644 = vrot.lane.b32.xlu1 %v5624_v39, %s7756_s16  ;;  %5892 = vrot.lane.b32.xlu0 %v5871_v41, %s7751_s11  ;;  %v4974_v39 = vrot.slane %v10198_v16, 4  ;;  %v5056_v41 = vmul.bf16 %v5168_v62, %v10164_v21  ;;  %v6353_v62 = vrot.slane %v10220_v37, 4 }
 0x568   :  { %v5321_v23 = vsel %vm184_vm5, %v5313_v7, %v5314_v43 }
 0x569   :  { %v10261_v36 = vsel %vm529_vm4, %v5300_v61, %v5321_v23  ;;  %v4960_v22 = vpop.permute.xlu1 %4959  ;;  %v10263_v44 = vpop.permute.xlu0 %4965  ;;  %v5867_v23 = vmul.bf16 %v10238_v59, %v5808_v28  ;;  %v10300_v28 = vld [vmem:[#allocation2 + $0x70] sm:$0xff] }
 0x56a   :  { %v4973_v43 = vrot.slane %v4960_v22, 4 }
 0x56b   :  { %5418 = vrot.lane.b32.xlu1 %v5398_v10, %s7754_s14  ;;  %5896 = vrot.lane.b32.xlu0 %v5873_v33, %s7751_s11  ;;  %v5810_v10 = vld [vmem:[#allocation2 + $0x5c] sm:$0xf]  ;;  %v10303_v33 = vrot.slane %v9922_v3, 4 }
 0x56c   :  { %v4981_v38 = vsel %vm184_vm5, %v4973_v43, %v4974_v39  ;;  %v6355_v43 = vrot.slane %v10222_v29, 4  ;;  %v6352_v39 = vrot.slane %v9936_v58, 4 }
 0x56d   :  { %v10279_v16 = vsel %vm186_vm2, %v4960_v22, %v4981_v38  ;;  %v10281_v30 = vpop.permute.xlu1 %5999  ;;  %v10283_v61 = vpop.permute.xlu0 %5138  ;;  %v5869_v22 = vmul.bf16 %v10238_v59, %v5810_v10  ;;  %v6380_v38 = vld [vmem:[#allocation2 + $0x6c] sm:$0xf]  ;;  %v6351_v10 = vrot.slane %v10166_v12, 4 }
 0x56e   :  { %10942 = vst [vmem:[#allocation25_spill] sm:$0xff] %v10279_v16  ;;  %10943 = vst [vmem:[#allocation31_spill] sm:$0xff] %v10281_v30  ;;  %v6439_v30 = vmul.bf16 %v10303_v33, %v6380_v38  ;;  %v6358_v16 = vrot.slane %v10123_v63, 4 }
 0x56f   :  { %5076 = vrot.lane.b32.xlu1 %v5056_v41, %s7753_s13  ;;  %5884 = vrot.lane.b32.xlu0 %v5867_v23, %s7751_s11  ;;  %v6354_v41 = vrot.slane %v9946_v51, 4  ;;  %v6356_v23 = vrot.slane %v10112_v46, 4  ;;  %v6359_v58 = vsel %vm184_vm5, %v6351_v10, %v6352_v39  ;;  %v6441_v46 = vmul.bf16 %v10303_v33, %v6382_v40  ;;  %v6376_v10 = vld [vmem:[#allocation2 + $0x4c] sm:$0xf] }
 0x571   :  { %v10293_v52 = vpop.permute.xlu1 %5132  ;;  %v10295_v49 = vpop.permute.xlu0 %5535  ;;  %v6361_v4 = vsel %vm184_vm5, %v6353_v62, %v6354_v41 }
 0x572   :  { %v6362_v38 = vsel %vm140_vm1, %v10220_v37, %v6361_v4  ;;  %v6378_v4 = vld [vmem:[#allocation2 + $0x5c] sm:$0xf] }
 0x573   :  { %5192 = vrot.lane.b32.xlu1 %v10300_v28, %s7757_s17  ;;  %5888 = vrot.lane.b32.xlu0 %v5869_v22, %s7751_s11  ;;  %v6363_v22 = vsel %vm184_vm5, %v6355_v43, %v6356_v23 }
 0x574   :  { %v6364_v63 = vsel %vm140_vm1, %v10222_v29, %v6363_v22 }
 0x575   :  { %v10312_v7 = vpop.permute.xlu1 %6172  ;;  %v6348_v53 = vpop.permute.xlu0 %6347 }
 0x576   :  { %v6357_v32 = vrot.slane %v6348_v53, 4 }
 0x577   :  { %6232 = vrot.lane.b32.xlu1 %v9994_v31, %s7758_s18  ;;  %6460 = vrot.lane.b32.xlu0 %v6439_v30, %s7752_s12  ;;  %v5626_v30 = vmul.bf16 %v10141_v42, %v10300_v28  ;;  %v5751_v42 = vmul.bf16 %v9865_v5, %v9891_v6 }
 0x578   :  { %v6365_v51 = vsel %vm184_vm5, %v6357_v32, %v6358_v16  ;;  %v6360_v32 = vsel %vm140_vm1, %v10166_v12, %v6359_v58  ;;  %v10346_v12 = vld [vmem:[#allocation7 + $0x8] ss:$12 sps:$4 sm:$0xff]  }
 0x579   :  { %v6366_v62 = vsel %vm140_vm1, %v6348_v53, %v6365_v51  ;;  %v5534_v43 = vpop.permute.xlu1 %5533  ;;  %v10329_v41 = vpop.permute.xlu0 %5307  ;;  %v7572_v40 = vcombine.high %v6360_v32, %v6362_v38  ;;  %v6435_v53 = vmul.bf16 %v10303_v33, %v6376_v10  ;;  %v7571_v16 = vcombine.low %v6360_v32, %v6362_v38  ;;  %v6571_v38 = vld [vmem:[%s10813_s5 + $0x8] sm:$0xff] }
 0x57a   :  { %v7575_v23 = vcombine.low %v6364_v63, %v6366_v62  ;;  %v7576_v39 = vcombine.high %v6364_v63, %v6366_v62  ;;  %v5400_v51 = vmul.bf16 %v10153_v13, %v10300_v28  ;;  %v5753_v13 = vmul.bf16 %v9865_v5, %v9889_v60 }
 0x57b   :  { %5648 = vrot.lane.b32.xlu1 %v5626_v30, %s7756_s16  ;;  %6464 = vrot.lane.b32.xlu0 %v6441_v46, %s7752_s12  ;;  %v6437_v46 = vmul.bf16 %v10303_v33, %v6378_v4  ;;  %v10373_v30 = vsel %vm529_vm4, %v10185_v0, %v9912_v34  ;;  %v5544_v4 = vrot.slane %v5534_v43, 4 }
 0x57c   :  { %7055 = vmatprep.subr.bf16.mxu0 %v7576_v39  ;;  %v6096_v5 = vmul.bf16 %v9983_v24, %v10373_v30  ;;  %v6092_v34 = vmul.bf16 %v9959_v17, %v10373_v30 }
 0x57d   :  { %v10337_v37 = vpop.permute.xlu1 %5305  ;;  %7056 = vmatpush1.bf16.msra.mxu0 %v7575_v23  ;;  %v10339_v29 = vpop.permute.xlu0 %4969  ;;  %v6573_v23 = vld [vmem:[%s10813_s5 + $0x18] sm:$0xff] }
 0x57e   :  { %7057 = vmatprep.subr.bf16.mxu0 %v7572_v40  ;;  %v7662_v40 = vld [vmem:[#allocation7 + $0x4] ss:$12 sps:$4 sm:$0xff]  }
 0x57f   :  { %5767 = vrot.lane.b32.xlu1 %v5751_v42, %s7751_s11  ;;  %6452 = vrot.lane.b32.xlu0 %v6435_v53, %s7752_s12  ;;  %v5058_v53 = vmul.bf16 %v10300_v28, %v10164_v21  ;;  %v10408_v21 = vsel %vm759_vm6, %v10238_v59, %v10106_v2  ;;  %v5316_v28 = vrot.slane %v10337_v37, 4 }
 0x580   :  { %7022 = vmatprep.mubr.bf16.mxu1 %v7662_v40 }
 0x581   :  { %v10348_v22 = vpop.permute.xlu1 %4963  ;;  %7058 = vmatpush1.bf16.msra.mxu0 %v7571_v16  ;;  %v10350_v58 = vpop.permute.xlu0 %5182  ;;  %v5543_v16 = vrot.slane %v10213_v15, 4 }
 0x583   :  { %5422 = vrot.lane.b32.xlu1 %v5400_v51, %s7754_s14  ;;  %6456 = vrot.lane.b32.xlu0 %v6437_v46, %s7752_s12 }
 0x584   :  { %7579 = vmatmul.mubr.msk.bf16.vlgmr.msra.gmra.mxu0 %vm2197_vm8, %v10346_v12 }
 0x585   :  { %v10362_v63 = vpop.permute.xlu1 %6003  ;;  %v10364_v62 = vpop.permute.xlu0 %5638  ;;  %7085 = vmatprep.mubr.bf16.mxu0 %v10928_v18 }
 0x587   :  { %5771 = vrot.lane.b32.xlu1 %v5753_v13, %s7751_s11  ;;  %6581 = vperm.xlu0 %7617, %v6571_v38   ;;  %v6094_v38 = vmul.bf16 %v9970_v56, %v10373_v30  ;;  %v5545_v13 = vrot.slane %v10295_v49, 4  ;;  %v5870_v56 = vmul.bf16 %v9983_v24, %v10408_v21 }
 0x589   :  { %v10378_v39 = vpop.permute.xlu1 %5775  ;;  %v10380_v10 = vpop.permute.xlu0 %5412 }
 0x58b   :  { %6116 = vrot.lane.b32.xlu1 %v6096_v5, %s7755_s15  ;;  %6591 = vperm.xlu0 %7617, %v6573_v23   ;;  %v5551_v23 = vsel %vm184_vm5, %v5543_v16, %v5544_v4 }
 0x58c   :  { %v5552_v4 = vsel %vm759_vm6, %v10213_v15, %v5551_v23 }
 0x58d   :  { %v10385_v32 = vpop.permute.xlu1 %5136  ;;  %v10389_v0 = vpop.permute.xlu0 %5070 }
 0x58f   :  { %6108 = vrot.lane.b32.xlu1 %v6092_v34, %s7755_s15  ;;  %v5315_v34 = vrot.slane %v10245_v19, 4 }
 0x591   :  { %v10392_v42 = vpop.permute.xlu1 %6176  ;;  %v10398_v51 = vpop.permute.xlu0 %5186 }
 0x593   :  { %5080 = vrot.lane.b32.xlu1 %v5058_v53, %s7753_s13 }
 0x595   :  { %v5538_v46 = vpop.permute.xlu1 %5537  ;;  %v10420_v2 = vpop.permute.xlu0 %5642 }
 0x596   :  { %v5546_v5 = vrot.slane %v5538_v46, 4  ;;  %v5317_v46 = vrot.slane %v10329_v41, 4 }
 0x597   :  { %6112 = vrot.lane.b32.xlu1 %v6094_v38, %s7755_s15 }
 0x598   :  { %v5553_v43 = vsel %vm184_vm5, %v5545_v13, %v5546_v5  ;;  %v10422_v13 = vld [vmem:[#allocation7 + $0x20] ss:$12 sps:$4 sm:$0xff]   ;;  %v5323_v5 = vsel %vm184_vm5, %v5315_v34, %v5316_v28  ;;  %v10944_v28 = vcombine.high %v10227_v8, %v10230_v55 }
 0x599   :  { %v5310_v53 = vpop.permute.xlu1 %5309  ;;  %v5554_v16 = vsel %vm759_vm6, %v10295_v49, %v5553_v43  ;;  %7580 = vmatmul.mubr.msk.bf16.gmra.mxu0 %vm2197_vm8, %v10422_v13  ;;  %v5866_v49 = vmul.bf16 %v9959_v17, %v10408_v21  ;;  %v5146_v43 = vrot.slane %v10385_v32, 4  ;;  %v5324_v34 = vsel %vm529_vm4, %v10245_v19, %v5323_v5  ;;  %v10442_v17 = vpop.permute.xlu0 %5416 }
 0x59a   :  { %v5318_v59 = vrot.slane %v5310_v53, 4  ;;  %v7535_v37 = vcombine.low %v5552_v4, %v5554_v16  ;;  %v7536_v38 = vcombine.high %v5552_v4, %v5554_v16  ;;  %7128 = vmatprep.mubr.bf16.mxu0 %v7662_v40  ;;  %v5147_v53 = vrot.slane %v10283_v61, 4 }
 0x59b   :  { %5890 = vrot.lane.b32.xlu1 %v5870_v56, %s7751_s11  ;;  %v5144_v56 = vrot.slane %v10293_v52, 4  ;;  %v10945_v16 = vcombine.low %v10227_v8, %v10230_v55  ;;  %v5197_v19 = vrot.slane %v10350_v58, 4  ;;  %v5143_v8 = vrot.slane %v10176_v14, 4 }
 0x59c   :  { %v5325_v24 = vsel %vm184_vm5, %v5317_v46, %v5318_v59  ;;  %6990 = vmatprep.subr.bf16.mxu1 %v7536_v38  ;;  %v6098_v46 = vmul.bf16 %v9994_v31, %v10373_v30  ;;  %v5145_v59 = vrot.slane %v10206_v35, 4  ;;  %v5154_v61 = vsel %vm184_vm5, %v5146_v43, %v5147_v53 }
 0x59d   :  { %v4968_v15 = vpop.permute.xlu1 %4967  ;;  %6991 = vmatpush1.bf16.msra.mxu1 %v7535_v37  ;;  %v5326_v23 = vsel %vm529_vm4, %v10329_v41, %v5325_v24  ;;  %v5142_v41 = vrot.slane %v10196_v57, 4  ;;  %v5140_v38 = vrot.slane %v10130_v1, 4  ;;  %v5141_v24 = vrot.slane %v10132_v26, 4  ;;  %v10469_v14 = vpop.permute.xlu0 %5074 }
 0x59e   :  { %6992 = vmatprep.subr.bf16.mxu1 %v10944_v28  ;;  %v7528_v4 = vcombine.high %v5324_v34, %v5326_v23  ;;  %v7527_v5 = vcombine.low %v5324_v34, %v5326_v23  ;;  %v5152_v55 = vsel %vm184_vm5, %v5144_v56, %v5145_v59  ;;  %v5155_v35 = vsel %vm356_vm7, %v10385_v32, %v5154_v61 }
 0x59f   :  { %5882 = vrot.lane.b32.xlu1 %v5866_v49, %s7751_s11  ;;  %v5868_v23 = vmul.bf16 %v10408_v21, %v10002_v45  ;;  %v5150_v26 = vsel %vm184_vm5, %v5142_v41, %v5143_v8  ;;  %v4977_v43 = vrot.slane %v4968_v15, 4  ;;  %v10946_v28 = vcombine.high %v10257_v25, %v10261_v36 }
 0x5a0   :  { %v5153_v32 = vsel %vm356_vm7, %v10293_v52, %v5152_v55  ;;  %v5148_v34 = vsel %vm184_vm5, %v5140_v38, %v5141_v24  ;;  %v4978_v53 = vrot.slane %v10339_v29, 4  ;;  %v4975_v56 = vrot.slane %v10348_v22, 4 }
 0x5a1   :  { %v5181_v40 = vpop.permute.xlu1 %5180  ;;  %6993 = vmatpush1.bf16.msra.mxu1 %v10945_v16  ;;  %v5151_v41 = vsel %vm356_vm7, %v10196_v57, %v5150_v26  ;;  %v10947_v16 = vcombine.low %v10257_v25, %v10261_v36  ;;  %v5872_v52 = vmul.bf16 %v9994_v31, %v10408_v21  ;;  %v5149_v29 = vsel %vm356_vm7, %v10130_v1, %v5148_v34  ;;  %v10498_v36 = vpop.permute.xlu0 %5190 }
 0x5a2   :  { %v5196_v37 = vrot.slane %v5181_v40, 4  ;;  %6994 = vmatprep.subr.bf16.mxu1 %v7528_v4  ;;  %v7520_v4 = vcombine.high %v5153_v32, %v5155_v35  ;;  %v4985_v59 = vsel %vm184_vm5, %v4977_v43, %v4978_v53  ;;  %v6431_v57 = vsel %vm186_vm2, %v10303_v33, %v9922_v3 }
 0x5a3   :  { %6120 = vrot.lane.b32.xlu1 %v6098_v46, %s7755_s15  ;;  %v4976_v46 = vrot.slane %v10263_v44, 4  ;;  %v7516_v31 = vcombine.high %v5149_v29, %v5151_v41  ;;  %v4986_v44 = vsel %vm186_vm2, %v4968_v15, %v4985_v59  ;;  %v6438_v61 = vmul.bf16 %v6431_v57, %v10026_v48 }
 0x5a4   :  { %v5204_v30 = vsel %vm184_vm5, %v5196_v37, %v5197_v19  ;;  %v7519_v19 = vcombine.low %v5153_v32, %v5155_v35  ;;  %v6186_v1 = vrot.slane %v10392_v42, 4  ;;  %v7515_v37 = vcombine.low %v5149_v29, %v5151_v41  ;;  %v10948_v32 = vld [vmem:[#allocation18_spill] sm:$0xff] }
 0x5a5   :  { %v10462_v58 = vsel %vm356_vm7, %v5181_v40, %v5204_v30  ;;  %v10464_v49 = vpop.permute.xlu1 %6007  ;;  %6995 = vmatpush1.bf16.msra.mxu1 %v7527_v5  ;;  %v4983_v25 = vsel %vm184_vm5, %v4975_v56, %v4976_v46  ;;  %v6187_v3 = vrot.slane %v9975_v9, 4  ;;  %v6184_v33 = vrot.slane %v10312_v7, 4  ;;  %v10516_v35 = vpop.permute.xlu0 %5646 }
 0x5a6   :  { %6996 = vmatprep.subr.bf16.mxu1 %v10946_v28  ;;  %v4984_v38 = vsel %vm186_vm2, %v10348_v22, %v4983_v25  ;;  %v6434_v24 = vmul.bf16 %v6431_v57, %v10004_v50  ;;  %v6185_v8 = vrot.slane %v9957_v54, 4  ;;  %v6182_v55 = vrot.slane %v10204_v20, 4 }
 0x5a7   :  { %5886 = vrot.lane.b32.xlu1 %v5868_v23, %s7751_s11  ;;  %v7512_v5 = vcombine.high %v4984_v38, %v4986_v44  ;;  %v6194_v30 = vsel %vm184_vm5, %v6186_v1, %v6187_v3  ;;  %v7511_v22 = vcombine.low %v4984_v38, %v4986_v44  ;;  %v6181_v9 = vrot.slane %v9992_v47, 4  ;;  %v10950_v47 = vld [vmem:[#allocation25_spill] sm:$0xff]  ;;  %v10955_v1 = vld [vmem:[#allocation31_spill] sm:$0xff] }
 0x5a8   :  { %v6183_v23 = vrot.slane %v10008_v11, 4  ;;  %v6180_v26 = vrot.slane %v10143_v27, 4  ;;  %v6192_v43 = vsel %vm184_vm5, %v6184_v33, %v6185_v8  ;;  %v6195_v54 = vsel %vm1401_vm9, %v10392_v42, %v6194_v30  ;;  %v10957_v8 = vld [vmem:[#allocation21_spill] sm:$0xff] }
 0x5a9   :  { %v10482_v40 = vpop.permute.xlu1 %5779  ;;  %6997 = vmatpush1.bf16.msra.mxu1 %v10947_v16  ;;  %v6440_v34 = vmul.bf16 %v6431_v57, %v10948_v32  ;;  %v6017_v56 = vrot.slane %v10464_v49, 4  ;;  %v6193_v11 = vsel %vm1401_vm9, %v10312_v7, %v6192_v43  ;;  %v10952_v16 = vld [vmem:[#allocation28_spill] sm:$0xff]  ;;  %v6015_v46 = vrot.slane %v10362_v63, 4  ;;  %v10539_v29 = vpop.permute.xlu0 %5420 }
 0x5aa   :  { %6998 = vmatprep.subr.bf16.mxu1 %v7520_v4  ;;  %v6190_v53 = vsel %vm184_vm5, %v6182_v55, %v6183_v23  ;;  %v10949_v4 = vld [vmem:[#allocation24_spill] sm:$0xff]  ;;  %v6018_v42 = vrot.slane %v10952_v16, 4  ;;  %v7568_v59 = vcombine.high %v6193_v11, %v6195_v54  ;;  %v5085_v38 = vrot.slane %v10389_v0, 4 }
 0x5ab   :  { %5894 = vrot.lane.b32.xlu1 %v5872_v52, %s7751_s11  ;;  %v10951_v41 = vcombine.high %v10949_v4, %v10950_v47  ;;  %v6188_v52 = vsel %vm184_vm5, %v6180_v26, %v6181_v9  ;;  %v10954_v7 = vcombine.low %v10949_v4, %v10950_v47  ;;  %v6014_v55 = vrot.slane %v10957_v8, 4  ;;  %v6570_v26 = vld [vmem:[%s10813_s5] sm:$0xff]  ;;  %v10959_v43 = vld [vmem:[#allocation20_spill] sm:$0xff] }
 0x5ac   :  { %v6025_v3 = vsel %vm184_vm5, %v6017_v56, %v6018_v42  ;;  %v7567_v30 = vcombine.low %v6193_v11, %v6195_v54  ;;  %v5199_v47 = vrot.slane %v10398_v51, 4  ;;  %v10960_v42 = vld [vmem:[#allocation29_spill] sm:$0xff] }
 0x5ad   :  { %v10501_v21 = vpop.permute.xlu1 %6220  ;;  %6999 = vmatpush1.bf16.msra.mxu1 %v7519_v19  ;;  %v10953_v19 = vld [vmem:[#allocation30_spill] sm:$0xff]  ;;  %v10572_v11 = vpop.permute.xlu0 %5078 }
 0x5ae   :  { %7000 = vmatprep.subr.bf16.mxu1 %v7516_v31  ;;  %v6016_v25 = vrot.slane %v10953_v19, 4  ;;  %v6191_v31 = vsel %vm1401_vm9, %v10204_v20, %v6190_v53  ;;  %v6189_v20 = vsel %vm1401_vm9, %v10143_v27, %v6188_v52  ;;  %v6026_v53 = vsel %vm484_vm3, %v10464_v49, %v6025_v3  ;;  %v10961_v49 = vld [vmem:[#allocation13_spill] sm:$0xff] }
 0x5af   :  { %6458 = vrot.lane.b32.xlu1 %v6438_v61, %s7752_s12  ;;  %v6436_v61 = vmul.bf16 %v6431_v57, %v10002_v45  ;;  %v7564_v23 = vcombine.high %v6189_v20, %v6191_v31  ;;  %v5789_v27 = vrot.slane %v10482_v40, 4  ;;  %v5790_v52 = vrot.slane %v10960_v42, 4 }
 0x5b0   :  { %v6023_v9 = vsel %vm184_vm5, %v6015_v46, %v6016_v25  ;;  %v6237_v46 = vrot.slane %v10961_v49, 4 }
 0x5b1   :  { %v10510_v15 = vpop.permute.xlu1 %5636  ;;  %7001 = vmatpush1.bf16.msra.mxu1 %v7515_v37  ;;  %v6013_v37 = vrot.slane %v10955_v1, 4  ;;  %v6024_v19 = vsel %vm484_vm3, %v10362_v63, %v6023_v9  ;;  %v5797_v3 = vsel %vm184_vm5, %v5789_v27, %v5790_v52 }
 0x5b2   :  { %7002 = vmatprep.subr.bf16.mxu1 %v7512_v5  ;;  %v10956_v5 = vld [vmem:[#allocation23_spill] sm:$0xff]  ;;  %v7560_v51 = vcombine.high %v6024_v19, %v6026_v53 }
 0x5b3   :  { %6450 = vrot.lane.b32.xlu1 %v6434_v24, %s7752_s12  ;;  %v6012_v24 = vrot.slane %v10956_v5, 4  ;;  %v6021_v4 = vsel %vm184_vm5, %v6013_v37, %v6014_v55  ;;  %v10962_v37 = vld [vmem:[#allocation16_spill] sm:$0xff] }
 0x5b5   :  { %v10525_v28 = vpop.permute.xlu1 %5410  ;;  %7003 = vmatpush1.bf16.msra.mxu1 %v7511_v22  ;;  %v10958_v22 = vld [vmem:[#allocation27_spill] sm:$0xff] }
 0x5b6   :  { %7004 = vmatprep.subr.bf16.mxu1 %v10951_v41  ;;  %v6011_v57 = vrot.slane %v10958_v22, 4  ;;  %v6236_v41 = vrot.slane %v10501_v21, 4 }
 0x5b7   :  { %6462 = vrot.lane.b32.xlu1 %v6440_v34, %s7752_s12  ;;  %v5788_v34 = vrot.slane %v10959_v43, 4 }
 0x5b8   :  { %v6019_v25 = vsel %vm184_vm5, %v6011_v57, %v6012_v24  ;;  %v6244_v5 = vsel %vm184_vm5, %v6236_v41, %v6237_v46  ;;  %v10599_v57 = vpop.permute.xlu0 %5194 }
 0x5b9   :  { %v5069_v44 = vpop.permute.xlu1 %5068  ;;  %7005 = vmatpush1.bf16.msra.mxu1 %v10954_v7 }
 0x5ba   :  { %v5084_v33 = vrot.slane %v5069_v44, 4  ;;  %7006 = vmatprep.subr.bf16.mxu1 %v7568_v59  ;;  %v7563_v59 = vcombine.low %v6189_v20, %v6191_v31  ;;  %v6022_v31 = vsel %vm484_vm3, %v10955_v1, %v6021_v4  ;;  %v6020_v1 = vsel %vm484_vm3, %v10958_v22, %v6019_v25 }
 0x5bb   :  { %6454 = vrot.lane.b32.xlu1 %v6436_v61, %s7752_s12  ;;  %v6572_v61 = vld [vmem:[%s10813_s5 + $0x10] sm:$0xff]  ;;  %v7559_v20 = vcombine.low %v6024_v19, %v6026_v53  ;;  %v7555_v27 = vcombine.low %v6020_v1, %v6022_v31  ;;  %s7759_s5 = smov [#allocation9]  }
 0x5bc   :  { %v5092_v0 = vsel %vm184_vm5, %v5084_v33, %v5085_v38  ;;  %v6239_v38 = vrot.slane %v10962_v37, 4  ;;  %s7224_s29 = sshll.u32 %s7759_s5, 4  ;;  %s7225_s29 = int_to_ptr.vmem [resolvable:$true] %s7224_s29 }
 0x5bd   :  { %v10567_v54 = vsel %vm186_vm2, %v5069_v44, %v5092_v0  ;;  %v5185_v56 = vpop.permute.xlu1 %5184  ;;  %7007 = vmatpush2.bf16.msra.mxu1 %v7567_v30  ;;  %v5787_v44 = vrot.slane %v10378_v39, 4  ;;  %v7556_v0 = vcombine.high %v6020_v1, %v6022_v31  ;;  %v5657_v31 = vrot.slane %v10516_v35, 4  ;;  %s7717_s30 = scalar_lea.vmem %s7225_s29, 2048  ;;  %p7722_p11 = scmp.lt.s32.totalorder %s7225_s29, %s7225_s29 }
 0x5be   :  { %v5198_v16 = vrot.slane %v5185_v56, 4  ;;  %7008 = vmatprep.subr.bf16.mxu1 %v7564_v23  ;;  %v5798_v23 = vsel %vm714_vm0, %v10482_v40, %v5797_v3  ;;  %v5652_v3 = vrot.slane %v10510_v15, 4  ;;  %p7718_p10 = scmp.ne.s32.totalorder %s7225_s29, %s7717_s30  ;;  %p7723_p12 = scmp.lt.s32.totalorder %s7717_s30, %s7717_s30 }
 0x5bf   :  { %6576 = vperm.xlu1 %7618, %v6570_v26   ;;  %v5795_v30 = vsel %vm184_vm5, %v5787_v44, %v5788_v34  ;;  %v10606_v26 = vsel %vm1401_vm9, %v10501_v21, %v6244_v5  ;;  %v5651_v21 = vpop.permute.xlu0 %5650 }
 0x5c0   :  { %v5206_v7 = vsel %vm184_vm5, %v5198_v16, %v5199_v47  ;;  %v5796_v40 = vsel %vm714_vm0, %v10378_v39, %v5795_v30  ;;  %p7724_p13 = por %p7723_p12, %p7722_p11 }
 0x5c1   :  { %v10589_v63 = vsel %vm356_vm7, %v5185_v56, %v5206_v7  ;;  %v6225_v33 = vpop.permute.xlu1 %6224  ;;  %7009 = vmatpush2.bf16.msra.mxu1 %v7563_v59  ;;  %v7552_v56 = vcombine.high %v5796_v40, %v5798_v23  ;;  %v7551_v47 = vcombine.low %v5796_v40, %v5798_v23 }
 0x5c2   :  { %v7517_v24 = vcombine.low %v10462_v58, %v10589_v63  ;;  %v7518_v8 = vcombine.high %v10462_v58, %v10589_v63  ;;  %v6238_v55 = vrot.slane %v6225_v33, 4  ;;  %7010 = vmatprep.subr.bf16.mxu1 %v7560_v51  ;;  %p7725_p0 = pnand %p7724_p13, %p7718_p10 }
 0x5c3   :  { %6586 = vperm.xlu1 %7618, %v6572_v61   ;;  %v10621_v16 = vpop.permute.xlu0 %5769 }
 0x5c4   :  { %v6246_v9 = vsel %vm184_vm5, %v6238_v55, %v6239_v38  ;;  %v5655_v38 = vrot.slane %v10420_v2, 4  ;;  %v5659_v55 = vrot.slane %v5651_v21, 4 }
 0x5c5   :  { %v10609_v43 = vsel %vm1401_vm9, %v6225_v33, %v6246_v9  ;;  %v5641_v22 = vpop.permute.xlu1 %5640  ;;  %7011 = vmatpush2.bf16.msra.mxu1 %v7559_v20  ;;  %v5653_v33 = vrot.slane %v10364_v62, 4 }
 0x5c6   :  { %v7565_v34 = vcombine.low %v10606_v26, %v10609_v43  ;;  %v7566_v53 = vcombine.high %v10606_v26, %v10609_v43  ;;  %7012 = vmatprep.subr.bf16.mxu1 %v7556_v0  ;;  %v5654_v61 = vrot.slane %v5641_v22, 4 }
 0x5c7   :  { %v5425_v49 = vpop.permute.xlu0 %5424  ;;  %v5660_v0 = vsel %vm184_vm5, %v5652_v3, %v5653_v33 }
 0x5c8   :  { %v5662_v1 = vsel %vm184_vm5, %v5654_v61, %v5655_v38  ;;  %v5661_v61 = vsel %vm759_vm6, %v10510_v15, %v5660_v0  ;;  %v5429_v38 = vrot.slane %v10442_v17, 4  ;;  %v5433_v33 = vrot.slane %v5425_v49, 4 }
 0x5c9   :  { %v10617_v4 = vpop.permute.xlu1 %5414  ;;  %7013 = vmatpush2.bf16.msra.mxu1 %v7555_v27  ;;  %v5663_v2 = vsel %vm759_vm6, %v5641_v22, %v5662_v1  ;;  %v5201_v17 = vrot.slane %v10498_v36, 4 }
 0x5ca   :  { %7014 = vmatprep.subr.bf16.mxu1 %v7552_v56  ;;  %v5428_v40 = vrot.slane %v10617_v4, 4  ;;  %v7534_v22 = vcombine.high %v5661_v61, %v5663_v2 }
 0x5cb   :  { %v10627_v59 = vpop.permute.xlu0 %5773 }
 0x5cc   :  { %v5436_v1 = vsel %vm184_vm5, %v5428_v40, %v5429_v38  ;;  %v5786_v49 = vrot.slane %v10627_v59, 4 }
 0x5cd   :  { %v10619_v41 = vpop.permute.xlu1 %5072  ;;  %7015 = vmatpush2.bf16.msra.mxu1 %v7551_v47  ;;  %v5437_v40 = vsel %vm529_vm4, %v10617_v4, %v5436_v1 }
 0x5cf   :  { %v10631_v25 = vpop.permute.xlu0 %6118 }
 0x5d1   :  { %v10623_v42 = vpop.permute.xlu1 %5188 }
 0x5d3   :  { %v10635_v51 = vpop.permute.xlu0 %6122 }
 0x5d5   :  { %v10625_v52 = vpop.permute.xlu1 %6228 }
 0x5d7   :  { %v10644_v20 = vpop.permute.xlu0 %5082 }
 0x5d9   :  { %v5645_v46 = vpop.permute.xlu1 %5644 }
 0x5da   :  { %v5656_v37 = vrot.slane %v5645_v46, 4 }
 0x5db   :  { %v10658_v3 = vpop.permute.xlu0 %6110 }
 0x5dc   :  { %v5664_v30 = vsel %vm184_vm5, %v5656_v37, %v5657_v31  ;;  %v5426_v37 = vrot.slane %v10525_v28, 4  ;;  %v5431_v31 = vrot.slane %v10539_v29, 4  ;;  %v5203_v29 = vrot.slane %v10599_v57, 4 }
 0x5dd   :  { %v5419_v39 = vpop.permute.xlu1 %5418  ;;  %v5665_v35 = vsel %vm759_vm6, %v5645_v46, %v5664_v30  ;;  %v5427_v46 = vrot.slane %v10380_v10, 4  ;;  %v5784_v10 = vrot.slane %v10621_v16, 4 }
 0x5de   :  { %v5430_v56 = vrot.slane %v5419_v39, 4 }
 0x5df   :  { %v5434_v0 = vsel %vm184_vm5, %v5426_v37, %v5427_v46 }
 0x5e0   :  { %v5438_v15 = vsel %vm184_vm5, %v5430_v56, %v5431_v31  ;;  %v5435_v37 = vsel %vm529_vm4, %v10525_v28, %v5434_v0  ;;  %v7655_v0 = vld [vmem:[#allocation2 + $0x24] ss:$16 sps:$4 sm:$0xff]  }
 0x5e1   :  { %v10629_v19 = vpop.permute.xlu1 %5076  ;;  %v5439_v56 = vsel %vm529_vm4, %v5419_v39, %v5438_v15  ;;  %v7526_v38 = vcombine.high %v5435_v37, %v5437_v40  ;;  %v7525_v28 = vcombine.low %v5435_v37, %v5437_v40 }
 0x5e5   :  { %v10633_v44 = vpop.permute.xlu1 %5192 }
 0x5e9   :  { %v10637_v7 = vpop.permute.xlu1 %6232 }
 0x5ed   :  { %v5649_v5 = vpop.permute.xlu1 %5648 }
 0x5ee   :  { %v5658_v9 = vrot.slane %v5649_v5, 4 }
 0x5f0   :  { %v5666_v23 = vsel %vm184_vm5, %v5658_v9, %v5659_v55 }
 0x5f1   :  { %v5667_v27 = vsel %vm759_vm6, %v5649_v5, %v5666_v23  ;;  %v5768_v62 = vpop.permute.xlu1 %5767  ;;  %v5202_v5 = vrot.slane %v10633_v44, 4  ;;  %v7533_v23 = vcombine.low %v5661_v61, %v5663_v2  ;;  %v10676_v2 = vpop.permute.xlu0 %6114 }
 0x5f2   :  { %v7537_v21 = vcombine.low %v5665_v35, %v5667_v27  ;;  %v7538_v47 = vcombine.high %v5665_v35, %v5667_v27  ;;  %v5783_v30 = vrot.slane %v5768_v62, 4  ;;  %v5200_v35 = vrot.slane %v10623_v42, 4 }
 0x5f3   :  { %v5210_v36 = vsel %vm184_vm5, %v5202_v5, %v5203_v29 }
 0x5f4   :  { %7096 = vmatprep.subr.bf16.mxu0 %v7538_v47  ;;  %v5791_v16 = vsel %vm184_vm5, %v5783_v30, %v5784_v10  ;;  %v5208_v4 = vsel %vm184_vm5, %v5200_v35, %v5201_v17  ;;  %v5211_v31 = vsel %vm356_vm7, %v10633_v44, %v5210_v36  ;;  %v5088_v17 = vrot.slane %v10629_v19, 4 }
 0x5f5   :  { %v5423_v55 = vpop.permute.xlu1 %5422  ;;  %7097 = vmatpush1.bf16.msra.mxu0 %v7537_v21  ;;  %v5209_v1 = vsel %vm356_vm7, %v10623_v42, %v5208_v4  ;;  %v10691_v15 = vpop.permute.xlu0 %5892  ;;  %v5089_v42 = vrot.slane %v10572_v11, 4  ;;  %v5091_v10 = vrot.slane %v10644_v20, 4  ;;  %v6240_v20 = vrot.slane %v10625_v52, 4  ;;  %v10966_v4 = vld [vmem:[#allocation14_spill] sm:$0xff] }
 0x5f6   :  { %v5432_v9 = vrot.slane %v5423_v55, 4  ;;  %7098 = vmatprep.subr.bf16.mxu0 %v7534_v22  ;;  %v5792_v22 = vsel %vm714_vm0, %v5768_v62, %v5791_v16  ;;  %v7522_v30 = vcombine.high %v5209_v1, %v5211_v31  ;;  %v5086_v62 = vrot.slane %v10619_v41, 4  ;;  %v10714_v16 = vld [vmem:[#allocation7] ss:$12 sps:$4 sm:$0xff]  }
 0x5f7   :  { %v7521_v29 = vcombine.low %v5209_v1, %v5211_v31  ;;  %v5096_v40 = vsel %vm184_vm5, %v5088_v17, %v5089_v42  ;;  %v6127_v17 = vrot.slane %v10676_v2, 4 }
 0x5f8   :  { %v5440_v27 = vsel %vm184_vm5, %v5432_v9, %v5433_v33  ;;  %v7657_v9 = vld [vmem:[#allocation2 + $0x28] ss:$16 sps:$4 sm:$0xff]  }
 0x5f9   :  { %v5441_v57 = vsel %vm529_vm4, %v5423_v55, %v5440_v27  ;;  %v5772_v21 = vpop.permute.xlu1 %5771  ;;  %7099 = vmatpush1.bf16.msra.mxu0 %v7533_v23  ;;  %v5087_v23 = vrot.slane %v10469_v14, 4  ;;  %v10701_v27 = vpop.permute.xlu0 %5896  ;;  %v10964_v14 = vld [vmem:[#allocation15_spill] sm:$0xff] }
 0x5fa   :  { %v7529_v59 = vcombine.low %v5439_v56, %v5441_v57  ;;  %v7530_v47 = vcombine.high %v5439_v56, %v5441_v57  ;;  %v5785_v61 = vrot.slane %v5772_v21, 4  ;;  %v6242_v56 = vrot.slane %v10637_v7, 4 }
 0x5fb   :  { %v5094_v35 = vsel %vm184_vm5, %v5086_v62, %v5087_v23  ;;  %v10963_v57 = vcombine.high %v9891_v6, %v9889_v60  ;;  %v6243_v11 = vrot.slane %v10964_v14, 4  ;;  %v6129_v62 = vrot.slane %v10631_v25, 4 }
 0x5fc   :  { %v5793_v39 = vsel %vm184_vm5, %v5785_v61, %v5786_v49  ;;  %7100 = vmatprep.subr.bf16.mxu0 %v7530_v47  ;;  %v5097_v47 = vsel %vm186_vm2, %v10629_v19, %v5096_v40 }
 0x5fd   :  { %v5794_v46 = vsel %vm714_vm0, %v5772_v21, %v5793_v39  ;;  %v10687_v33 = vpop.permute.xlu1 %6116  ;;  %7101 = vmatpush1.bf16.msra.mxu0 %v7529_v59  ;;  %v5095_v59 = vsel %vm186_vm2, %v10619_v41, %v5094_v35  ;;  %v6241_v39 = vrot.slane %v10966_v4, 4  ;;  %v6250_v41 = vsel %vm184_vm5, %v6242_v56, %v6243_v11 }
 0x5fe   :  { %v7547_v5 = vcombine.low %v5792_v22, %v5794_v46  ;;  %v7548_v55 = vcombine.high %v5792_v22, %v5794_v46  ;;  %7102 = vmatprep.subr.bf16.mxu0 %v7526_v38  ;;  %v10727_v38 = vld [vmem:[#allocation7 + $0x1c] ss:$12 sps:$4 sm:$0xff]   ;;  %v7510_v19 = vcombine.high %v10567_v54, %v5095_v59  ;;  %v7509_v58 = vcombine.low %v10567_v54, %v5095_v59 }
 0x5ff   :  { %v6248_v46 = vsel %vm184_vm5, %v6240_v20, %v6241_v39  ;;  %v5903_v11 = vrot.slane %v10691_v15, 4  ;;  %v5905_v59 = vrot.slane %v10701_v27, 4 }
 0x600   :  { %7016 = vmatprep.subr.bf16.mxu1 %v7548_v55  ;;  %v6249_v63 = vsel %vm1401_vm9, %v10625_v52, %v6248_v46  ;;  %v10740_v55 = vld [vmem:[#allocation7 + $0x18] ss:$12 sps:$4 sm:$0xff]   ;;  %v6131_v52 = vrot.slane %v10635_v51, 4 }
 0x601   :  { %v10693_v44 = vpop.permute.xlu1 %6108  ;;  %7017 = vmatpush2.bf16.msra.mxu1 %v7547_v5  ;;  %7103 = vmatpush1.bf16.msra.mxu0 %v7525_v28  ;;  %v5885_v5 = vpop.permute.xlu0 %5884 }
 0x602   :  { %7018 = vmatprep.subr.bf16.mxu1 %v7657_v9  ;;  %7104 = vmatprep.subr.bf16.mxu0 %v7522_v30  ;;  %v6128_v30 = vrot.slane %v10687_v33, 4  ;;  %v6124_v54 = vrot.slane %v10693_v44, 4 }
 0x604   :  { %v6136_v23 = vsel %vm184_vm5, %v6128_v30, %v6129_v62 }
 0x605   :  { %v5081_v49 = vpop.permute.xlu1 %5080  ;;  %7019 = vmatpush2.bf16.msra.mxu1 %v7655_v0  ;;  %7105 = vmatpush1.bf16.msra.mxu0 %v7521_v29  ;;  %v5889_v1 = vpop.permute.xlu0 %5888  ;;  %v6125_v0 = vrot.slane %v10658_v3, 4 }
 0x606   :  { %v5090_v36 = vrot.slane %v5081_v49, 4  ;;  %7020 = vmatprep.subr.bf16.mxu1 %v10963_v57  ;;  %7106 = vmatprep.subr.bf16.mxu0 %v7518_v8  ;;  %v10965_v8 = vcombine.low %v9891_v6, %v9889_v60  ;;  %v6251_v60 = vsel %vm1401_vm9, %v10637_v7, %v6250_v41  ;;  %v5901_v20 = vrot.slane %v5889_v1, 4 }
 0x607   :  { %v7569_v7 = vcombine.low %v6249_v63, %v6251_v60  ;;  %v6132_v2 = vsel %vm184_vm5, %v6124_v54, %v6125_v0 }
 0x608   :  { %v5098_v21 = vsel %vm184_vm5, %v5090_v36, %v5091_v10  ;;  %v6133_v14 = vsel %vm484_vm3, %v10693_v44, %v6132_v2 }
 0x609   :  { %v5099_v61 = vsel %vm186_vm2, %v5081_v49, %v5098_v21  ;;  %v6113_v37 = vpop.permute.xlu1 %6112  ;;  %7021 = vmatpush2.bf16.msra.mxu1 %v10965_v8  ;;  %7107 = vmatpush1.bf16.msra.mxu0 %v7517_v24  ;;  %v7570_v24 = vcombine.high %v6249_v63, %v6251_v60  ;;  %v6461_v25 = vpop.permute.xlu0 %6460  ;;  %v6137_v49 = vsel %vm484_vm3, %v10687_v33, %v6136_v23 }
 0x60a   :  { %v7513_v31 = vcombine.low %v5097_v47, %v5099_v61  ;;  %v7514_v22 = vcombine.high %v5097_v47, %v5099_v61  ;;  %v6126_v9 = vrot.slane %v6113_v37, 4  ;;  %v5899_v61 = vrot.slane %v5885_v5, 4 }
 0x60c   :  { %7023 = vmatmul.mubr.bf16.vlgmr.msra.gmra.mxu1 %v10714_v16  ;;  %7108 = vmatprep.subr.bf16.mxu0 %v7514_v22  ;;  %v6134_v42 = vsel %vm184_vm5, %v6126_v9, %v6127_v17 }
 0x60d   :  { %v5891_v6 = vpop.permute.xlu1 %5890  ;;  %7109 = vmatpush1.bf16.msra.mxu0 %v7513_v31  ;;  %7032 = vmatprep.mubr.bf16.mxu1 %v10727_v38  ;;  %v6135_v35 = vsel %vm484_vm3, %v6113_v37, %v6134_v42  ;;  %v6465_v26 = vpop.permute.xlu0 %6464  ;;  %v10968_v42 = vcombine.low %v10026_v48, %v10948_v32 }
 0x60e   :  { %7110 = vmatprep.subr.bf16.mxu0 %v7510_v19  ;;  %v5902_v56 = vrot.slane %v5891_v6, 4  ;;  %v7558_v33 = vcombine.high %v6133_v14, %v6135_v35  ;;  %v7557_v8 = vcombine.low %v6133_v14, %v6135_v35  ;;  %v6473_v1 = vrot.slane %v6465_v26, 4 }
 0x610   :  { %v5910_v43 = vsel %vm184_vm5, %v5902_v56, %v5903_v11 }
 0x611   :  { %v5883_v28 = vpop.permute.xlu1 %5882  ;;  %7111 = vmatpush1.bf16.msra.mxu0 %v7509_v58  ;;  %v5911_v4 = vsel %vm714_vm0, %v5891_v6, %v5910_v43  ;;  %v6453_v46 = vpop.permute.xlu0 %6452 }
 0x612   :  { %7112 = vmatprep.subr.bf16.mxu0 %v7570_v24  ;;  %v5898_v21 = vrot.slane %v5883_v28, 4  ;;  %v6471_v24 = vrot.slane %v6461_v25, 4  ;;  %v6467_v17 = vrot.slane %v6453_v46, 4 }
 0x614   :  { %7033 = vmatmul.mubr.bf16.gmra.mxu1 %v10740_v55  ;;  %v5906_v44 = vsel %vm184_vm5, %v5898_v21, %v5899_v61 }
 0x615   :  { %v6121_v29 = vpop.permute.xlu1 %6120  ;;  %7113 = vmatpush2.bf16.msra.mxu0 %v7569_v7  ;;  %7181 = vmatprep.mubr.bf16.mxu1 %v10928_v18  ;;  %v5907_v19 = vsel %vm714_vm0, %v5883_v28, %v5906_v44  ;;  %v6457_v30 = vpop.permute.xlu0 %6456  ;;  %v10967_v28 = vcombine.high %v10026_v48, %v10948_v32  ;;  %v10970_v48 = vcombine.low %v10004_v50, %v10002_v45 }
 0x616   :  { %v6130_v10 = vrot.slane %v6121_v29, 4  ;;  %7114 = vmatprep.subr.bf16.mxu0 %v7566_v53 }
 0x618   :  { %v6138_v51 = vsel %vm184_vm5, %v6130_v10, %v6131_v52  ;;  %v6469_v52 = vrot.slane %v6457_v30, 4 }
 0x619   :  { %v6139_v3 = vsel %vm484_vm3, %v6121_v29, %v6138_v51  ;;  %v5887_v40 = vpop.permute.xlu1 %5886  ;;  %7115 = vmatpush2.bf16.msra.mxu0 %v7565_v34  ;;  %v6582_v21 = vpop.permute.xlu0 %6581 }
 0x61a   :  { %v7561_v36 = vcombine.low %v6137_v49, %v6139_v3  ;;  %v7562_v53 = vcombine.high %v6137_v49, %v6139_v3  ;;  %v5900_v57 = vrot.slane %v5887_v40, 4  ;;  %v10969_v49 = vcombine.high %v10004_v50, %v10002_v45 }
 0x61c   :  { %7116 = vmatprep.subr.bf16.mxu0 %v7562_v53  ;;  %v5908_v34 = vsel %vm184_vm5, %v5900_v57, %v5901_v20 }
 0x61d   :  { %v5895_v47 = vpop.permute.xlu1 %5894  ;;  %7117 = vmatpush2.bf16.msra.mxu0 %v7561_v36  ;;  %v5909_v39 = vsel %vm714_vm0, %v5887_v40, %v5908_v34 }
 0x61e   :  { %v5904_v37 = vrot.slane %v5895_v47, 4  ;;  %7118 = vmatprep.subr.bf16.mxu0 %v7558_v33  ;;  %v7550_v5 = vcombine.high %v5907_v19, %v5909_v39  ;;  %v7549_v63 = vcombine.low %v5907_v19, %v5909_v39  ;;  %v6592_v39 = vpop.permute.xlu0 %6591 }
 0x620   :  { %v5912_v15 = vsel %vm184_vm5, %v5904_v37, %v5905_v59 }
 0x621   :  { %v5913_v27 = vsel %vm714_vm0, %v5895_v47, %v5912_v15  ;;  %v6459_v41 = vpop.permute.xlu1 %6458  ;;  %7119 = vmatpush2.bf16.msra.mxu0 %v7557_v8 }
 0x622   :  { %v7553_v31 = vcombine.low %v5911_v4, %v5913_v27  ;;  %v7554_v22 = vcombine.high %v5911_v4, %v5913_v27  ;;  %v6470_v58 = vrot.slane %v6459_v41, 4 }
 0x624   :  { %7120 = vmatprep.subr.bf16.mxu0 %v7554_v22  ;;  %v6478_v9 = vsel %vm184_vm5, %v6470_v58, %v6471_v24 }
 0x625   :  { %v6451_v60 = vpop.permute.xlu1 %6450  ;;  %7121 = vmatpush2.bf16.msra.mxu0 %v7553_v31  ;;  %v6479_v29 = vsel %vm140_vm1, %v6459_v41, %v6478_v9 }
 0x626   :  { %7122 = vmatprep.subr.bf16.mxu0 %v7550_v5  ;;  %v6466_v7 = vrot.slane %v6451_v60, 4 }
 0x628   :  { %v6474_v10 = vsel %vm184_vm5, %v6466_v7, %v6467_v17 }
 0x629   :  { %v6463_v6 = vpop.permute.xlu1 %6462  ;;  %7123 = vmatpush2.bf16.msra.mxu0 %v7549_v63  ;;  %v6475_v3 = vsel %vm140_vm1, %v6451_v60, %v6474_v10 }
 0x62a   :  { %v6472_v62 = vrot.slane %v6463_v6, 4  ;;  %7124 = vmatprep.subr.bf16.mxu0 %v10967_v28 }
 0x62c   :  { %v6480_v54 = vsel %vm184_vm5, %v6472_v62, %v6473_v1 }
 0x62d   :  { %v6481_v0 = vsel %vm140_vm1, %v6463_v6, %v6480_v54  ;;  %v6455_v23 = vpop.permute.xlu1 %6454  ;;  %7125 = vmatpush2.bf16.msra.mxu0 %v10968_v42 }
 0x62e   :  { %v7577_v25 = vcombine.low %v6479_v29, %v6481_v0  ;;  %v7578_v2 = vcombine.high %v6479_v29, %v6481_v0  ;;  %v6468_v51 = vrot.slane %v6455_v23, 4  ;;  %7126 = vmatprep.subr.bf16.mxu0 %v10969_v49 }
 0x630   :  { %v6476_v35 = vsel %vm184_vm5, %v6468_v51, %v6469_v52  ;;  %7161 = vmatprep.subr.bf16.mxu1 %v7578_v2 }
 0x631   :  { %v6477_v40 = vsel %vm140_vm1, %v6455_v23, %v6476_v35  ;;  %7127 = vmatpush2.bf16.msra.mxu0 %v10970_v48  ;;  %7162 = vmatpush1.bf16.msra.mxu1 %v7577_v25 }
 0x632   :  { %v7573_v32 = vcombine.low %v6475_v3, %v6477_v40  ;;  %v7574_v56 = vcombine.high %v6475_v3, %v6477_v40 }
 0x634   :  { %7129 = vmatmul.mubr.bf16.vlgmr.msra.gmra.mxu0 %v10714_v16  ;;  %7163 = vmatprep.subr.bf16.mxu1 %v7574_v56 }
 0x635   :  { %7164 = vmatpush1.bf16.msra.mxu1 %v7573_v32  ;;  %7138 = vmatprep.mubr.bf16.mxu0 %v10727_v38 }
 0x638   :  { %7581 = vmatmul.mubr.msk.bf16.vlgmr.msra.gmra.mxu1 %vm2197_vm8, %v10346_v12 }
 0x639   :  { %7191 = vmatprep.mubr.bf16.mxu1 %v10928_v18 }
 0x63a   :  { %v6577_v53 = vpop.permute.xlu1 %6576 }
 0x63c   :  { %7139 = vmatmul.mubr.bf16.gmra.mxu0 %v10740_v55 }
 0x63e   :  { %v6587_v26 = vpop.permute.xlu1 %6586 }
 0x640   :  { %7582 = vmatmul.mubr.msk.bf16.gmra.mxu1 %vm2197_vm8, %v10422_v13 }
 0x644   :  { %v7077_v45 = vpop.f32.mrf.mxu0 }
 0x646   :  { %v7079_v50 = vpop.f32.mrf.mxu0 }
 0x648   :  { %v7081_v36 = vpop.f32.mrf.mxu0 }
 0x64a   :  { %v7083_v57 = vpop.f32.mrf.mxu0 }
 0x659   :  { %v7087_v20 = vpop.f32.mrf.mxu0 }
 0x65b   :  { %v7089_v47 = vpop.f32.mrf.mxu0 }
 0x65d   :  { %v7091_v44 = vpop.f32.mrf.mxu0 }
 0x65f   :  { %v7093_v19 = vpop.f32.mrf.mxu0 }
 0x6cc   :  { %v7024_v16 = vpop.f32.mrf.mxu1 }
 0x6cd   :  { %v7025_v14 = vadd.f32 %v7024_v16, %v6577_v53 }
 0x6ce   :  { %v7026_v11 = vpop.f32.mrf.mxu1 }
 0x6cf   :  { %v7078_v38 = vadd.f32 %v7077_v45, %v7025_v14  ;;  %v7027_v33 = vadd.f32 %v7026_v11, %v6577_v53 }
 0x6d0   :  { %v7028_v12 = vpop.f32.mrf.mxu1 }
 0x6d1   :  { %7202 = vst [vmem:[#allocation9] sm:$0xff] %v7078_v38  ;;  %v7080_v18 = vadd.f32 %v7079_v50, %v7027_v33  ;;  %v7029_v59 = vadd.f32 %v7028_v12, %v6582_v21 }
 0x6d2   :  { %v7030_v55 = vpop.f32.mrf.mxu1 }
 0x6d3   :  { %7203 = vst [vmem:[#allocation9 + $0x8] sm:$0xff] %v7080_v18  ;;  %v7082_v13 = vadd.f32 %v7081_v36, %v7029_v59  ;;  %v7031_v61 = vadd.f32 %v7030_v55, %v6582_v21 }
 0x6d4   :  { %v7034_v43 = vpop.f32.mrf.mxu1 }
 0x6d5   :  { %7204 = vst [vmem:[#allocation9 + $0x10] sm:$0xff] %v7082_v13  ;;  %v7084_v34 = vadd.f32 %v7083_v57, %v7031_v61  ;;  %v7035_v37 = vadd.f32 %v7034_v43, %v6587_v26 }
 0x6d6   :  { %v7036_v8 = vpop.f32.mrf.mxu1 }
 0x6d7   :  { %7205 = vst [vmem:[#allocation9 + $0x18] sm:$0xff] %v7084_v34  ;;  %v7037_v15 = vadd.f32 %v7036_v8, %v6587_v26  ;;  %v7088_v4 = vadd.f32 %v7087_v20, %v7035_v37 }
 0x6d8   :  { %v7038_v27 = vpop.f32.mrf.mxu1 }
 0x6d9   :  { %7206 = vst [vmem:[#allocation9 + $0x20] sm:$0xff] %v7088_v4  ;;  %v7039_v41 = vadd.f32 %v7038_v27, %v6592_v39  ;;  %v7090_v31 = vadd.f32 %v7089_v47, %v7037_v15 }
 0x6da   :  { %v7040_v22 = vpop.f32.mrf.mxu1 }
 0x6db   :  { %7207 = vst [vmem:[#allocation9 + $0x28] sm:$0xff] %v7090_v31  ;;  %v7041_v46 = vadd.f32 %v7040_v22, %v6592_v39  ;;  %v7092_v5 = vadd.f32 %v7091_v44, %v7039_v41 }
 0x6dd   :  { %7208 = vst [vmem:[#allocation9 + $0x30] sm:$0xff] %v7092_v5  ;;  %v7094_v60 = vadd.f32 %v7093_v19, %v7041_v46 }
 0x6df   :  { %7209 = vst [vmem:[#allocation9 + $0x38] sm:$0xff] %v7094_v60 }
 0x6f4   :  { %v7130_v58 = vpop.f32.mrf.mxu0 }
 0x6f5   :  { %v7131_v24 = vadd.f32 %v7130_v58, %v6577_v53 }
 0x6f6   :  { %v7132_v63 = vpop.f32.mrf.mxu0 }
 0x6f7   :  { %v7133_v30 = vadd.f32 %v7132_v63, %v6577_v53 }
 0x6f8   :  { %v7134_v6 = vpop.f32.mrf.mxu0  ;;  %v7183_v1 = vpop.f32.mrf.mxu1 }
 0x6f9   :  { %v7184_v9 = vadd.f32 %v7183_v1, %v7131_v24  ;;  %v7135_v28 = vadd.f32 %v7134_v6, %v6582_v21 }
 0x6fa   :  { %v7136_v7 = vpop.f32.mrf.mxu0  ;;  %v7185_v62 = vpop.f32.mrf.mxu1 }
 0x6fb   :  { %7211 = vst [vmem:[#allocation9 + $0x40] sm:$0xff] %v7184_v9  ;;  %v7186_v17 = vadd.f32 %v7185_v62, %v7133_v30  ;;  %v7137_v29 = vadd.f32 %v7136_v7, %v6582_v21 }
 0x6fc   :  { %v7140_v54 = vpop.f32.mrf.mxu0  ;;  %v7187_v52 = vpop.f32.mrf.mxu1 }
 0x6fd   :  { %7212 = vst [vmem:[#allocation9 + $0x48] sm:$0xff] %v7186_v17  ;;  %v7188_v0 = vadd.f32 %v7187_v52, %v7135_v28  ;;  %v7141_v10 = vadd.f32 %v7140_v54, %v6587_v26 }
 0x6fe   :  { %v7142_v23 = vpop.f32.mrf.mxu0  ;;  %v7189_v42 = vpop.f32.mrf.mxu1 }
 0x6ff   :  { %7213 = vst [vmem:[#allocation9 + $0x50] sm:$0xff] %v7188_v0  ;;  %v7190_v25 = vadd.f32 %v7189_v42, %v7137_v29  ;;  %v7143_v49 = vadd.f32 %v7142_v23, %v6587_v26 }
 0x700   :  { %v7144_v2 = vpop.f32.mrf.mxu0  ;;  %v7193_v51 = vpop.f32.mrf.mxu1 }
 0x701   :  { %7214 = vst [vmem:[#allocation9 + $0x58] sm:$0xff] %v7190_v25  ;;  %v7194_v35 = vadd.f32 %v7193_v51, %v7141_v10  ;;  %v7145_v48 = vadd.f32 %v7144_v2, %v6592_v39 }
 0x702   :  { %v7146_v3 = vpop.f32.mrf.mxu0  ;;  %v7195_v40 = vpop.f32.mrf.mxu1 }
 0x703   :  { %7215 = vst [vmem:[#allocation9 + $0x60] sm:$0xff] %v7194_v35  ;;  %v7196_v32 = vadd.f32 %v7195_v40, %v7143_v49  ;;  %v7147_v45 = vadd.f32 %v7146_v3, %v6592_v39 }
 0x704   :  { %v7197_v56 = vpop.f32.mrf.mxu1 }
 0x705   :  { %7216 = vst [vmem:[#allocation9 + $0x68] sm:$0xff] %v7196_v32  ;;  %v7198_v50 = vadd.f32 %v7197_v56, %v7145_v48 }
 0x706   :  { %v7199_v36 = vpop.f32.mrf.mxu1 }
 0x707   :  { %7217 = vst [vmem:[#allocation9 + $0x70] sm:$0xff] %v7198_v50  ;;  %v7200_v53 = vadd.f32 %v7199_v36, %v7147_v45 }
 0x709   :  { %7218 = vst [vmem:[#allocation9 + $0x78] sm:$0xff] %v7200_v53 }
 0x70a   :  { %7728 = shalt.err (!%p7725_p0)
}
 0x70b   :  { %s7760_s7 = smov 256  }
 0x70c   :  { %7230 = dma.vmem_to_hbm [thread:$0]  %s7225_s29, 2048, %s10814_s6, [#allocation6], %s7760_s7, %s7760_s7, %s7757_s17  }
 0x70d   :  { %7741 = dma.done.wait [#allocation6], 2048  }
 0x70e   :  { %7742 = vsyncadd [#allocation6], 4294965248 }
 0x70f   :  { %7234 = vsyncpa [#allocation5], 1 }
 0x710   :  { %7235 = vsyncpa [#allocation8], 1 }
 0x711   :  { %7236 = vsyncpa [#allocation6], 1 }

</bundles_post_ra>
